<compile_context>
chip_gen: v6e
topology: v6e:2x2x1
jax: 0.10.0
libtpu: 0.0.40
codegen_flags: <defaults>
</compile_context>

<pallas_src>
import functools

import jax
import jax.numpy as jnp
from jax.experimental import pallas as pl
from jax.experimental.pallas import tpu as pltpu

LN_EPS = 1e-5
NEG_INF = -1e9

LAYER_PARAM_NAMES = (
    "ln1_g", "ln1_b", "qkv_w", "qkv_b", "attn_ow", "attn_ob",
    "ln2_g", "ln2_b", "mlp_w1", "mlp_b1", "mlp_w2", "mlp_b2",
)


# ----------------------------- shared math (kernel + pure-JAX reference) -------

def _layer_norm(x, gamma, beta):
    x = x.astype(jnp.float32)
    mu = jnp.mean(x, axis=-1, keepdims=True)
    var = jnp.mean((x - mu) ** 2, axis=-1, keepdims=True)
    return (x - mu) * jax.lax.rsqrt(var + LN_EPS) * gamma + beta


def _dense(x, w, b=None):
    """x @ w (+ b) with bf16 operands and f32 accumulation."""
    *lead, d = x.shape
    y = jnp.dot(x.reshape(-1, d).astype(jnp.bfloat16), w.astype(jnp.bfloat16),
                preferred_element_type=jnp.float32)
    y = y.reshape(*lead, w.shape[-1])
    if b is not None:
        y = y + b
    return y


def _gelu(x):
    # GPT-2 "gelu_new" (tanh approximation); tanh goes to the EUP.
    return 0.5 * x * (1.0 + jnp.tanh(0.7978845608028654 * (x + 0.044715 * x * x * x)))


def _mhsa(x, w_qkv, b_qkv, w_o, b_o, bias, n_heads, *, approx_recip):
    """Causal MHSA on a single (S, E) sequence; heads batched per contraction."""
    S, E = x.shape
    dh = E // n_heads
    scale = 1.0 / float(dh) ** 0.5
    qkv = _dense(x, w_qkv, b_qkv)                                   # (S, 3E) f32
    # Lane-aligned head slices (dh is a multiple of 128 in the demo), batched on
    # a leading head axis.  Softmax scale folded into q in f32 (S*dh VALU pass,
    # not S*S per head) before the bf16 cast.
    q = jnp.stack([qkv[:, h * dh:(h + 1) * dh] for h in range(n_heads)], 0) * scale
    k = jnp.stack([qkv[:, E + h * dh:E + (h + 1) * dh] for h in range(n_heads)], 0)
    v = jnp.stack([qkv[:, 2 * E + h * dh:2 * E + (h + 1) * dh]
                   for h in range(n_heads)], 0)                     # (H, S, dh)
    s = jnp.einsum('hqd,hkd->hqk', q.astype(jnp.bfloat16), k.astype(jnp.bfloat16),
                   preferred_element_type=jnp.float32)              # (H, S, S) f32
    s = s + bias[None]                                              # causal + padding
    s = s - jnp.max(s, axis=-1, keepdims=True)
    p = jnp.exp(s)
    den = jnp.sum(p, axis=-1, keepdims=True)
    if approx_recip:
        p = p * pl.reciprocal(den, approx=True)                     # EUP, not VALU divide
    else:
        p = p / den
    ctx = jnp.einsum('hqk,hkd->hqd', p.astype(jnp.bfloat16), v.astype(jnp.bfloat16),
                     preferred_element_type=jnp.float32)            # (H, S, dh)
    attn = jnp.concatenate([ctx[h] for h in range(n_heads)], axis=-1)   # (S, E)
    return _dense(attn, w_o, b_o)


def _gpt2_block(x, bias, p, n_heads, *, approx_recip):
    """Pre-LN GPT-2 transformer block on (S, E) (dropout = identity)."""
    (ln1_g, ln1_b, qkv_w, qkv_b, ao_w, ao_b,
     ln2_g, ln2_b, w1, b1, w2, b2) = p
    x = x + _mhsa(_layer_norm(x, ln1_g, ln1_b), qkv_w, qkv_b, ao_w, ao_b,
                  bias, n_heads, approx_recip=approx_recip)
    x = x + _dense(_gelu(_dense(_layer_norm(x, ln2_g, ln2_b), w1, b1)), w2, b2)
    return x


def _pad_bias(attn_mask, B, S):
    """Additive padding bias (B, 1, S): 0 where attended, -1e9 where padded."""
    if attn_mask is None:
        return jnp.zeros((B, 1, S), jnp.float32)
    return ((1.0 - attn_mask.astype(jnp.float32)) * NEG_INF)[:, None, :]


def _round_up(x, m):
    return (x + m - 1) // m * m


def _vmem_limit_bytes():
    """Chip-aware VMEM limit: ~52 MiB on v7x (64 MiB phys), ~112 MiB on v5e/v6e."""
    cap = 64 * 1024 * 1024
    try:
        info = pltpu.get_tpu_info()
        cap = int(getattr(info, "vmem_capacity_bytes", cap))
    except Exception:
        pass
    return max(32 * 1024 * 1024, min(cap - 12 * 1024 * 1024, 112 * 1024 * 1024))


# ----------------------------- Pallas kernels ----------------------------------

def gpt2_blocks_kernel(x0_ref, pad_ref,
                       ln1g_ref, ln1b_ref, qkvw_ref, qkvb_ref, aow_ref, aob_ref,
                       ln2g_ref, ln2b_ref, w1_ref, b1_ref, w2_ref, b2_ref,
                       lnfg_ref, lnfb_ref,
                       h_ref, x_sc, *, n_heads):
    # grid = (B, L): axis 0 = batch tile ("parallel"), axis 1 = layer ("arbitrary").
    l = pl.program_id(1)

    @pl.when(l == 0)
    def _():
        # Seed the f32 residual-stream carry from (embed + wpe), computed in the wrapper.
        x_sc[...] = x0_ref[0].astype(jnp.float32)

    # In-kernel causal mask (no (B,S,S) bias DMA'd / resident) + (1,S) padding bias.
    S = x_sc.shape[0]
    row = jax.lax.broadcasted_iota(jnp.int32, (S, S), 0)
    col = jax.lax.broadcasted_iota(jnp.int32, (S, S), 1)
    causal = jnp.where(col <= row, 0.0, NEG_INF).astype(jnp.float32)   # (S, S)
    bias = causal + pad_ref[0]                                         # + (1, S) keys pad

    layer_p = (ln1g_ref[0], ln1b_ref[0], qkvw_ref[0], qkvb_ref[0],
               aow_ref[0], aob_ref[0], ln2g_ref[0], ln2b_ref[0],
               w1_ref[0], b1_ref[0], w2_ref[0], b2_ref[0])
    x = _gpt2_block(x_sc[...], bias, layer_p, n_heads, approx_recip=True)
    x_sc[...] = x

    @pl.when(l == pl.num_programs(1) - 1)
    def _():
        # Final LayerNorm; emit bf16 hidden state (halves HBM h traffic).
        h_ref[...] = _layer_norm(x, lnfg_ref[...], lnfb_ref[...]
                                 )[None].astype(h_ref.dtype)


def lm_head_kernel(h_ref, wte_ref, o_ref):
    # (tm, E) bf16 @ (E, tv) bf16 -> f32 logits tile (lane-dense tv).
    o_ref[...] = jnp.dot(h_ref[...], wte_ref[...],
                         preferred_element_type=jnp.float32)


# ----------------------------- wrappers -----------------------------------------

def _lm_head(h2, wte_t, vmem_limit):
    """Tied-embedding LM head, tiled over rows and vocab (rows innermost so each
    wte tile is streamed from HBM once); vocab padded to the tile multiple."""
    M, E = h2.shape
    V = wte_t.shape[1]
    tv = min(2048, _round_up(V, 256))          # big, 256-multiple vocab tiles
    tm = min(512, _round_up(M, 16))            # bounded row tiles (bf16 sublane-friendly)
    Mp, Vp = _round_up(M, tm), _round_up(V, tv)
    if Mp != M:
        h2 = jnp.pad(h2, ((0, Mp - M), (0, 0)))
    if Vp != V:
        wte_t = jnp.pad(wte_t, ((0, 0), (0, Vp - V)))

    flops = 2 * Mp * E * Vp
    bytes_acc = E * Vp * 2 + (Vp // tv) * Mp * E * 2 + Mp * Vp * 4

    logits = pl.pallas_call(
        lm_head_kernel,
        out_shape=jax.ShapeDtypeStruct((Mp, Vp), jnp.float32),
        grid_spec=pltpu.PrefetchScalarGridSpec(
            num_scalar_prefetch=0,
            grid=(Vp // tv, Mp // tm),         # rows innermost: wte tile DMA'd once
            in_specs=[pl.BlockSpec((tm, E), lambda j, i: (i, 0)),
                      pl.BlockSpec((E, tv), lambda j, i: (0, j))],
            out_specs=pl.BlockSpec((tm, tv), lambda j, i: (i, j))),
        compiler_params=pltpu.CompilerParams(
            dimension_semantics=("parallel", "parallel"),
            vmem_limit_bytes=vmem_limit),
        cost_estimate=pl.CostEstimate(flops=int(flops), transcendentals=0,
                                      bytes_accessed=int(bytes_acc)),
    )(h2, wte_t)
    return logits[:M, :V]


def text_decoder_forward(embed, params, attn_mask=None, *, n_heads):
    embed = jnp.asarray(embed, jnp.float32)
    B, S, E = embed.shape
    L = params["qkv_w"].shape[0]
    F = params["mlp_w1"].shape[-1]
    V = params["wte_t"].shape[-1]

    # inputs_embeds + positional embeddings folded in the wrapper (one cheap XLA add).
    x0 = embed + params["wpe"][:S][None].astype(jnp.float32)          # (B, S, E) f32
    pad = _pad_bias(attn_mask, B, S)                                   # (B, 1, S) f32
    vmem_limit = _vmem_limit_bytes()

    layer_args = [params[name] for name in LAYER_PARAM_NAMES]

    def batch_spec(arr):        # (B, ...) blocks indexed by batch tile, constant over l
        return pl.BlockSpec((1,) + tuple(arr.shape[1:]), lambda b, l: (b, 0, 0))

    def layer_spec(arr):        # (L, ...) per-layer weight blocks, streamed over l
        return pl.BlockSpec((1,) + tuple(arr.shape[1:]), lambda b, l: (l, 0, 0))

    def const_spec(arr):        # grid-invariant (final LN params): single buffer
        return pl.BlockSpec(tuple(arr.shape), lambda b, l: (0, 0),
                            pipeline_mode=pl.Buffered(1))

    in_specs = ([batch_spec(x0), batch_spec(pad)]
                + [layer_spec(a) for a in layer_args]
                + [const_spec(params["lnf_g"]), const_spec(params["lnf_b"])])

    weight_bytes = sum(int(a.size) * a.dtype.itemsize for a in layer_args)
    flops_blocks = int(L * (2 * B * S * E * 3 * E      # qkv proj
                            + 4 * B * S * S * E        # scores + PV
                            + 2 * B * S * E * E        # attn out proj
                            + 4 * B * S * E * F))      # MLP
    bytes_blocks = int(B * weight_bytes                # weights re-streamed per batch tile
                       + B * S * E * 4                 # x0 read (f32)
                       + B * S * E * 2                 # h write (bf16)
                       + B * S * 4)                    # padding bias
    trans_blocks = int(L * B * (n_heads * S * S + S * F))

    hidden = pl.pallas_call(
        functools.partial(gpt2_blocks_kernel, n_heads=n_heads),
        out_shape=jax.ShapeDtypeStruct((B, S, E), jnp.bfloat16),
        grid_spec=pltpu.PrefetchScalarGridSpec(
            num_scalar_prefetch=0,
            grid=(B, L),
            in_specs=in_specs,
            out_specs=pl.BlockSpec((1, S, E), lambda b, l: (b, 0, 0)),
            scratch_shapes=[pltpu.VMEM((S, E), jnp.float32)]),
        compiler_params=pltpu.CompilerParams(
            dimension_semantics=("parallel", "arbitrary"),
            vmem_limit_bytes=vmem_limit),
        cost_estimate=pl.CostEstimate(flops=flops_blocks,
                                      transcendentals=trans_blocks,
                                      bytes_accessed=bytes_blocks),
    )(x0, pad, *layer_args, params["lnf_g"], params["lnf_b"])

    logits = _lm_head(hidden.reshape(B * S, E), params["wte_t"], vmem_limit)
    return logits.reshape(B, S, V)


# ----------------------------- pure-JAX reference --------------------------------

def text_decoder_ref(embed, params, attn_mask=None, *, n_heads):
    embed = jnp.asarray(embed, jnp.float32)
    B, S, E = embed.shape
    L = params["qkv_w"].shape[0]
    pos = jnp.arange(S)
    causal = jnp.where(pos[None, :] <= pos[:, None], 0.0, NEG_INF).astype(jnp.float32)
    bias = causal[None] + _pad_bias(attn_mask, B, S)                   # (B, S, S)
    x = embed + params["wpe"][:S][None].astype(jnp.float32)
    for l in range(L):
        layer_p = tuple(params[name][l] for name in LAYER_PARAM_NAMES)
        x = jnp.stack([_gpt2_block(x[b], bias[b], layer_p, n_heads, approx_recip=False)
                       for b in range(B)], 0)
    x = _layer_norm(x.reshape(B * S, E), params["lnf_g"], params["lnf_b"])
    logits = jnp.dot(x.astype(jnp.bfloat16), params["wte_t"],
                     preferred_element_type=jnp.float32)
    return logits.reshape(B, S, -1)


# ----------------------------- params --------------------------------------------

def init_params(key, *, num_layers, embed_size, n_heads, vocab_size, max_seq, fwd_exp=4):
    """Deterministic synthetic GPT-2-style params.  Weight matrices are stored
    pre-transposed to (in, out) layout and in bf16 (matmul operands); biases and
    LayerNorm params stay f32."""
    E, F, L, V = embed_size, embed_size * fwd_exp, num_layers, vocab_size
    assert E % n_heads == 0
    ks = jax.random.split(key, 6)
    std = 0.02

    def w(k, shape):
        return (jax.random.normal(k, shape, jnp.float32) * std).astype(jnp.bfloat16)

    return dict(
        wpe=jax.random.normal(ks[0], (max_seq, E), jnp.float32) * 0.01,
        ln1_g=jnp.ones((L, 1, E), jnp.float32), ln1_b=jnp.zeros((L, 1, E), jnp.float32),
        qkv_w=w(ks[1], (L, E, 3 * E)), qkv_b=jnp.zeros((L, 1, 3 * E), jnp.float32),
        attn_ow=w(ks[2], (L, E, E)), attn_ob=jnp.zeros((L, 1, E), jnp.float32),
        ln2_g=jnp.ones((L, 1, E), jnp.float32), ln2_b=jnp.zeros((L, 1, E), jnp.float32),
        mlp_w1=w(ks[3], (L, E, F)), mlp_b1=jnp.zeros((L, 1, F), jnp.float32),
        mlp_w2=w(ks[4], (L, F, E)), mlp_b2=jnp.zeros((L, 1, E), jnp.float32),
        lnf_g=jnp.ones((1, E), jnp.float32), lnf_b=jnp.zeros((1, E), jnp.float32),
        wte_t=w(ks[5], (E, V)),                 # tied embedding, stored (E, V)
    )


# ----------------------------- demo ----------------------------------------------

if __name__ == "__main__":
    # Small, lane-dense demo shapes (head_dim = 256/2 = 128).
    B, S, E, H, L, V = 2, 8, 256, 2, 2, 512

    key = jax.random.PRNGKey(0)
    kp, ke = jax.random.split(key)
    params = init_params(kp, num_layers=L, embed_size=E, n_heads=H,
                         vocab_size=V, max_seq=S)
    embed = jax.random.normal(ke, (B, S, E), jnp.float32)
    # attention_mask like HF: 1 = attend, 0 = padding (pad last token of sequence 1)
    attn_mask = jnp.ones((B, S), jnp.float32).at[1, S - 1].set(0.0)

    logits = text_decoder_forward(embed, params, attn_mask, n_heads=H)
    logits = jax.block_until_ready(logits)
    assert logits.shape == (B, S, V), logits.shape

    ref = text_decoder_ref(embed, params, attn_mask, n_heads=H)
    max_err = float(jnp.max(jnp.abs(logits - ref)))
    assert jnp.allclose(logits, ref, atol=2e-2, rtol=2e-2), max_err

    # attn_mask=None path (forward default)
    logits2 = jax.block_until_ready(text_decoder_forward(embed, params, None, n_heads=H))
    assert logits2.shape == (B, S, V), logits2.shape

    print("KERNEL_OK")
</pallas_src>

<mosaic_0001>
module attributes {stable_mosaic.version = 11 : i64} {
  func.func @gpt2_blocks_kernel(%arg0: i32, %arg1: i32, %arg2: memref<1x8x256xf32, #tpu.memory_space<vmem>>, %arg3: memref<1x1x8xf32, #tpu.memory_space<vmem>>, %arg4: memref<1x1x256xf32, #tpu.memory_space<vmem>>, %arg5: memref<1x1x256xf32, #tpu.memory_space<vmem>>, %arg6: memref<1x256x768xbf16, #tpu.memory_space<vmem>>, %arg7: memref<1x1x768xf32, #tpu.memory_space<vmem>>, %arg8: memref<1x256x256xbf16, #tpu.memory_space<vmem>>, %arg9: memref<1x1x256xf32, #tpu.memory_space<vmem>>, %arg10: memref<1x1x256xf32, #tpu.memory_space<vmem>>, %arg11: memref<1x1x256xf32, #tpu.memory_space<vmem>>, %arg12: memref<1x256x1024xbf16, #tpu.memory_space<vmem>>, %arg13: memref<1x1x1024xf32, #tpu.memory_space<vmem>>, %arg14: memref<1x1024x256xbf16, #tpu.memory_space<vmem>>, %arg15: memref<1x1x256xf32, #tpu.memory_space<vmem>>, %arg16: memref<1x256xf32, #tpu.memory_space<vmem>>, %arg17: memref<1x256xf32, #tpu.memory_space<vmem>>, %arg18: memref<1x8x256xbf16, #tpu.memory_space<vmem>>, %arg19: memref<8x256xf32, #tpu.memory_space<vmem>>) attributes {dimension_semantics = [#tpu.dimension_semantics<parallel>, #tpu.dimension_semantics<arbitrary>], iteration_bounds = array<i64: 2, 2>, scalar_prefetch = 0 : i64, scratch_operands = 1 : i64, tpu.core_type = #tpu.core_type<tc>, window_params = [{transform_indices = @transform_0, window_bounds = array<i64: 1, 8, 256>}, {transform_indices = @transform_1, window_bounds = array<i64: 1, 1, 8>}, {transform_indices = @transform_2, window_bounds = array<i64: 1, 1, 256>}, {transform_indices = @transform_3, window_bounds = array<i64: 1, 1, 256>}, {transform_indices = @transform_4, window_bounds = array<i64: 1, 256, 768>}, {transform_indices = @transform_5, window_bounds = array<i64: 1, 1, 768>}, {transform_indices = @transform_6, window_bounds = array<i64: 1, 256, 256>}, {transform_indices = @transform_7, window_bounds = array<i64: 1, 1, 256>}, {transform_indices = @transform_8, window_bounds = array<i64: 1, 1, 256>}, {transform_indices = @transform_9, window_bounds = array<i64: 1, 1, 256>}, {transform_indices = @transform_10, window_bounds = array<i64: 1, 256, 1024>}, {transform_indices = @transform_11, window_bounds = array<i64: 1, 1, 1024>}, {transform_indices = @transform_12, window_bounds = array<i64: 1, 1024, 256>}, {transform_indices = @transform_13, window_bounds = array<i64: 1, 1, 256>}, {pipeline_mode = #tpu.pipeline_mode<synchronous>, transform_indices = @transform_14, window_bounds = array<i64: 1, 256>}, {pipeline_mode = #tpu.pipeline_mode<synchronous>, transform_indices = @transform_15, window_bounds = array<i64: 1, 256>}, {transform_indices = @transform_16, window_bounds = array<i64: 1, 8, 256>}]} {
    %c0_i32 = arith.constant 0 : i32
    %0 = arith.cmpi eq, %arg1, %c0_i32 : i32
    %1 = arith.extui %0 : i1 to i32
    %c0_i32_0 = arith.constant 0 : i32
    %2 = arith.cmpi ne, %1, %c0_i32_0 : i32
    scf.if %2 {
      %c0_68 = arith.constant 0 : index
      %c0_69 = arith.constant 0 : index
      %c0_70 = arith.constant 0 : index
      %158 = vector.load %arg2[%c0_68, %c0_69, %c0_70] : memref<1x8x256xf32, #tpu.memory_space<vmem>>, vector<1x8x256xf32>
      %159 = vector.shape_cast %158 : vector<1x8x256xf32> to vector<8x256xf32>
      %c0_71 = arith.constant 0 : index
      %c0_72 = arith.constant 0 : index
      %160 = vector.load %arg19[%c0_71, %c0_72] : memref<8x256xf32, #tpu.memory_space<vmem>>, vector<8x256xf32>
      tpu.vector_store %arg19[%c0_71, %c0_72], %159 {strides = array<i32>} : memref<8x256xf32, #tpu.memory_space<vmem>>, vector<8x256xf32>,
    } else {
    }
    %3 = tpu.iota {dimensions = array<i32: 0>} : vector<8x8xi32>
    %4 = tpu.iota {dimensions = array<i32: 1>} : vector<8x8xi32>
    %5 = arith.cmpi sle, %4, %3 : vector<8x8xi32>
    %cst = arith.constant 0.000000e+00 : f32
    %cst_1 = arith.constant -1.000000e+09 : f32
    %6 = vector.broadcast %cst : f32 to vector<8x8xf32>
    %7 = vector.broadcast %cst_1 : f32 to vector<8x8xf32>
    %8 = arith.select %5, %6, %7 : vector<8x8xi1>, vector<8x8xf32>
    %c0 = arith.constant 0 : index
    %c0_2 = arith.constant 0 : index
    %c0_3 = arith.constant 0 : index
    %9 = vector.load %arg3[%c0, %c0_2, %c0_3] : memref<1x1x8xf32, #tpu.memory_space<vmem>>, vector<1x1x8xf32>
    %10 = vector.shape_cast %9 : vector<1x1x8xf32> to vector<1x8xf32>
    %11 = vector.broadcast %10 : vector<1x8xf32> to vector<8x8xf32>
    %12 = arith.addf %8, %11 : vector<8x8xf32>
    %c0_4 = arith.constant 0 : index
    %c0_5 = arith.constant 0 : index
    %c0_6 = arith.constant 0 : index
    %13 = vector.load %arg4[%c0_4, %c0_5, %c0_6] : memref<1x1x256xf32, #tpu.memory_space<vmem>>, vector<1x1x256xf32>
    %14 = vector.shape_cast %13 : vector<1x1x256xf32> to vector<1x256xf32>
    %c0_7 = arith.constant 0 : index
    %c0_8 = arith.constant 0 : index
    %c0_9 = arith.constant 0 : index
    %15 = vector.load %arg5[%c0_7, %c0_8, %c0_9] : memref<1x1x256xf32, #tpu.memory_space<vmem>>, vector<1x1x256xf32>
    %16 = vector.shape_cast %15 : vector<1x1x256xf32> to vector<1x256xf32>
    %c0_10 = arith.constant 0 : index
    %c0_11 = arith.constant 0 : index
    %c0_12 = arith.constant 0 : index
    %17 = vector.load %arg6[%c0_10, %c0_11, %c0_12] : memref<1x256x768xbf16, #tpu.memory_space<vmem>>, vector<1x256x768xbf16>
    %18 = vector.shape_cast %17 : vector<1x256x768xbf16> to vector<256x768xbf16>
    %c0_13 = arith.constant 0 : index
    %c0_14 = arith.constant 0 : index
    %c0_15 = arith.constant 0 : index
    %19 = vector.load %arg7[%c0_13, %c0_14, %c0_15] : memref<1x1x768xf32, #tpu.memory_space<vmem>>, vector<1x1x768xf32>
    %20 = vector.shape_cast %19 : vector<1x1x768xf32> to vector<1x768xf32>
    %c0_16 = arith.constant 0 : index
    %c0_17 = arith.constant 0 : index
    %c0_18 = arith.constant 0 : index
    %21 = vector.load %arg8[%c0_16, %c0_17, %c0_18] : memref<1x256x256xbf16, #tpu.memory_space<vmem>>, vector<1x256x256xbf16>
    %22 = vector.shape_cast %21 : vector<1x256x256xbf16> to vector<256x256xbf16>
    %c0_19 = arith.constant 0 : index
    %c0_20 = arith.constant 0 : index
    %c0_21 = arith.constant 0 : index
    %23 = vector.load %arg9[%c0_19, %c0_20, %c0_21] : memref<1x1x256xf32, #tpu.memory_space<vmem>>, vector<1x1x256xf32>
    %24 = vector.shape_cast %23 : vector<1x1x256xf32> to vector<1x256xf32>
    %c0_22 = arith.constant 0 : index
    %c0_23 = arith.constant 0 : index
    %c0_24 = arith.constant 0 : index
    %25 = vector.load %arg10[%c0_22, %c0_23, %c0_24] : memref<1x1x256xf32, #tpu.memory_space<vmem>>, vector<1x1x256xf32>
    %26 = vector.shape_cast %25 : vector<1x1x256xf32> to vector<1x256xf32>
    %c0_25 = arith.constant 0 : index
    %c0_26 = arith.constant 0 : index
    %c0_27 = arith.constant 0 : index
    %27 = vector.load %arg11[%c0_25, %c0_26, %c0_27] : memref<1x1x256xf32, #tpu.memory_space<vmem>>, vector<1x1x256xf32>
    %28 = vector.shape_cast %27 : vector<1x1x256xf32> to vector<1x256xf32>
    %c0_28 = arith.constant 0 : index
    %c0_29 = arith.constant 0 : index
    %c0_30 = arith.constant 0 : index
    %29 = vector.load %arg12[%c0_28, %c0_29, %c0_30] : memref<1x256x1024xbf16, #tpu.memory_space<vmem>>, vector<1x256x1024xbf16>
    %30 = vector.shape_cast %29 : vector<1x256x1024xbf16> to vector<256x1024xbf16>
    %c0_31 = arith.constant 0 : index
    %c0_32 = arith.constant 0 : index
    %c0_33 = arith.constant 0 : index
    %31 = vector.load %arg13[%c0_31, %c0_32, %c0_33] : memref<1x1x1024xf32, #tpu.memory_space<vmem>>, vector<1x1x1024xf32>
    %32 = vector.shape_cast %31 : vector<1x1x1024xf32> to vector<1x1024xf32>
    %c0_34 = arith.constant 0 : index
    %c0_35 = arith.constant 0 : index
    %c0_36 = arith.constant 0 : index
    %33 = vector.load %arg14[%c0_34, %c0_35, %c0_36] : memref<1x1024x256xbf16, #tpu.memory_space<vmem>>, vector<1x1024x256xbf16>
    %34 = vector.shape_cast %33 : vector<1x1024x256xbf16> to vector<1024x256xbf16>
    %c0_37 = arith.constant 0 : index
    %c0_38 = arith.constant 0 : index
    %c0_39 = arith.constant 0 : index
    %35 = vector.load %arg15[%c0_37, %c0_38, %c0_39] : memref<1x1x256xf32, #tpu.memory_space<vmem>>, vector<1x1x256xf32>
    %36 = vector.shape_cast %35 : vector<1x1x256xf32> to vector<1x256xf32>
    %c0_40 = arith.constant 0 : index
    %c0_41 = arith.constant 0 : index
    %37 = vector.load %arg19[%c0_40, %c0_41] : memref<8x256xf32, #tpu.memory_space<vmem>>, vector<8x256xf32>
    %cst_42 = arith.constant dense<0.000000e+00> : vector<8xf32>
    %38 = vector.multi_reduction <add>, %37, %cst_42 [1] : vector<8x256xf32> to vector<8xf32>
    %39 = vector.shape_cast %38 : vector<8xf32> to vector<8x1xf32>
    %cst_43 = arith.constant 2.560000e+02 : f32
    %40 = vector.broadcast %cst_43 : f32 to vector<8x1xf32>
    %41 = arith.divf %39, %40 : vector<8x1xf32>
    %42 = vector.broadcast %41 : vector<8x1xf32> to vector<8x256xf32>
    %43 = arith.subf %37, %42 : vector<8x256xf32>
    %44 = arith.mulf %43, %43 : vector<8x256xf32>
    %cst_44 = arith.constant dense<0.000000e+00> : vector<8xf32>
    %45 = vector.multi_reduction <add>, %44, %cst_44 [1] : vector<8x256xf32> to vector<8xf32>
    %46 = vector.shape_cast %45 : vector<8xf32> to vector<8x1xf32>
    %cst_45 = arith.constant 2.560000e+02 : f32
    %47 = vector.broadcast %cst_45 : f32 to vector<8x1xf32>
    %48 = arith.divf %46, %47 : vector<8x1xf32>
    %49 = vector.broadcast %41 : vector<8x1xf32> to vector<8x256xf32>
    %50 = arith.subf %37, %49 : vector<8x256xf32>
    %cst_46 = arith.constant 9.99999974E-6 : f32
    %51 = vector.broadcast %cst_46 : f32 to vector<8x1xf32>
    %52 = arith.addf %48, %51 : vector<8x1xf32>
    %53 = math.rsqrt %52 : vector<8x1xf32>
    %54 = vector.broadcast %53 : vector<8x1xf32> to vector<8x256xf32>
    %55 = arith.mulf %50, %54 : vector<8x256xf32>
    %56 = vector.broadcast %14 : vector<1x256xf32> to vector<8x256xf32>
    %57 = arith.mulf %55, %56 : vector<8x256xf32>
    %58 = vector.broadcast %16 : vector<1x256xf32> to vector<8x256xf32>
    %59 = arith.addf %57, %58 : vector<8x256xf32>
    %60 = arith.truncf %59 : vector<8x256xf32> to vector<8x256xbf16>
    %cst_47 = arith.constant dense<0.000000e+00> : vector<8x768xf32>
    %61 = tpu.matmul %60, %18, %cst_47 {dimension_numbers = #tpu.dot_dimension_numbers<[1], [0], [0], [1], [0, 0, 1, 1], [], []>} : vector<8x256xbf16>, vector<256x768xbf16>, vector<8x768xf32> -> vector<8x768xf32>
    %62 = vector.broadcast %20 : vector<1x768xf32> to vector<8x768xf32>
    %63 = arith.addf %61, %62 : vector<8x768xf32>
    %64 = vector.extract_strided_slice %63 {offsets = [0, 0], sizes = [8, 128], strides = [1, 1]} : vector<8x768xf32> to vector<8x128xf32>
    %65 = vector.extract_strided_slice %63 {offsets = [0, 128], sizes = [8, 128], strides = [1, 1]} : vector<8x768xf32> to vector<8x128xf32>
    %66 = vector.shape_cast %64 : vector<8x128xf32> to vector<1x8x128xf32>
    %67 = vector.shape_cast %65 : vector<8x128xf32> to vector<1x8x128xf32>
    %68 = tpu.concatenate %66, %67 in 0 : vector<1x8x128xf32>, vector<1x8x128xf32> -> vector<2x8x128xf32>
    %cst_48 = arith.constant 0.0883883461 : f32
    %69 = vector.broadcast %cst_48 : f32 to vector<2x8x128xf32>
    %70 = arith.mulf %68, %69 : vector<2x8x128xf32>
    %71 = vector.extract_strided_slice %63 {offsets = [0, 256], sizes = [8, 128], strides = [1, 1]} : vector<8x768xf32> to vector<8x128xf32>
    %72 = vector.extract_strided_slice %63 {offsets = [0, 384], sizes = [8, 128], strides = [1, 1]} : vector<8x768xf32> to vector<8x128xf32>
    %73 = vector.shape_cast %71 : vector<8x128xf32> to vector<1x8x128xf32>
    %74 = vector.shape_cast %72 : vector<8x128xf32> to vector<1x8x128xf32>
    %75 = tpu.concatenate %73, %74 in 0 : vector<1x8x128xf32>, vector<1x8x128xf32> -> vector<2x8x128xf32>
    %76 = vector.extract_strided_slice %63 {offsets = [0, 512], sizes = [8, 128], strides = [1, 1]} : vector<8x768xf32> to vector<8x128xf32>
    %77 = vector.extract_strided_slice %63 {offsets = [0, 640], sizes = [8, 128], strides = [1, 1]} : vector<8x768xf32> to vector<8x128xf32>
    %78 = vector.shape_cast %76 : vector<8x128xf32> to vector<1x8x128xf32>
    %79 = vector.shape_cast %77 : vector<8x128xf32> to vector<1x8x128xf32>
    %80 = tpu.concatenate %78, %79 in 0 : vector<1x8x128xf32>, vector<1x8x128xf32> -> vector<2x8x128xf32>
    %81 = arith.truncf %70 : vector<2x8x128xf32> to vector<2x8x128xbf16>
    %82 = arith.truncf %75 : vector<2x8x128xf32> to vector<2x8x128xbf16>
    "tpu.trace_start"() <{level = 10 : i32, message = "hqd,hkd->hqk"}> : () -> ()
    %cst_49 = arith.constant dense<0.000000e+00> : vector<2x8x8xf32>
    %83 = tpu.matmul %81, %82, %cst_49 {dimension_numbers = #tpu.dot_dimension_numbers<[2], [2], [1], [1], [0, 0, 0, 1, 1, 1], [0], [0]>} : vector<2x8x128xbf16>, vector<2x8x128xbf16>, vector<2x8x8xf32> -> vector<2x8x8xf32>
    "tpu.trace_stop"() : () -> ()
    %84 = vector.shape_cast %12 : vector<8x8xf32> to vector<1x8x8xf32>
    %85 = vector.broadcast %84 : vector<1x8x8xf32> to vector<2x8x8xf32>
    %86 = arith.addf %83, %85 : vector<2x8x8xf32>
    %cst_50 = arith.constant dense<0xFF800000> : vector<2x8xf32>
    %87 = vector.multi_reduction <maximumf>, %86, %cst_50 [2] : vector<2x8x8xf32> to vector<2x8xf32>
    %88 = vector.shape_cast %87 : vector<2x8xf32> to vector<2x8x1xf32>
    %89 = vector.broadcast %88 : vector<2x8x1xf32> to vector<2x8x8xf32>
    %90 = arith.subf %86, %89 : vector<2x8x8xf32>
    %91 = math.exp %90 : vector<2x8x8xf32>
    %cst_51 = arith.constant dense<0.000000e+00> : vector<2x8xf32>
    %92 = vector.multi_reduction <add>, %91, %cst_51 [2] : vector<2x8x8xf32> to vector<2x8xf32>
    %93 = vector.shape_cast %92 : vector<2x8xf32> to vector<2x8x1xf32>
    %94 = tpu.reciprocal %93 {approx = true} : vector<2x8x1xf32> -> vector<2x8x1xf32>
    %95 = vector.broadcast %94 : vector<2x8x1xf32> to vector<2x8x8xf32>
    %96 = arith.mulf %91, %95 : vector<2x8x8xf32>
    %97 = arith.truncf %96 : vector<2x8x8xf32> to vector<2x8x8xbf16>
    %98 = arith.truncf %80 : vector<2x8x128xf32> to vector<2x8x128xbf16>
    "tpu.trace_start"() <{level = 10 : i32, message = "hqk,hkd->hqd"}> : () -> ()
    %cst_52 = arith.constant dense<0.000000e+00> : vector<2x8x128xf32>
    %99 = tpu.matmul %97, %98, %cst_52 {dimension_numbers = #tpu.dot_dimension_numbers<[2], [1], [1], [2], [0, 0, 0, 1, 1, 2], [0], [0]>} : vector<2x8x8xbf16>, vector<2x8x128xbf16>, vector<2x8x128xf32> -> vector<2x8x128xf32>
    "tpu.trace_stop"() : () -> ()
    %100 = vector.extract_strided_slice %99 {offsets = [0, 0, 0], sizes = [1, 8, 128], strides = [1, 1, 1]} : vector<2x8x128xf32> to vector<1x8x128xf32>
    %101 = vector.shape_cast %100 : vector<1x8x128xf32> to vector<8x128xf32>
    %102 = vector.extract_strided_slice %99 {offsets = [1, 0, 0], sizes = [1, 8, 128], strides = [1, 1, 1]} : vector<2x8x128xf32> to vector<1x8x128xf32>
    %103 = vector.shape_cast %102 : vector<1x8x128xf32> to vector<8x128xf32>
    %104 = tpu.concatenate %101, %103 in 1 : vector<8x128xf32>, vector<8x128xf32> -> vector<8x256xf32>
    %105 = arith.truncf %104 : vector<8x256xf32> to vector<8x256xbf16>
    %cst_53 = arith.constant dense<0.000000e+00> : vector<8x256xf32>
    %106 = tpu.matmul %105, %22, %cst_53 {dimension_numbers = #tpu.dot_dimension_numbers<[1], [0], [0], [1], [0, 0, 1, 1], [], []>} : vector<8x256xbf16>, vector<256x256xbf16>, vector<8x256xf32> -> vector<8x256xf32>
    %107 = vector.broadcast %24 : vector<1x256xf32> to vector<8x256xf32>
    %108 = arith.addf %106, %107 : vector<8x256xf32>
    %109 = arith.addf %37, %108 : vector<8x256xf32>
    %cst_54 = arith.constant dense<0.000000e+00> : vector<8xf32>
    %110 = vector.multi_reduction <add>, %109, %cst_54 [1] : vector<8x256xf32> to vector<8xf32>
    %111 = vector.shape_cast %110 : vector<8xf32> to vector<8x1xf32>
    %cst_55 = arith.constant 2.560000e+02 : f32
    %112 = vector.broadcast %cst_55 : f32 to vector<8x1xf32>
    %113 = arith.divf %111, %112 : vector<8x1xf32>
    %114 = vector.broadcast %113 : vector<8x1xf32> to vector<8x256xf32>
    %115 = arith.subf %109, %114 : vector<8x256xf32>
    %116 = arith.mulf %115, %115 : vector<8x256xf32>
    %cst_56 = arith.constant dense<0.000000e+00> : vector<8xf32>
    %117 = vector.multi_reduction <add>, %116, %cst_56 [1] : vector<8x256xf32> to vector<8xf32>
    %118 = vector.shape_cast %117 : vector<8xf32> to vector<8x1xf32>
    %cst_57 = arith.constant 2.560000e+02 : f32
    %119 = vector.broadcast %cst_57 : f32 to vector<8x1xf32>
    %120 = arith.divf %118, %119 : vector<8x1xf32>
    %121 = vector.broadcast %113 : vector<8x1xf32> to vector<8x256xf32>
    %122 = arith.subf %109, %121 : vector<8x256xf32>
    %cst_58 = arith.constant 9.99999974E-6 : f32
    %123 = vector.broadcast %cst_58 : f32 to vector<8x1xf32>
    %124 = arith.addf %120, %123 : vector<8x1xf32>
    %125 = math.rsqrt %124 : vector<8x1xf32>
    %126 = vector.broadcast %125 : vector<8x1xf32> to vector<8x256xf32>
    %127 = arith.mulf %122, %126 : vector<8x256xf32>
    %128 = vector.broadcast %26 : vector<1x256xf32> to vector<8x256xf32>
    %129 = arith.mulf %127, %128 : vector<8x256xf32>
    %130 = vector.broadcast %28 : vector<1x256xf32> to vector<8x256xf32>
    %131 = arith.addf %129, %130 : vector<8x256xf32>
    %132 = arith.truncf %131 : vector<8x256xf32> to vector<8x256xbf16>
    %cst_59 = arith.constant dense<0.000000e+00> : vector<8x1024xf32>
    %133 = tpu.matmul %132, %30, %cst_59 {dimension_numbers = #tpu.dot_dimension_numbers<[1], [0], [0], [1], [0, 0, 1, 1], [], []>} : vector<8x256xbf16>, vector<256x1024xbf16>, vector<8x1024xf32> -> vector<8x1024xf32>
    %134 = vector.broadcast %32 : vector<1x1024xf32> to vector<8x1024xf32>
    %135 = arith.addf %133, %134 : vector<8x1024xf32>
    %cst_60 = arith.constant 5.000000e-01 : f32
    %136 = vector.broadcast %cst_60 : f32 to vector<8x1024xf32>
    %137 = arith.mulf %136, %135 : vector<8x1024xf32>
    %cst_61 = arith.constant 4.471500e-02 : f32
    %138 = vector.broadcast %cst_61 : f32 to vector<8x1024xf32>
    %139 = arith.mulf %138, %135 : vector<8x1024xf32>
    %140 = arith.mulf %139, %135 : vector<8x1024xf32>
    %141 = arith.mulf %140, %135 : vector<8x1024xf32>
    %142 = arith.addf %135, %141 : vector<8x1024xf32>
    %cst_62 = arith.constant 0.797884583 : f32
    %143 = vector.broadcast %cst_62 : f32 to vector<8x1024xf32>
    %144 = arith.mulf %143, %142 : vector<8x1024xf32>
    %145 = math.tanh %144 : vector<8x1024xf32>
    %cst_63 = arith.constant 1.000000e+00 : f32
    %146 = vector.broadcast %cst_63 : f32 to vector<8x1024xf32>
    %147 = arith.addf %146, %145 : vector<8x1024xf32>
    %148 = arith.mulf %137, %147 : vector<8x1024xf32>
    %149 = arith.truncf %148 : vector<8x1024xf32> to vector<8x1024xbf16>
    %cst_64 = arith.constant dense<0.000000e+00> : vector<8x256xf32>
    %150 = tpu.matmul %149, %34, %cst_64 {dimension_numbers = #tpu.dot_dimension_numbers<[1], [0], [0], [1], [0, 0, 1, 1], [], []>} : vector<8x1024xbf16>, vector<1024x256xbf16>, vector<8x256xf32> -> vector<8x256xf32>
    %151 = vector.broadcast %36 : vector<1x256xf32> to vector<8x256xf32>
    %152 = arith.addf %150, %151 : vector<8x256xf32>
    %153 = arith.addf %109, %152 : vector<8x256xf32>
    %c0_65 = arith.constant 0 : index
    %c0_66 = arith.constant 0 : index
    %154 = vector.load %arg19[%c0_65, %c0_66] : memref<8x256xf32, #tpu.memory_space<vmem>>, vector<8x256xf32>
    tpu.vector_store %arg19[%c0_65, %c0_66], %153 {strides = array<i32>} : memref<8x256xf32, #tpu.memory_space<vmem>>, vector<8x256xf32>,
    %c1_i32 = arith.constant 1 : i32
    %155 = arith.cmpi eq, %arg1, %c1_i32 : i32
    %156 = arith.extui %155 : i1 to i32
    %c0_i32_67 = arith.constant 0 : i32
    %157 = arith.cmpi ne, %156, %c0_i32_67 : i32
    scf.if %157 {
      %c0_68 = arith.constant 0 : index
      %c0_69 = arith.constant 0 : index
      %158 = vector.load %arg16[%c0_68, %c0_69] : memref<1x256xf32, #tpu.memory_space<vmem>>, vector<1x256xf32>
      %c0_70 = arith.constant 0 : index
      %c0_71 = arith.constant 0 : index
      %159 = vector.load %arg17[%c0_70, %c0_71] : memref<1x256xf32, #tpu.memory_space<vmem>>, vector<1x256xf32>
      %cst_72 = arith.constant dense<0.000000e+00> : vector<8xf32>
      %160 = vector.multi_reduction <add>, %153, %cst_72 [1] : vector<8x256xf32> to vector<8xf32>
      %161 = vector.shape_cast %160 : vector<8xf32> to vector<8x1xf32>
      %cst_73 = arith.constant 2.560000e+02 : f32
      %162 = vector.broadcast %cst_73 : f32 to vector<8x1xf32>
      %163 = arith.divf %161, %162 : vector<8x1xf32>
      %164 = vector.broadcast %163 : vector<8x1xf32> to vector<8x256xf32>
      %165 = arith.subf %153, %164 : vector<8x256xf32>
      %166 = arith.mulf %165, %165 : vector<8x256xf32>
      %cst_74 = arith.constant dense<0.000000e+00> : vector<8xf32>
      %167 = vector.multi_reduction <add>, %166, %cst_74 [1] : vector<8x256xf32> to vector<8xf32>
      %168 = vector.shape_cast %167 : vector<8xf32> to vector<8x1xf32>
      %cst_75 = arith.constant 2.560000e+02 : f32
      %169 = vector.broadcast %cst_75 : f32 to vector<8x1xf32>
      %170 = arith.divf %168, %169 : vector<8x1xf32>
      %171 = vector.broadcast %163 : vector<8x1xf32> to vector<8x256xf32>
      %172 = arith.subf %153, %171 : vector<8x256xf32>
      %cst_76 = arith.constant 9.99999974E-6 : f32
      %173 = vector.broadcast %cst_76 : f32 to vector<8x1xf32>
      %174 = arith.addf %170, %173 : vector<8x1xf32>
      %175 = math.rsqrt %174 : vector<8x1xf32>
      %176 = vector.broadcast %175 : vector<8x1xf32> to vector<8x256xf32>
      %177 = arith.mulf %172, %176 : vector<8x256xf32>
      %178 = vector.broadcast %158 : vector<1x256xf32> to vector<8x256xf32>
      %179 = arith.mulf %177, %178 : vector<8x256xf32>
      %180 = vector.broadcast %159 : vector<1x256xf32> to vector<8x256xf32>
      %181 = arith.addf %179, %180 : vector<8x256xf32>
      %182 = vector.shape_cast %181 : vector<8x256xf32> to vector<1x8x256xf32>
      %183 = arith.truncf %182 : vector<1x8x256xf32> to vector<1x8x256xbf16>
      %c0_77 = arith.constant 0 : index
      %c0_78 = arith.constant 0 : index
      %c0_79 = arith.constant 0 : index
      %184 = vector.load %arg18[%c0_77, %c0_78, %c0_79] : memref<1x8x256xbf16, #tpu.memory_space<vmem>>, vector<1x8x256xbf16>
      tpu.vector_store %arg18[%c0_77, %c0_78, %c0_79], %183 {strides = array<i32>} : memref<1x8x256xbf16, #tpu.memory_space<vmem>>, vector<1x8x256xbf16>,
    } else {
    }
    return
  }
  func.func @transform_0(%arg0: i32, %arg1: i32) -> (i32, i32, i32) {
    %c0_i32 = arith.constant 0 : i32
    %c0_i32_0 = arith.constant 0 : i32
    %c0_i32_1 = arith.constant 0 : i32
    return %arg0, %c0_i32, %c0_i32_0 : i32, i32, i32
  }
  func.func @transform_1(%arg0: i32, %arg1: i32) -> (i32, i32, i32) {
    %c0_i32 = arith.constant 0 : i32
    %c0_i32_0 = arith.constant 0 : i32
    %c0_i32_1 = arith.constant 0 : i32
    return %arg0, %c0_i32, %c0_i32_0 : i32, i32, i32
  }
  func.func @transform_2(%arg0: i32, %arg1: i32) -> (i32, i32, i32) {
    %c0_i32 = arith.constant 0 : i32
    %c0_i32_0 = arith.constant 0 : i32
    %c0_i32_1 = arith.constant 0 : i32
    return %arg1, %c0_i32, %c0_i32_0 : i32, i32, i32
  }
  func.func @transform_3(%arg0: i32, %arg1: i32) -> (i32, i32, i32) {
    %c0_i32 = arith.constant 0 : i32
    %c0_i32_0 = arith.constant 0 : i32
    %c0_i32_1 = arith.constant 0 : i32
    return %arg1, %c0_i32, %c0_i32_0 : i32, i32, i32
  }
  func.func @transform_4(%arg0: i32, %arg1: i32) -> (i32, i32, i32) {
    %c0_i32 = arith.constant 0 : i32
    %c0_i32_0 = arith.constant 0 : i32
    %c0_i32_1 = arith.constant 0 : i32
    return %arg1, %c0_i32, %c0_i32_0 : i32, i32, i32
  }
  func.func @transform_5(%arg0: i32, %arg1: i32) -> (i32, i32, i32) {
    %c0_i32 = arith.constant 0 : i32
    %c0_i32_0 = arith.constant 0 : i32
    %c0_i32_1 = arith.constant 0 : i32
    return %arg1, %c0_i32, %c0_i32_0 : i32, i32, i32
  }
  func.func @transform_6(%arg0: i32, %arg1: i32) -> (i32, i32, i32) {
    %c0_i32 = arith.constant 0 : i32
    %c0_i32_0 = arith.constant 0 : i32
    %c0_i32_1 = arith.constant 0 : i32
    return %arg1, %c0_i32, %c0_i32_0 : i32, i32, i32
  }
  func.func @transform_7(%arg0: i32, %arg1: i32) -> (i32, i32, i32) {
    %c0_i32 = arith.constant 0 : i32
    %c0_i32_0 = arith.constant 0 : i32
    %c0_i32_1 = arith.constant 0 : i32
    return %arg1, %c0_i32, %c0_i32_0 : i32, i32, i32
  }
  func.func @transform_8(%arg0: i32, %arg1: i32) -> (i32, i32, i32) {
    %c0_i32 = arith.constant 0 : i32
    %c0_i32_0 = arith.constant 0 : i32
    %c0_i32_1 = arith.constant 0 : i32
    return %arg1, %c0_i32, %c0_i32_0 : i32, i32, i32
  }
  func.func @transform_9(%arg0: i32, %arg1: i32) -> (i32, i32, i32) {
    %c0_i32 = arith.constant 0 : i32
    %c0_i32_0 = arith.constant 0 : i32
    %c0_i32_1 = arith.constant 0 : i32
    return %arg1, %c0_i32, %c0_i32_0 : i32, i32, i32
  }
  func.func @transform_10(%arg0: i32, %arg1: i32) -> (i32, i32, i32) {
    %c0_i32 = arith.constant 0 : i32
    %c0_i32_0 = arith.constant 0 : i32
    %c0_i32_1 = arith.constant 0 : i32
    return %arg1, %c0_i32, %c0_i32_0 : i32, i32, i32
  }
  func.func @transform_11(%arg0: i32, %arg1: i32) -> (i32, i32, i32) {
    %c0_i32 = arith.constant 0 : i32
    %c0_i32_0 = arith.constant 0 : i32
    %c0_i32_1 = arith.constant 0 : i32
    return %arg1, %c0_i32, %c0_i32_0 : i32, i32, i32
  }
  func.func @transform_12(%arg0: i32, %arg1: i32) -> (i32, i32, i32) {
    %c0_i32 = arith.constant 0 : i32
    %c0_i32_0 = arith.constant 0 : i32
    %c0_i32_1 = arith.constant 0 : i32
    return %arg1, %c0_i32, %c0_i32_0 : i32, i32, i32
  }
  func.func @transform_13(%arg0: i32, %arg1: i32) -> (i32, i32, i32) {
    %c0_i32 = arith.constant 0 : i32
    %c0_i32_0 = arith.constant 0 : i32
    %c0_i32_1 = arith.constant 0 : i32
    return %arg1, %c0_i32, %c0_i32_0 : i32, i32, i32
  }
  func.func @transform_14(%arg0: i32, %arg1: i32) -> (i32, i32) {
    %c0_i32 = arith.constant 0 : i32
    %c0_i32_0 = arith.constant 0 : i32
    %c0_i32_1 = arith.constant 0 : i32
    return %c0_i32, %c0_i32_0 : i32, i32
  }
  func.func @transform_15(%arg0: i32, %arg1: i32) -> (i32, i32) {
    %c0_i32 = arith.constant 0 : i32
    %c0_i32_0 = arith.constant 0 : i32
    %c0_i32_1 = arith.constant 0 : i32
    return %c0_i32, %c0_i32_0 : i32, i32
  }
  func.func @transform_16(%arg0: i32, %arg1: i32) -> (i32, i32, i32) {
    %c0_i32 = arith.constant 0 : i32
    %c0_i32_0 = arith.constant 0 : i32
    %c0_i32_1 = arith.constant 0 : i32
    return %arg0, %c0_i32, %c0_i32_0 : i32, i32, i32
  }
}

</mosaic_0001>

<bundles_post_ra>
// kernel: tpu_custom_call.1
= control target key start
LH: loop header
LB: loop body
LE: loop exit
PB: predicated region body
PF: predicated region fallthrough
CT: control target
= control target key end

     0   :  { %s7418_s0 = inlined_call_operand.hbm [shape: f32[2,8,256], index: 0, kind: input, shape index: {}]   ;;  %s7419_s1 = inlined_call_operand.hbm [shape: f32[2,1,8], index: 1, kind: input, shape index: {}]   ;;  %s7420_s2 = inlined_call_operand.hbm [shape: f32[2,1,256], index: 2, kind: input, shape index: {}]   ;;  %s7421_s3 = inlined_call_operand.vmem [shape: f32[2,1,256], index: 3, kind: input, shape index: {}]   ;;  %s7422_s4 = inlined_call_operand.hbm [shape: bf16[2,256,768], index: 4, kind: input, shape index: {}]   ;;  %s7423_s5 = inlined_call_operand.hbm [shape: f32[2,1,768], index: 5, kind: input, shape index: {}]   ;;  %s7424_s6 = inlined_call_operand.hbm [shape: bf16[2,256,256], index: 6, kind: input, shape index: {}]   ;;  %s7425_s7 = inlined_call_operand.hbm [shape: f32[2,1,256], index: 7, kind: input, shape index: {}]   ;;  %s7426_s8 = inlined_call_operand.hbm [shape: f32[2,1,256], index: 8, kind: input, shape index: {}]   ;;  %s7427_s9 = inlined_call_operand.hbm [shape: f32[2,1,256], index: 9, kind: input, shape index: {}]   ;;  %s7428_s10 = inlined_call_operand.hbm [shape: bf16[2,256,1024], index: 10, kind: input, shape index: {}]   ;;  %s7429_s11 = inlined_call_operand.vmem [shape: f32[2,1,1024], index: 11, kind: input, shape index: {}]   ;;  %s7430_s12 = inlined_call_operand.hbm [shape: bf16[2,1024,256], index: 12, kind: input, shape index: {}]   ;;  %s7431_s13 = inlined_call_operand.hbm [shape: f32[2,1,256], index: 13, kind: input, shape index: {}]   ;;  %s7432_s14 = inlined_call_operand.vmem [shape: f32[1,256], index: 14, kind: input, shape index: {}]   ;;  %s7433_s15 = inlined_call_operand.vmem [shape: f32[1,256], index: 15, kind: input, shape index: {}]   ;;  %s7434_s16 = inlined_call_operand.hbm [shape: bf16[2,8,256], index: 16, kind: output, shape index: {}]  }
   0x1   :  { %7467 = sst [smem:[#allocation53_spill]] %s7418_s0 }
   0x2   :  { %7468 = sst [smem:[#allocation54_spill]] %s7419_s1 }
   0x3   :  { %7469 = sst [smem:[#allocation55_spill]] %s7421_s3 }
   0x4   :  { %7470 = sst [smem:[#allocation56_spill]] %s7422_s4 }
   0x5   :  { %7471 = sst [smem:[#allocation57_spill]] %s7423_s5 }
   0x6   :  { %7472 = sst [smem:[#allocation58_spill]] %s7424_s6 }
   0x7   :  { %7473 = sst [smem:[#allocation59_spill]] %s7425_s7 }
   0x8   :  { %7474 = sst [smem:[#allocation60_spill]] %s7426_s8 }
   0x9   :  { %7475 = sst [smem:[#allocation61_spill]] %s7427_s9 }
   0xa   :  { %7476 = sst [smem:[#allocation62_spill]] %s7428_s10 }
   0xb   :  { %7477 = sst [smem:[#allocation63_spill]] %s7429_s11 }
   0xc   :  { %7478 = sst [smem:[#allocation64_spill]] %s7431_s13 }
   0xd   :  { %7479 = sst [smem:[#allocation65_spill]] %s7432_s14 }
   0xe   :  { %7480 = sst [smem:[#allocation66_spill]] %s7433_s15 }
   0xf   :  { %7481 = sst [smem:[#allocation67_spill]] %s7434_s16 }
  0x10   :  { %21 = vsyncpa [#allocation4], 0 }
  0x11   :  { %23 = vsyncpa [#allocation4 + $0x1], 0 }
  0x12   :  { %24 = vsyncpa [#allocation7], 0 }
  0x13   :  { %26 = vsyncpa [#allocation7 + $0x1], 0 }
  0x14   :  { %27 = vsyncpa [#allocation10], 0 }
  0x15   :  { %29 = vsyncpa [#allocation10 + $0x1], 0 }
  0x16   :  { %30 = vsyncpa [#allocation13], 0 }
  0x17   :  { %32 = vsyncpa [#allocation13 + $0x1], 0 }
  0x18   :  { %33 = vsyncpa [#allocation16], 0 }
  0x19   :  { %35 = vsyncpa [#allocation16 + $0x1], 0 }
  0x1a   :  { %36 = vsyncpa [#allocation19], 0 }
  0x1b   :  { %38 = vsyncpa [#allocation19 + $0x1], 0 }
  0x1c   :  { %39 = vsyncpa [#allocation22], 0 }
  0x1d   :  { %41 = vsyncpa [#allocation22 + $0x1], 0 }
  0x1e   :  { %42 = vsyncpa [#allocation5], 0 }
  0x1f   :  { %44 = vsyncpa [#allocation5 + $0x1], 0  ;;  %s6375_s21 = smov 0   ;;  %s6377_s22 = smov 0  }
  0x20   :  { %s6379_s23 = smov 0   ;;  %s6381_s24 = smov 0  }
  0x21   :  { %s6383_s25 = smov 0   ;;  %s6385_s26 = smov 0  }
  0x22   :  { %s6387_s27 = smov 0   ;;  %s6389_s28 = smov 0  }
  0x23   :  { %s6391_s29 = smov 0   ;;  %s6393_s30 = smov 0  }
  0x24   :  { %s6395_s0 = smov 0  }
  0x25 LB: > { %7482 = sst [smem:[#allocation33_spill]] %s6230_s22  ;;  %s6431_s17 = sadd.s32 4294967295, %s6266_s0   ;;  %s6266_s0 = sphi %s6395_s0, %s50_s0   ;;  %s6262_s30 = sphi %s6393_s30, %s7563_s30   ;;  %s6258_s29 = sphi %s6391_s29, %s7560_s29   ;;  %s6254_s28 = sphi %s6389_s28, %s7562_s28   ;;  %s6250_s27 = sphi %s6387_s27, %s7559_s27   ;;  %s6246_s26 = sphi %s6385_s26, %s7558_s26   ;;  %s6242_s25 = sphi %s6383_s25, %s7557_s25   ;;  %s6238_s24 = sphi %s6381_s24, %s7556_s24   ;;  %s6234_s23 = sphi %s6379_s23, %s7555_s23   ;;  %s6230_s22 = sphi %s6377_s22, %s7554_s22   ;;  %s6226_s21 = sphi %s6375_s21, %s7553_s21  }
  0x26   : > { %7483 = sst [smem:[#allocation34_spill]] %s6234_s23  ;;  %s4710_s18 = sadd.s32 4294967294, %s6266_s0  }
  0x27   : > { %7484 = sst [smem:[#allocation35_spill]] %s6238_s24  ;;  %s59_s19 = sadd.s32 1, %s6258_s29 }
  0x28   : > { %7485 = sst [smem:[#allocation36_spill]] %s6242_s25  ;;  %s62_s20 = sadd.s32 1, %s6262_s30 }
  0x29   : > { %7486 = sst [smem:[#allocation37_spill]] %s6246_s26  ;;  %p60_p0 = scmp.ge.s32.totalorder %s59_s19, 2 }
  0x2a   : > { %7487 = sst [smem:[#allocation38_spill]] %s6250_s27  ;;  %s69_s16 = sadd.s32 1, %s6246_s26 }
  0x2b   : > { %7488 = sst [smem:[#allocation39_spill]] %s6254_s28  ;;  %p76_p1 = scmp.ne.s32.totalorder %s6246_s26, %s6242_s25 }
  0x2c   : > { %7489 = sst [smem:[#allocation40_spill]] %s6258_s29  ;;  %p77_p2 = scmp.eq.s32.totalorder %s6266_s0, 0 }
  0x2d   : > { %7490 = sst [smem:[#allocation41_spill]] %s6266_s0  ;;  %s7565_s19 = smov (%p60_p0, %s59_s19), 0 }
  0x2e   : > { %7491 = sst [smem:[#allocation42_spill]] %s6431_s17  ;;  %s7567_s20 = smov (!%p60_p0, %s62_s20), %s6262_s30 }
  0x2f   : > { %7492 = sst [smem:[#allocation43_spill]] %s7565_s19  ;;  %p6448_p3 = por %p77_p2, %p76_p1 }
  0x30   : > { %p7440_p4 = scmp.ne.s32.totalorder %s6242_s25, %s6238_s24  ;;  %p64_p5 = scmp.ge.s32.totalorder %s7567_s20, 2 }
  0x31   : > { %p83_p6 = scmp.eq.s32.totalorder %s6431_s17, 0  ;;  %s118_s15 = ssub.s32 %s6258_s29, %s7565_s19 }
  0x32   : > { %s121_s14 = sadd.s32 1, %s6234_s23  ;;  %s7569_s20 = smov (%p64_p5, %s7567_s20), 0 }
  0x33   : > { %7494 = sst [smem:[#allocation44_spill]] %s7569_s20  ;;  %p6465_p7 = por %p83_p6, %p7440_p4 }
  0x34   : > { %p119_p8 = scmp.eq.s32.totalorder %s118_s15, 0  ;;  %s66_s19 = ssub.s32 %s6262_s30, %s7569_s20 }
  0x35   : > { %s7495_s11 = scalar_select %p6465_p7, 1, 0 }
  0x36   : > { %p128_p9 = scmp.ne.s32.totalorder %s6234_s23, %s6230_s22  ;;  %p67_p10 = scmp.eq.s32.totalorder %s66_s19, 0 }
  0x37   : > { %7496 = sst [smem:[#allocation45_spill]] %s7495_s11  ;;  %p134_p11 = scmp.ne.s32.totalorder %s6230_s22, %s6226_s21 }
  0x38   : > { %s6476_s3 = scalar_select %p119_p8, %s6234_s23, %s121_s14  }
  0x39   : > { %s6479_s27 = scalar_select %p67_p10, %s6246_s26, %s69_s16  }
  0x3a   : > { %7497 = sst [smem:[#allocation46_spill]] %s6476_s3  ;;  %p6483_p12 = por %p128_p9, %p77_p2 }
  0x3b   : > { %7498 = sst [smem:[#allocation47_spill]] %s6479_s27  ;;  %p6489_p13 = por %p134_p11, %p83_p6 }
  0x3c   : > { %p486_p0 = scmp.eq.s32.totalorder %s6431_s17, 3  ;;  %p492_p5 = scmp.eq.s32.totalorder %s4710_s18, 3 }
  0x3d   : > { %s7500_s11 = scalar_select %p6489_p13, 1, 0 }
  0x3e   : > { %p5267_p4 = scmp.lt.s32.totalorder %s6266_s0, 4  ;;  %p6498_p7 = por %p486_p0, %p76_p1 }
  0x3f   : > { %7501 = sst [smem:[#allocation48_spill]] %s7500_s11  ;;  %p7504_p8 = scmp.ne.s32.totalorder %s6242_s25, %s6238_s24 }
  0x40   : > { %s7502_s15 = scalar_select %p6498_p7, 1, 0 }
  0x41   : > { %p6505_p10 = por %p492_p5, %p7504_p8  ;;  %s6510_s16 = sand.u32 1, %s6246_s26  }
  0x42   : > { %7503 = sst [smem:[#allocation49_spill]] %s7502_s15  ;;  %p6516_p2 = pnand %p5267_p4, %p6448_p3 }
  0x43   : > { %s7505_s14 = scalar_select %p6505_p10, 1, 0 }
  0x44   : > { %s6521_s18 = sand.u32 1, %s6266_s0   ;;  %s4716_s19 = sshll.u32 %s6262_s30, 4 }
  0x45   : > { %7506 = sst [smem:[#allocation50_spill]] %s7505_s14  ;;  %s540_s20 = scalar_lea.vmem [#allocation6], %s6510_s16 }
  0x46   : > { %7508 = sst [smem:[#allocation51_spill]] %s6521_s18  ;;  %s547_s27 = sshll.u32 %s540_s20, 4  ;;  %s548_s27 = int_to_ptr.vmem [resolvable:$true] %s547_s27 }
  0x47   : > { %s7509_s1 = sld [smem:[#allocation54_spill]]  ;;  %s7451_s28 = scalar_lea.sflag [#allocation7], %s6521_s18 }
  0x48   : > { %p7455_p1 = pneg %p6516_p2  ;;  %s5795_s14 = scalar_lea.vmem %s548_s27, 16 }
  0x49   : > { %p5796_p3 = scmp.ne.s32.totalorder %s548_s27, %s5795_s14  ;;  %s6268_s15 = smov [#allocation6]  }
  0x4a   : > { %s5800_s11 = sshll.u32 %s6268_s15, 4  ;;  %s5801_s11 = int_to_ptr.vmem [resolvable:$false] %s5800_s11 }
  0x4b   : > { %p5798_p6 = pnand %p5796_p3, %p7455_p1  ;;  %s5802_s22 = scalar_lea.vmem %s5801_s11, 32 }
  0x4c   : > { %p5803_p11 = scmp.lt.s32.totalorder %s548_s27, %s5801_s11  ;;  %p5804_p0 = scmp.lt.s32.totalorder %s5802_s22, %s5795_s14 }
  0x4d   : > { %s545_s26 = scalar_lea.hbm %s7509_s1, %s4716_s19  ;;  %p5799_p9 = pneg %p5798_p6 }
  0x4e   : > { %p5805_p5 = por %p5804_p0, %p5803_p11 }
  0x50   : > { %p5806_p8 = pnand %p5805_p5, %p5799_p9 }
  0x52   : > { %5809 = shalt.err (!%p5806_p8)
}
  0x53   : > { %5232 = dma.hbm_to_vmem [thread:$0]  (!%p6516_p2), %s545_s26, 16, %s548_s27, %s7451_s28  }
  0x54   : > { %p6542_p3 = pnand %p5267_p4, %p6483_p12  ;;  %p4743_p6 = scmp.ge.s32.totalorder %s6266_s0, 1 }
  0x55   : > { %p764_p9 = scmp.lt.s32.totalorder %s6266_s0, 5  ;;  %s6549_s11 = sand.u32 1, %s6234_s23  }
  0x56   : > { %s5194_s24 = smul.u32 768, %s6549_s11  ;;  %s7513_s4 = sld [smem:[#allocation56_spill]] }
  0x57   : > { %p6551_p11 = pnand %p4743_p6, %p764_p9  ;;  %s5195_s20 = smul.u32 12288, %s6258_s29 }
  0x58   : > { %s584_s27 = scalar_lea.vmem [#allocation9], %s5194_s24  ;;  %s7462_s19 = scalar_lea.sflag [#allocation10], %s6521_s18 }
  0x59   : > { %s7511_s22 = scalar_select %p6551_p11, 1, 0 }
  0x5a   : > { %s591_s14 = sshll.u32 %s584_s27, 4  ;;  %p6563_p4 = pneg %p6542_p3  ;;  %s592_s14 = int_to_ptr.vmem [resolvable:$true] %s591_s14 }
  0x5b   : > { %7512 = sst [smem:[#allocation52_spill]] %s7511_s22  ;;  %s5823_s1 = scalar_lea.vmem %s592_s14, 12288 }
  0x5c   : > { %s590_s13 = scalar_lea.hbm %s7513_s4, %s5195_s20  ;;  %p5824_p12 = scmp.ne.s32.totalorder %s592_s14, %s5823_s1 }
  0x5d   : > { %s6269_s23 = smov [#allocation9]  }
  0x5e   : > { %p5826_p0 = pnand %p5824_p12, %p6563_p4  ;;  %s5828_s0 = sshll.u32 %s6269_s23, 4  ;;  %s5829_s0 = int_to_ptr.vmem [resolvable:$false] %s5828_s0 }
  0x5f   : > { %s5830_s15 = scalar_lea.vmem %s5829_s0, 24576  ;;  %p5831_p8 = scmp.lt.s32.totalorder %s592_s14, %s5829_s0 }
  0x60   : > { %p5827_p5 = pneg %p5826_p0  ;;  %p5832_p6 = scmp.lt.s32.totalorder %s5830_s15, %s5823_s1 }
  0x62   : > { %p5833_p9 = por %p5832_p6, %p5831_p8 }
  0x64   : > { %p5834_p1 = pnand %p5833_p9, %p5827_p5 }
  0x66   : > { %5837 = shalt.err (!%p5834_p1)
}
  0x67   : > { %s6270_s24 = smov 384   ;;  %s6271_s20 = smov 24  }
  0x68   : > { %5238 = dma.hbm_to_vmem [thread:$0]  (!%p6542_p3), %s590_s13, 12288, %s592_s14, %s7462_s19, %s6270_s24, %s6270_s24, %s6271_s20  }
  0x69   : > { %s4722_s26 = sshll.u32 %s6549_s11, 8  ;;  %s5153_s23 = sshll.u32 %s6258_s29, 12 }
  0x6a   : > { %s7515_s6 = sld [smem:[#allocation58_spill]]  ;;  %s624_s0 = scalar_lea.vmem [#allocation12], %s4722_s26 }
  0x6b   : > { %s631_s15 = sshll.u32 %s624_s0, 4  ;;  %s7461_s17 = scalar_lea.sflag [#allocation13], %s6521_s18  ;;  %s632_s15 = int_to_ptr.vmem [resolvable:$true] %s631_s15 }
  0x6c   : > { %s5851_s25 = scalar_lea.vmem %s632_s15, 4096  ;;  %s6272_s22 = smov [#allocation12]  }
  0x6d   : > { %p5852_p1 = scmp.ne.s32.totalorder %s632_s15, %s5851_s25  ;;  %s5856_s9 = sshll.u32 %s6272_s22, 4  ;;  %s5857_s9 = int_to_ptr.vmem [resolvable:$false] %s5856_s9 }
  0x6e   : > { %s5858_s7 = scalar_lea.vmem %s5857_s9, 8192  ;;  %p5859_p5 = scmp.lt.s32.totalorder %s632_s15, %s5857_s9 }
  0x6f   : > { %p5854_p12 = pnand %p5852_p1, %p6563_p4  ;;  %p5860_p8 = scmp.lt.s32.totalorder %s5858_s7, %s5851_s25 }
  0x70   : > { %s630_s1 = scalar_lea.hbm %s7515_s6, %s5153_s23 }
  0x71   : > { %p5855_p0 = pneg %p5854_p12  ;;  %p5861_p6 = por %p5860_p8, %p5859_p5 }
  0x73   : > { %p5862_p9 = pnand %p5861_p6, %p5855_p0 }
  0x75   : > { %5865 = shalt.err (!%p5862_p9)
}
  0x76   : > { %s7459_s4 = smov 128   ;;  %s7460_s13 = smov 8  }
  0x77   : > { %5244 = dma.hbm_to_vmem [thread:$0]  (!%p6542_p3), %s630_s1, 4096, %s632_s15, %s7461_s17, %s7459_s4, %s7459_s4, %s7460_s13  }
  0x78   : > { %s6589_s22 = sshll.u32 %s6549_s11, 1  ;;  %s6592_s7 = sshll.u32 %s6258_s29, 5 }
  0x79   : > { %s7516_s8 = sld [smem:[#allocation60_spill]]  ;;  %s664_s24 = scalar_lea.vmem [#allocation15], %s6589_s22 }
  0x7a   : > { %s672_s20 = sshll.u32 %s664_s24, 4  ;;  %s7463_s26 = scalar_lea.sflag [#allocation16], %s6521_s18  ;;  %s673_s20 = int_to_ptr.vmem [resolvable:$true] %s672_s20 }
  0x7b   : > { %s5879_s23 = scalar_lea.vmem %s673_s20, 32  ;;  %s6275_s27 = smov [#allocation15]  }
  0x7c   : > { %p5880_p1 = scmp.ne.s32.totalorder %s673_s20, %s5879_s23  ;;  %s5884_s1 = sshll.u32 %s6275_s27, 4  ;;  %s5885_s1 = int_to_ptr.vmem [resolvable:$false] %s5884_s1 }
  0x7d   : > { %s5886_s0 = scalar_lea.vmem %s5885_s1, 64  ;;  %p5887_p5 = scmp.lt.s32.totalorder %s673_s20, %s5885_s1 }
  0x7e   : > { %p5882_p12 = pnand %p5880_p1, %p6563_p4  ;;  %p5888_p8 = scmp.lt.s32.totalorder %s5886_s0, %s5879_s23 }
  0x7f   : > { %s670_s14 = scalar_lea.hbm %s7516_s8, %s6592_s7 }
  0x80   : > { %p5883_p0 = pneg %p5882_p12  ;;  %p5889_p6 = por %p5888_p8, %p5887_p5 }
  0x82   : > { %p5890_p9 = pnand %p5889_p6, %p5883_p0 }
  0x84   : > { %5893 = shalt.err (!%p5890_p9)
}
  0x85   : > { %5250 = dma.hbm_to_vmem [thread:$0]  (!%p6542_p3), %s670_s14, 32, %s673_s20, %s7463_s26  }
  0x86   : > { %s4734_s15 = sshll.u32 %s6549_s11, 10  ;;  %s5157_s9 = sshll.u32 %s6258_s29, 14 }
  0x87   : > { %s7517_s10 = sld [smem:[#allocation62_spill]]  ;;  %s702_s1 = scalar_lea.vmem [#allocation18], %s4734_s15 }
  0x88   : > { %s709_s23 = sshll.u32 %s702_s1, 4  ;;  %s699_s0 = scalar_lea.sflag [#allocation19], %s6521_s18  ;;  %s710_s23 = int_to_ptr.vmem [resolvable:$true] %s709_s23 }
  0x89   : > { %s5907_s4 = scalar_lea.vmem %s710_s23, 16384  ;;  %s6276_s13 = smov [#allocation18]  }
  0x8a   : > { %p5908_p1 = scmp.ne.s32.totalorder %s710_s23, %s5907_s4  ;;  %s5912_s17 = sshll.u32 %s6276_s13, 4  ;;  %s5913_s17 = int_to_ptr.vmem [resolvable:$false] %s5912_s17 }
  0x8b   : > { %s5914_s19 = scalar_lea.vmem %s5913_s17, 32768  ;;  %p5915_p5 = scmp.lt.s32.totalorder %s710_s23, %s5913_s17 }
  0x8c   : > { %p5910_p12 = pnand %p5908_p1, %p6563_p4  ;;  %p5916_p8 = scmp.lt.s32.totalorder %s5914_s19, %s5907_s4 }
  0x8d   : > { %s708_s27 = scalar_lea.hbm %s7517_s10, %s5157_s9 }
  0x8e   : > { %p5911_p0 = pneg %p5910_p12  ;;  %p5917_p6 = por %p5916_p8, %p5915_p5 }
  0x90   : > { %p5918_p9 = pnand %p5917_p6, %p5911_p0 }
  0x92   : > { %5921 = shalt.err (!%p5918_p9)
}
  0x93   : > { %s6277_s14 = smov 512   ;;  %s6278_s20 = smov 32  }
  0x94   : > { %5256 = dma.hbm_to_vmem [thread:$0]  (!%p6542_p3), %s708_s27, 16384, %s710_s23, %s699_s0, %s6277_s14, %s6277_s14, %s6278_s20  }
  0x95   : > { %s6621_s24 = scalar_lea.hbm %s7430_s12, %s5157_s9  ;;  %s730_s17 = scalar_lea.vmem [#allocation20], %s4734_s15 }
  0x96   : > { %s737_s19 = sshll.u32 %s730_s17, 4  ;;  %s4713_s4 = sshll.u32 %s6510_s16, 4  ;;  %s6623_s19 = int_to_ptr.vmem [resolvable:$true] %s737_s19 }
  0x97   : > { %s5151_s1 = sshll.u32 %s6262_s30, 8  ;;  %s7518_s8 = sld [smem:[#allocation53_spill]] }
  0x98   : > { %s522_s5 = scalar_lea.vmem [#allocation3], %s4713_s4  ;;  %s519_s18 = scalar_lea.sflag [#allocation4], %s6510_s16 }
  0x99   : > { %s530_s29 = sshll.u32 %s522_s5, 4  ;;  %p7519_p12 = pneg %p6516_p2  ;;  %s531_s29 = int_to_ptr.vmem [resolvable:$true] %s530_s29 }
  0x9a   : > { %s5935_s27 = scalar_lea.vmem %s531_s29, 256  ;;  %s6279_s15 = smov [#allocation3]  }
  0x9b   : > { %p5936_p1 = scmp.ne.s32.totalorder %s531_s29, %s5935_s27  ;;  %s5940_s9 = sshll.u32 %s6279_s15, 4  ;;  %s5941_s9 = int_to_ptr.vmem [resolvable:$false] %s5940_s9 }
  0x9c   : > { %s5942_s23 = scalar_lea.vmem %s5941_s9, 512  ;;  %p5943_p8 = scmp.lt.s32.totalorder %s531_s29, %s5941_s9 }
  0x9d   : > { %s528_s10 = scalar_lea.hbm %s7518_s8, %s5151_s1  ;;  %p5938_p0 = pnand %p5936_p1, %p7519_p12 }
  0x9e   : > { %p5944_p6 = scmp.lt.s32.totalorder %s5942_s23, %s5935_s27 }
  0x9f   : > { %p5939_p5 = pneg %p5938_p0 }
  0xa0   : > { %p5945_p9 = por %p5944_p6, %p5943_p8 }
  0xa2   : > { %p5946_p10 = pnand %p5945_p9, %p5939_p5 }
  0xa4   : > { %5949 = shalt.err (!%p5946_p10)
}
  0xa5   : > { %5229 = dma.hbm_to_vmem [thread:$0]  (!%p6516_p2), %s528_s10, 256, %s531_s29, %s519_s18  }
  0xa6   : > { %s564_s8 = scalar_lea.hbm %s7420_s2, %s6592_s7  ;;  %s558_s16 = scalar_lea.vmem [#allocation8], %s6589_s22 }
  0xa7   : > { %s566_s26 = sshll.u32 %s558_s16, 4  ;;  %s5196_s14 = smul.u32 6, %s6549_s11  ;;  %s567_s26 = int_to_ptr.vmem [resolvable:$true] %s566_s26 }
  0xa8   : > { %s5963_s20 = scalar_lea.vmem %s567_s26, 32  ;;  %s6280_s25 = smov [#allocation8]  }
  0xa9   : > { %p5964_p1 = scmp.ne.s32.totalorder %s567_s26, %s5963_s20  ;;  %s5968_s21 = sshll.u32 %s6280_s25, 4  ;;  %s5969_s21 = int_to_ptr.vmem [resolvable:$false] %s5968_s21 }
  0xaa   : > { %s5970_s13 = scalar_lea.vmem %s5969_s21, 64  ;;  %p5971_p0 = scmp.lt.s32.totalorder %s567_s26, %s5969_s21 }
  0xab   : > { %p5966_p12 = pnand %p5964_p1, %p6563_p4  ;;  %p5972_p5 = scmp.lt.s32.totalorder %s5970_s13, %s5963_s20 }
  0xad   : > { %p5967_p10 = pneg %p5966_p12  ;;  %p5973_p2 = por %p5972_p5, %p5971_p0 }
  0xaf   : > { %p5974_p8 = pnand %p5973_p2, %p5967_p10 }
  0xb1   : > { %5977 = shalt.err (!%p5974_p8)
}
  0xb2   : > { %s7520_s10 = sld [smem:[#allocation51_spill]]  ;;  %s605_s4 = scalar_lea.vmem [#allocation11], %s5196_s14 }
  0xb3   : > { %s7522_s18 = sld [smem:[#allocation40_spill]]  ;;  %s613_s1 = sshll.u32 %s605_s4, 4  ;;  %s614_s1 = int_to_ptr.vmem [resolvable:$true] %s613_s1 }
  0xb4   : > { %s7523_s9 = sld [smem:[#allocation57_spill]]  ;;  %s5991_s5 = scalar_lea.vmem %s614_s1, 96 }
  0xb5   : > { %p5992_p6 = scmp.ne.s32.totalorder %s614_s1, %s5991_s5  ;;  %s6281_s6 = smov [#allocation11]  }
  0xb6   : > { %s5996_s16 = sshll.u32 %s6281_s6, 4  ;;  %s5997_s16 = int_to_ptr.vmem [resolvable:$false] %s5996_s16 }
  0xb7   : > { %p5994_p9 = pnand %p5992_p6, %p6563_p4  ;;  %s5998_s20 = scalar_lea.vmem %s5997_s16, 192 }
  0xb8   : > { %s7521_s29 = scalar_lea.sflag [#allocation7], %s7520_s10  ;;  %p5999_p12 = scmp.lt.s32.totalorder %s614_s1, %s5997_s16 }
  0xb9   : > { %5235 = dma.hbm_to_vmem [thread:$0]  (!%p6542_p3), %s564_s8, 32, %s567_s26, %s7521_s29  }
  0xba   : > { %s5197_s17 = smul.u32 96, %s7522_s18  ;;  %p5995_p1 = pneg %p5994_p9 }
  0xbb   : > { %p6000_p10 = scmp.lt.s32.totalorder %s5998_s20, %s5991_s5 }
  0xbc   : > { %s611_s23 = scalar_lea.hbm %s7523_s9, %s5197_s17 }
  0xbd   : > { %p6001_p0 = por %p6000_p10, %p5999_p12 }
  0xbf   : > { %p6002_p5 = pnand %p6001_p0, %p5995_p1 }
  0xc1   : > { %6005 = shalt.err (!%p6002_p5)
}
  0xc2   : > { %s7524_s8 = scalar_lea.sflag [#allocation10], %s7520_s10  ;;  %s7525_s25 = sld [smem:[#allocation59_spill]] }
  0xc3   : > { %5241 = dma.hbm_to_vmem [thread:$0]  (!%p6542_p3), %s611_s23, 96, %s614_s1, %s7524_s8  }
  0xc4   : > { %s645_s13 = scalar_lea.vmem [#allocation14], %s6589_s22  ;;  %s6282_s17 = smov [#allocation14]  }
  0xc5   : > { %s653_s29 = sshll.u32 %s645_s13, 4  ;;  %s6024_s4 = sshll.u32 %s6282_s17, 4  ;;  %s654_s29 = int_to_ptr.vmem [resolvable:$true] %s653_s29  ;;  %s6025_s4 = int_to_ptr.vmem [resolvable:$false] %s6024_s4 }
  0xc6   : > { %s6019_s18 = scalar_lea.vmem %s654_s29, 32  ;;  %s6026_s27 = scalar_lea.vmem %s6025_s4, 64 }
  0xc7   : > { %p6020_p2 = scmp.ne.s32.totalorder %s654_s29, %s6019_s18  ;;  %p6027_p9 = scmp.lt.s32.totalorder %s654_s29, %s6025_s4 }
  0xc8   : > { %s651_s21 = scalar_lea.hbm %s7525_s25, %s6592_s7  ;;  %p6028_p1 = scmp.lt.s32.totalorder %s6026_s27, %s6019_s18 }
  0xc9   : > { %p6022_p8 = pnand %p6020_p2, %p6563_p4 }
  0xca   : > { %p6029_p12 = por %p6028_p1, %p6027_p9 }
  0xcb   : > { %p6023_p6 = pneg %p6022_p8 }
  0xcd   : > { %p6030_p10 = pnand %p6029_p12, %p6023_p6 }
  0xcf   : > { %6033 = shalt.err (!%p6030_p10)
}
  0xd0   : > { %s7526_s1 = scalar_lea.sflag [#allocation13], %s7520_s10  ;;  %s7527_s23 = sld [smem:[#allocation61_spill]] }
  0xd1   : > { %5247 = dma.hbm_to_vmem [thread:$0]  (!%p6542_p3), %s651_s21, 32, %s654_s29, %s7526_s1  }
  0xd2   : > { %s683_s6 = scalar_lea.vmem [#allocation17], %s6589_s22  ;;  %s6283_s8 = smov [#allocation17]  }
  0xd3   : > { %s691_s16 = sshll.u32 %s683_s6, 4  ;;  %s6052_s26 = sshll.u32 %s6283_s8, 4  ;;  %s692_s16 = int_to_ptr.vmem [resolvable:$true] %s691_s16  ;;  %s6053_s26 = int_to_ptr.vmem [resolvable:$false] %s6052_s26 }
  0xd4   : > { %s6047_s20 = scalar_lea.vmem %s692_s16, 32  ;;  %s6054_s14 = scalar_lea.vmem %s6053_s26, 64 }
  0xd5   : > { %p6048_p0 = scmp.ne.s32.totalorder %s692_s16, %s6047_s20  ;;  %p6055_p8 = scmp.lt.s32.totalorder %s692_s16, %s6053_s26 }
  0xd6   : > { %s689_s5 = scalar_lea.hbm %s7527_s23, %s6592_s7  ;;  %p6056_p6 = scmp.lt.s32.totalorder %s6054_s14, %s6047_s20 }
  0xd7   : > { %p6050_p5 = pnand %p6048_p0, %p6563_p4 }
  0xd8   : > { %p6057_p9 = por %p6056_p6, %p6055_p8 }
  0xd9   : > { %p6051_p2 = pneg %p6050_p5 }
  0xdb   : > { %p6058_p1 = pnand %p6057_p9, %p6051_p2 }
  0xdd   : > { %6061 = shalt.err (!%p6058_p1)
}
  0xde   : > { %s7528_s25 = scalar_lea.sflag [#allocation16], %s7520_s10  ;;  %s6075_s21 = scalar_lea.vmem %s6623_s19, 16384 }
  0xdf   : > { %5253 = dma.hbm_to_vmem [thread:$0]  (!%p6542_p3), %s689_s5, 32, %s692_s16, %s7528_s25  }
  0xe0   : > { %p6076_p12 = scmp.ne.s32.totalorder %s6623_s19, %s6075_s21  ;;  %s6284_s13 = smov [#allocation20]  }
  0xe1   : > { %s6080_s29 = sshll.u32 %s6284_s13, 4  ;;  %s6081_s29 = int_to_ptr.vmem [resolvable:$false] %s6080_s29 }
  0xe2   : > { %p6078_p10 = pnand %p6076_p12, %p6563_p4  ;;  %s6082_s18 = scalar_lea.vmem %s6081_s29, 32768 }
  0xe3   : > { %p6083_p5 = scmp.lt.s32.totalorder %s6623_s19, %s6081_s29  ;;  %p6084_p2 = scmp.lt.s32.totalorder %s6082_s18, %s6075_s21 }
  0xe4   : > { %p6079_p0 = pneg %p6078_p10 }
  0xe5   : > { %p6085_p8 = por %p6084_p2, %p6083_p5 }
  0xe7   : > { %p6086_p6 = pnand %p6085_p8, %p6079_p0 }
  0xe9   : > { %6089 = shalt.err (!%p6086_p6)
}
  0xea   : > { %s7529_s17 = smov 8   ;;  %s7530_s4 = smov 128  }
  0xeb   : > { %5259 = dma.hbm_to_vmem [thread:$0]  (!%p6542_p3), %s6621_s24, 16384, %s6623_s19, %s699_s0, %s7530_s4, %s7530_s4, %s7529_s17  }
  0xec   : > { %s7531_s15 = sld [smem:[#allocation64_spill]]  ;;  %s751_s23 = scalar_lea.vmem [#allocation21], %s6589_s22 }
  0xed   : > { %s759_s5 = sshll.u32 %s751_s23, 4  ;;  %s748_s6 = scalar_lea.sflag [#allocation22], %s6549_s11  ;;  %s760_s5 = int_to_ptr.vmem [resolvable:$true] %s759_s5 }
  0xee   : > { %s6103_s16 = scalar_lea.vmem %s760_s5, 32  ;;  %s6285_s10 = smov [#allocation21]  }
  0xef   : > { %p6104_p9 = scmp.ne.s32.totalorder %s760_s5, %s6103_s16  ;;  %s6108_s20 = sshll.u32 %s6285_s10, 4  ;;  %s6109_s20 = int_to_ptr.vmem [resolvable:$false] %s6108_s20 }
  0xf0   : > { %s6110_s8 = scalar_lea.vmem %s6109_s20, 64  ;;  %p6111_p10 = scmp.lt.s32.totalorder %s760_s5, %s6109_s20 }
  0xf1   : > { %p6106_p1 = pnand %p6104_p9, %p6563_p4  ;;  %p6112_p0 = scmp.lt.s32.totalorder %s6110_s8, %s6103_s16 }
  0xf2   : > { %s757_s9 = scalar_lea.hbm %s7531_s15, %s6592_s7 }
  0xf3   : > { %p6107_p12 = pneg %p6106_p1  ;;  %p6113_p5 = por %p6112_p0, %p6111_p10 }
  0xf5   : > { %p6114_p2 = pnand %p6113_p5, %p6107_p12 }
  0xf7   : > { %6117 = shalt.err (!%p6114_p2)
}
  0xf8   : > { %5262 = dma.hbm_to_vmem [thread:$0]  (!%p6542_p3), %s757_s9, 32, %s760_s5, %s748_s6  }
  0xf9   : > { %768 = sbr.rel (%p6551_p11) target bundleno = 2891 (0xb4b), region = 84  ;;  %s7533_s11 = sld [smem:[#allocation36_spill]] (!%p6551_p11) }
  0xfa   : > { %s7534_s7 = sld [smem:[#allocation45_spill]] (!%p6551_p11) }
  0xff   : > { %s6707_s28 = sand.u32 1, %s7533_s11  }
 0x100   : > { %s4744_s0 = sshll.u32 %s6707_s28, 4  ;;  %s771_s24 = scalar_lea.sflag [#allocation4], %s6707_s28 }
 0x101   : > { %s6711_s19 = scalar_lea.vmem [#allocation3], %s4744_s0  ;;  %p7535_p4 = scmp.ne.s32.totalorder %s7534_s7, 0 }
 0x103   : > { %6189 = dma.done.wait (%p7535_p4), %s771_s24, 256  }
 0x104   : > { %6191 = vsyncadd (%p7535_p4), %s771_s24, 4294967040  ;;  %s7536_s3 = sld [smem:[#allocation42_spill]]  ;;  %s782_s25 = scalar_lea.vmem [#allocation6], %s6707_s28 }
 0x10a   : > { %s6718_s26 = sand.u32 1, %s7536_s3  }
 0x10b   : > { %s780_s14 = scalar_lea.sflag [#allocation7], %s6718_s26 }
 0x10c   : > { %6193 = dma.done.wait (%p7535_p4), %s780_s14, 16  }
 0x10d   : > { %6195 = vsyncadd (%p7535_p4), %s780_s14, 4294967280  ;;  %s7537_s21 = sld [smem:[#allocation33_spill]] }
 0x113   : > { %s6727_s29 = sand.u32 1, %s7537_s21  }
 0x114   : > { %s6730_s18 = sshll.u32 %s6727_s29, 1 }
 0x115   : > { %s791_s17 = scalar_lea.vmem [#allocation8], %s6730_s18 }
 0x116   : > { %6197 = dma.done.wait (%p6489_p13), %s780_s14, 32  }
 0x117   : > { %6199 = vsyncadd (%p6489_p13), %s780_s14, 4294967264  ;;  %s5198_s4 = smul.u32 768, %s6727_s29  ;;  %s797_s27 = scalar_lea.sflag [#allocation10], %s6718_s26 }
 0x119   : > { %s6739_s1 = scalar_lea.vmem [#allocation9], %s5198_s4 }
 0x11a   : > { %6201 = dma.done.wait (%p6489_p13), %s797_s27, 12384  }
 0x11b   : > { %6203 = vsyncadd (%p6489_p13), %s797_s27, 4294954912  ;;  %s5199_s15 = smul.u32 6, %s6727_s29  ;;  %s4746_s9 = sshll.u32 %s6727_s29, 8 }
 0x11c   : > { %s815_s5 = scalar_lea.sflag [#allocation13], %s6718_s26  ;;  %s6750_s6 = scalar_lea.vmem [#allocation12], %s4746_s9 }
 0x11d   : > { %s6747_s23 = scalar_lea.vmem [#allocation11], %s5199_s15 }
 0x11e   : > { %6205 = dma.done.wait (%p6489_p13), %s815_s5, 4128  }
 0x11f   : > { %6207 = vsyncadd (%p6489_p13), %s815_s5, 4294963168  ;;  %s827_s16 = scalar_lea.vmem [#allocation14], %s6730_s18  ;;  %s833_s10 = scalar_lea.sflag [#allocation16], %s6718_s26 }
 0x120   : > { %s836_s20 = scalar_lea.vmem [#allocation15], %s6730_s18 }
 0x121   : > { %6209 = dma.done.wait (%p6489_p13), %s833_s10, 64  }
 0x122   : > { %6211 = vsyncadd (%p6489_p13), %s833_s10, 4294967232  ;;  %s4750_s8 = sshll.u32 %s6727_s29, 10  ;;  %s845_s22 = scalar_lea.vmem [#allocation17], %s6730_s18 }
 0x123   : > { %s851_s11 = scalar_lea.sflag [#allocation19], %s6718_s26  ;;  %s6766_s7 = scalar_lea.vmem [#allocation18], %s4750_s8 }
 0x124   : > { %6213 = dma.done.wait (%p6489_p13), %s851_s11, 32768  }
 0x125   : > { %6215 = vsyncadd (%p6489_p13), %s851_s11, 4294934528  ;;  %s6772_s0 = scalar_lea.vmem [#allocation20], %s4750_s8  ;;  %s869_s24 = scalar_lea.sflag [#allocation22], %s6727_s29 }
 0x126   : > { %6217 = dma.done.wait (%p6489_p13), %s869_s24, 32  }
 0x127   : > { %6219 = vsyncadd (%p6489_p13), %s869_s24, 4294967264  ;;  %s7539_s26 = sld [smem:[#allocation38_spill]]  ;;  %s4753_s14 = sshll.u32 %s6707_s28, 3 }
 0x128   : > { %s7540_s5 = sld [smem:[#allocation55_spill]]  ;;  %s6793_s13 = scalar_lea.vmem [#allocation23], %s4753_s14 }
 0x129   : > { %s7541_s11 = sld [smem:[#allocation63_spill]] }
 0x12d   : > { %p983_p3 = scmp.lt.s32.totalorder %s7539_s26, 1  ;;  %p4756_p13 = scmp.ne.s32.totalorder %s7539_s26, 0 }
 0x12f   : > { %s984_s21 = scalar_select %p983_p3, %s7539_s26, 1 }
 0x130   : > { %995 = sbr.rel (%p4756_p13) target bundleno = 311 (0x137), region = 136 }
 0x131   : > { %s4754_s4 = sshll.u32 %s984_s21, 1  ;;  %s4755_s27 = sshll.u32 %s984_s21, 3 }
 0x132   : > { %s6786_s10 = scalar_lea.vmem %s7540_s5, %s4754_s4  ;;  %s6791_s3 = scalar_lea.vmem %s7541_s11, %s4755_s27 }
 0x135   : > { %v996_v0 = vld [vmem:[%s6711_s19] sm:$0xff]  ;;  %v997_v1 = vld [vmem:[%s6711_s19 + $0x8] sm:$0xff] }
 0x136   : > { %998 = vst [vmem:[#allocation2] sm:$0xff] %v996_v0  ;;  %999 = vst [vmem:[#allocation2 + $0x8] sm:$0xff] %v997_v1 }
 0x137 PF: > { %v5366_v5 = vld [vmem:[%s6739_s1 + $0x154] ss:$24 sps:$4 sm:$0xff]   ;;  %v5368_v6 = vld [vmem:[%s6739_s1 + $0x150] ss:$24 sps:$4 sm:$0xff]   ;;  %v5372_v9 = vld [vmem:[%s6739_s1 + $0x124] ss:$24 sps:$4 sm:$0xff]  }
 0x138   : > { %v5369_v7 = vld [vmem:[%s6739_s1 + $0x15c] ss:$24 sps:$4 sm:$0xff]   ;;  %v5371_v8 = vld [vmem:[%s6739_s1 + $0x158] ss:$24 sps:$4 sm:$0xff]   ;;  %1964 = vmatprep.subr.bf16.mxu0 %v5366_v5  ;;  %v5375_v10 = vld [vmem:[%s6739_s1 + $0x12c] ss:$24 sps:$4 sm:$0xff]  }
 0x139   : > { %2005 = vmatprep.subr.bf16.mxu1 %v5369_v7  ;;  %1965 = vmatpush1.bf16.msra.mxu0 %v5368_v6  ;;  %v5374_v11 = vld [vmem:[%s6739_s1 + $0x120] ss:$24 sps:$4 sm:$0xff]   ;;  %v5378_v13 = vld [vmem:[%s6739_s1 + $0xf4] ss:$24 sps:$4 sm:$0xff]   ;;  %v5380_v15 = vld [vmem:[%s6739_s1 + $0xf0] ss:$24 sps:$4 sm:$0xff]  }
 0x13a   : > { %2006 = vmatpush1.bf16.msra.mxu1 %v5371_v8  ;;  %v5377_v12 = vld [vmem:[%s6739_s1 + $0x128] ss:$24 sps:$4 sm:$0xff]   ;;  %1966 = vmatprep.subr.bf16.mxu0 %v5372_v9  ;;  %v5381_v14 = vld [vmem:[%s6739_s1 + $0xfc] ss:$24 sps:$4 sm:$0xff]   ;;  %v5383_v16 = vld [vmem:[%s6739_s1 + $0xf8] ss:$24 sps:$4 sm:$0xff]  }
 0x13b   : > { %2007 = vmatprep.subr.bf16.mxu1 %v5375_v10  ;;  %v5384_v17 = vld [vmem:[%s6739_s1 + $0xc4] ss:$24 sps:$4 sm:$0xff]   ;;  %v5386_v19 = vld [vmem:[%s6739_s1 + $0xc0] ss:$24 sps:$4 sm:$0xff]   ;;  %v5390_v21 = vld [vmem:[%s6739_s1 + $0x94] ss:$24 sps:$4 sm:$0xff]  }
 0x13c   : > { %v5387_v18 = vld [vmem:[%s6739_s1 + $0xcc] ss:$24 sps:$4 sm:$0xff]   ;;  %v5389_v20 = vld [vmem:[%s6739_s1 + $0xc8] ss:$24 sps:$4 sm:$0xff]   ;;  %v5393_v22 = vld [vmem:[%s6739_s1 + $0x9c] ss:$24 sps:$4 sm:$0xff]  }
 0x13d   : > { %v6798_v2 = vld [vmem:[#allocation2] sm:$0xff]  ;;  %v6800_v3 = vld [vmem:[#allocation2 + $0x8] sm:$0xff]  ;;  %1967 = vmatpush1.bf16.msra.mxu0 %v5374_v11  ;;  %v5396_v25 = vld [vmem:[%s6739_s1 + $0x64] ss:$24 sps:$4 sm:$0xff]   ;;  %vm6287_vm0 = vmmov 0   ;;  %vm2203_vm1 = vcmask 1043456  }
 0x13e   : > { %v1408_v4 = vadd.f32 %v6800_v3, %v6798_v2  ;;  %2008 = vmatpush1.bf16.msra.mxu1 %v5377_v12  ;;  %1968 = vmatprep.subr.bf16.mxu0 %v5378_v13  ;;  %v5392_v23 = vld [vmem:[%s6739_s1 + $0x90] ss:$24 sps:$4 sm:$0xff]   ;;  %v5399_v26 = vld [vmem:[%s6739_s1 + $0x6c] ss:$24 sps:$4 sm:$0xff]   ;;  %v5398_v27 = vld [vmem:[%s6739_s1 + $0x60] ss:$24 sps:$4 sm:$0xff]  }
 0x13f   : > { %2009 = vmatprep.subr.bf16.mxu1 %v5381_v14  ;;  %v5395_v24 = vld [vmem:[%s6739_s1 + $0x98] ss:$24 sps:$4 sm:$0xff]   ;;  %v5401_v28 = vld [vmem:[%s6739_s1 + $0x68] ss:$24 sps:$4 sm:$0xff]   ;;  %v5402_v29 = vld [vmem:[%s6739_s1 + $0x34] ss:$24 sps:$4 sm:$0xff]  }
 0x140   : > { %1409 = vadd.xlane.f32.xlu0 %v1408_v4  ;;  %v5405_v30 = vld [vmem:[%s6739_s1 + $0x3c] ss:$24 sps:$4 sm:$0xff]   ;;  %v5404_v31 = vld [vmem:[%s6739_s1 + $0x30] ss:$24 sps:$4 sm:$0xff]   ;;  %v5411_v34 = vld [vmem:[%s6739_s1 + $0xc] ss:$24 sps:$4 sm:$0xff]  }
 0x141   : > { %1969 = vmatpush1.bf16.msra.mxu0 %v5380_v15  ;;  %v5407_v32 = vld [vmem:[%s6739_s1 + $0x38] ss:$24 sps:$4 sm:$0xff]   ;;  %v5408_v33 = vld [vmem:[%s6739_s1 + $0x4] ss:$24 sps:$4 sm:$0xff]   ;;  %v5413_v36 = vld [vmem:[%s6739_s1 + $0x8] ss:$24 sps:$4 sm:$0xff]  }
 0x142   : > { %2010 = vmatpush1.bf16.msra.mxu1 %v5383_v16  ;;  %1970 = vmatprep.subr.bf16.mxu0 %v5384_v17  ;;  %v5410_v35 = vld [vmem:[%s6739_s1] ss:$24 sps:$4 sm:$0xff]   ;;  %v5414_v37 = vld [vmem:[%s6739_s1 + $0x2d4] ss:$24 sps:$4 sm:$0xff]   ;;  %v5416_v39 = vld [vmem:[%s6739_s1 + $0x2d0] ss:$24 sps:$4 sm:$0xff]   ;;  %v1000_v16 = vlaneseq }
 0x143   : > { %2011 = vmatprep.subr.bf16.mxu1 %v5387_v18  ;;  %v5417_v38 = vld [vmem:[%s6739_s1 + $0x2dc] ss:$24 sps:$4 sm:$0xff]   ;;  %v5419_v40 = vld [vmem:[%s6739_s1 + $0x2d8] ss:$24 sps:$4 sm:$0xff]   ;;  %v5423_v50 = vld [vmem:[%s6739_s1 + $0x2ac] ss:$24 sps:$4 sm:$0xff]  }
 0x144   : > { %v5420_v41 = vld [vmem:[%s6739_s1 + $0x2a4] ss:$24 sps:$4 sm:$0xff]   ;;  %v5422_v49 = vld [vmem:[%s6739_s1 + $0x2a0] ss:$24 sps:$4 sm:$0xff]   ;;  %v5426_v52 = vld [vmem:[%s6739_s1 + $0x274] ss:$24 sps:$4 sm:$0xff]  }
 0x145   : > { %1971 = vmatpush1.bf16.msra.mxu0 %v5386_v19  ;;  %v5425_v51 = vld [vmem:[%s6739_s1 + $0x2a8] ss:$24 sps:$4 sm:$0xff]   ;;  %v5429_v54 = vld [vmem:[%s6739_s1 + $0x27c] ss:$24 sps:$4 sm:$0xff]   ;;  %v5431_v55 = vld [vmem:[%s6739_s1 + $0x278] ss:$24 sps:$4 sm:$0xff]  }
 0x146   : > { %2012 = vmatpush1.bf16.msra.mxu1 %v5389_v20  ;;  %1972 = vmatprep.subr.bf16.mxu0 %v5390_v21  ;;  %v5428_v53 = vld [vmem:[%s6739_s1 + $0x270] ss:$24 sps:$4 sm:$0xff]   ;;  %v5432_v56 = vld [vmem:[%s6739_s1 + $0x244] ss:$24 sps:$4 sm:$0xff]   ;;  %v5434_v57 = vld [vmem:[%s6739_s1 + $0x240] ss:$24 sps:$4 sm:$0xff]  }
 0x147   : > { %2013 = vmatprep.subr.bf16.mxu1 %v5393_v22  ;;  %v5435_v58 = vld [vmem:[%s6739_s1 + $0x24c] ss:$24 sps:$4 sm:$0xff]   ;;  %v5437_v59 = vld [vmem:[%s6739_s1 + $0x248] ss:$24 sps:$4 sm:$0xff]   ;;  %v5441_v61 = vld [vmem:[%s6739_s1 + $0x21c] ss:$24 sps:$4 sm:$0xff]  }
 0x148   : > { %v5438_v60 = vld [vmem:[%s6739_s1 + $0x214] ss:$24 sps:$4 sm:$0xff]   ;;  %v5440_v62 = vld [vmem:[%s6739_s1 + $0x210] ss:$24 sps:$4 sm:$0xff]   ;;  %v5444_v0 = vld [vmem:[%s6739_s1 + $0x1e4] ss:$24 sps:$4 sm:$0xff]  }
 0x149   : > { %1973 = vmatpush1.bf16.msra.mxu0 %v5392_v23  ;;  %v5443_v63 = vld [vmem:[%s6739_s1 + $0x218] ss:$24 sps:$4 sm:$0xff]   ;;  %v5447_v1 = vld [vmem:[%s6739_s1 + $0x1ec] ss:$24 sps:$4 sm:$0xff]   ;;  %v5453_v5 = vld [vmem:[%s6739_s1 + $0x1bc] ss:$24 sps:$4 sm:$0xff]  }
 0x14a   : > { %2014 = vmatpush1.bf16.msra.mxu1 %v5395_v24  ;;  %1974 = vmatprep.subr.bf16.mxu0 %v5396_v25  ;;  %v5450_v4 = vld [vmem:[%s6739_s1 + $0x1b4] ss:$24 sps:$4 sm:$0xff]   ;;  %v5452_v6 = vld [vmem:[%s6739_s1 + $0x1b0] ss:$24 sps:$4 sm:$0xff]   ;;  %v5456_v8 = vld [vmem:[%s6739_s1 + $0x184] ss:$24 sps:$4 sm:$0xff]  }
 0x14b   : > { %2015 = vmatprep.subr.bf16.mxu1 %v5399_v26  ;;  %v5455_v7 = vld [vmem:[%s6739_s1 + $0x1b8] ss:$24 sps:$4 sm:$0xff]   ;;  %v5459_v9 = vld [vmem:[%s6739_s1 + $0x18c] ss:$24 sps:$4 sm:$0xff]   ;;  %v5461_v11 = vld [vmem:[%s6739_s1 + $0x188] ss:$24 sps:$4 sm:$0xff]  }
 0x14c   : > { %v5458_v10 = vld [vmem:[%s6739_s1 + $0x180] ss:$24 sps:$4 sm:$0xff]   ;;  %v5464_v12 = vld [vmem:[%s6739_s1 + $0x164] ss:$24 sps:$4 sm:$0xff]   ;;  %v6880_v17 = vshrl.u32 %v1000_v16, 7  ;;  %vm2173_vm3 = vcmask 64512  }
 0x14d   : > { %1975 = vmatpush1.bf16.msra.mxu0 %v5398_v27  ;;  %v1014_v20 = vld [vmem:[%s791_s17] sm:$0x3]  ;;  %v1015_v21 = vld [vmem:[%s6786_s10] sm:$0x3]  ;;  %s7542_s19 = scalar_lea.vmem [#allocation21], %s6730_s18 }
 0x14e   : > { %2016 = vmatpush1.bf16.msra.mxu1 %v5401_v28  ;;  %1976 = vmatprep.subr.bf16.mxu0 %v5402_v29  ;;  %v6883_v18 = vsub.s32 1, %v6880_v17  ;;  %v6886_v19 = vsub.s32 0, %v6880_v17 }
 0x14f   : > { %2017 = vmatprep.subr.bf16.mxu1 %v5405_v30 }
 0x150   : > { %v1433_v22 = vrot.slane %v1014_v20, %v6883_v18  ;;  %v1429_v23 = vrot.slane %v1014_v20, %v6886_v19  ;;  %v1446_v26 = vrot.slane %v1015_v21, %v6883_v18  ;;  %v1442_v28 = vrot.slane %v1015_v21, %v6886_v19 }
 0x151   : > { %1977 = vmatpush1.bf16.msra.mxu0 %v5404_v31 }
 0x152   : > { %2018 = vmatpush1.bf16.msra.mxu1 %v5407_v32  ;;  %1978 = vmatprep.subr.bf16.mxu0 %v5408_v33 }
 0x153   : > { %2019 = vmatprep.subr.bf16.mxu1 %v5411_v34  ;;  %v5462_v34 = vld [vmem:[%s6739_s1 + $0x160] ss:$24 sps:$4 sm:$0xff]  }
 0x155   : > { %1979 = vmatpush1.bf16.msra.mxu0 %v5410_v35 }
 0x156   : > { %2020 = vmatpush1.bf16.msra.mxu1 %v5413_v36  ;;  %1980 = vmatprep.subr.bf16.mxu0 %v5414_v37  ;;  %v5467_v36 = vld [vmem:[%s6739_s1 + $0x134] ss:$24 sps:$4 sm:$0xff]   ;;  %v5465_v37 = vld [vmem:[%s6739_s1 + $0x130] ss:$24 sps:$4 sm:$0xff]  }
 0x157   : > { %2021 = vmatprep.subr.bf16.mxu1 %v5417_v38  ;;  %v5470_v38 = vld [vmem:[%s6739_s1 + $0x104] ss:$24 sps:$4 sm:$0xff]  }
 0x159   : > { %1981 = vmatpush2.bf16.msra.mxu0 %v5416_v39  ;;  %v5468_v39 = vld [vmem:[%s6739_s1 + $0x100] ss:$24 sps:$4 sm:$0xff]  }
 0x15a   : > { %2022 = vmatpush2.bf16.msra.mxu1 %v5419_v40  ;;  %1982 = vmatprep.subr.bf16.mxu0 %v5420_v41  ;;  %v5473_v40 = vld [vmem:[%s6739_s1 + $0xd4] ss:$24 sps:$4 sm:$0xff]   ;;  %v5471_v41 = vld [vmem:[%s6739_s1 + $0xd0] ss:$24 sps:$4 sm:$0xff]  }
 0x15b   : > { %2023 = vmatprep.subr.bf16.mxu1 %v5423_v50  ;;  %v5488_v50 = vld [vmem:[%s6739_s1 + $0x2e4] ss:$24 sps:$4 sm:$0xff]  }
 0x15d   : > { %1983 = vmatpush2.bf16.msra.mxu0 %v5422_v49  ;;  %v5483_v49 = vld [vmem:[%s6739_s1 + $0x10] ss:$24 sps:$4 sm:$0xff]  }
 0x15e   : > { %2024 = vmatpush2.bf16.msra.mxu1 %v5425_v51  ;;  %1984 = vmatprep.subr.bf16.mxu0 %v5426_v52  ;;  %v5486_v51 = vld [vmem:[%s6739_s1 + $0x2e0] ss:$24 sps:$4 sm:$0xff]   ;;  %v5491_v52 = vld [vmem:[%s6739_s1 + $0x2b4] ss:$24 sps:$4 sm:$0xff]  }
 0x15f   : > { %2025 = vmatprep.subr.bf16.mxu1 %v5429_v54  ;;  %v5494_v54 = vld [vmem:[%s6739_s1 + $0x284] ss:$24 sps:$4 sm:$0xff]  }
 0x161   : > { %1985 = vmatpush2.bf16.msra.mxu0 %v5428_v53  ;;  %v5489_v53 = vld [vmem:[%s6739_s1 + $0x2b0] ss:$24 sps:$4 sm:$0xff]  }
 0x162   : > { %2026 = vmatpush2.bf16.msra.mxu1 %v5431_v55  ;;  %1986 = vmatprep.subr.bf16.mxu0 %v5432_v56  ;;  %v5492_v55 = vld [vmem:[%s6739_s1 + $0x280] ss:$24 sps:$4 sm:$0xff]   ;;  %v5497_v56 = vld [vmem:[%s6739_s1 + $0x254] ss:$24 sps:$4 sm:$0xff]  }
 0x163   : > { %2027 = vmatprep.subr.bf16.mxu1 %v5435_v58  ;;  %v5500_v58 = vld [vmem:[%s6739_s1 + $0x224] ss:$24 sps:$4 sm:$0xff]  }
 0x165   : > { %1987 = vmatpush2.bf16.msra.mxu0 %v5434_v57  ;;  %v5495_v57 = vld [vmem:[%s6739_s1 + $0x250] ss:$24 sps:$4 sm:$0xff]  }
 0x166   : > { %2028 = vmatpush2.bf16.msra.mxu1 %v5437_v59  ;;  %1988 = vmatprep.subr.bf16.mxu0 %v5438_v60  ;;  %v5498_v59 = vld [vmem:[%s6739_s1 + $0x220] ss:$24 sps:$4 sm:$0xff]   ;;  %v5503_v60 = vld [vmem:[%s6739_s1 + $0x1f4] ss:$24 sps:$4 sm:$0xff]  }
 0x167   : > { %2029 = vmatprep.subr.bf16.mxu1 %v5441_v61  ;;  %v5501_v61 = vld [vmem:[%s6739_s1 + $0x1f0] ss:$24 sps:$4 sm:$0xff]  }
 0x169   : > { %1989 = vmatpush2.bf16.msra.mxu0 %v5440_v62  ;;  %v5506_v62 = vld [vmem:[%s6739_s1 + $0x1c4] ss:$24 sps:$4 sm:$0xff]  }
 0x16a   : > { %2030 = vmatpush2.bf16.msra.mxu1 %v5443_v63  ;;  %1990 = vmatprep.subr.bf16.mxu0 %v5444_v0  ;;  %v5504_v63 = vld [vmem:[%s6739_s1 + $0x1c0] ss:$24 sps:$4 sm:$0xff]   ;;  %v5509_v0 = vld [vmem:[%s6739_s1 + $0x194] ss:$24 sps:$4 sm:$0xff]  }
 0x16b   : > { %2031 = vmatprep.subr.bf16.mxu1 %v5447_v1  ;;  %v5507_v1 = vld [vmem:[%s6739_s1 + $0x190] ss:$24 sps:$4 sm:$0xff]  }
 0x1c9   : > { %v1410_v42 = vpop.xlane.xlu0 %1409 }
 0x1ca   : > { %v1412_v43 = vmul.f32 0.00390625, %v1410_v42  ;;  %v5476_v42 = vld [vmem:[%s6739_s1 + $0xa4] ss:$24 sps:$4 sm:$0xff]  }
 0x1cc   : > { %v6842_v44 = vsub.f32 %v6798_v2, %v1412_v43  ;;  %v6845_v45 = vsub.f32 %v6800_v3, %v1412_v43  ;;  %v5446_v2 = vld [vmem:[%s6739_s1 + $0x1e0] ss:$24 sps:$4 sm:$0xff]  }
 0x1cd   : > { %v5449_v3 = vld [vmem:[%s6739_s1 + $0x1e8] ss:$24 sps:$4 sm:$0xff]   ;;  %1991 = vmatpush2.bf16.msra.mxu0 %v5446_v2  ;;  %v6286_v2 = vmov 0.0  }
 0x1ce   : > { %v1415_v46 = vmul.f32 %v6842_v44, %v6842_v44  ;;  %v1416_v47 = vmul.f32 %v6845_v45, %v6845_v45  ;;  %2032 = vmatpush2.bf16.msra.mxu1 %v5449_v3  ;;  %1992 = vmatprep.subr.bf16.mxu0 %v5450_v4  ;;  %v5474_v43 = vld [vmem:[%s6739_s1 + $0xa0] ss:$24 sps:$4 sm:$0xff]   ;;  %v1464_v3 = vsub.s32 2, %v6880_v17 }
 0x1cf   : > { %2033 = vmatprep.subr.bf16.mxu1 %v5453_v5  ;;  %v1112_v4 = vld [vmem:[%s6747_s23] sm:$0x3f] }
 0x1d0   : > { %v1417_v48 = vadd.f32 %v1416_v47, %v1415_v46  ;;  %v5482_v46 = vld [vmem:[%s6739_s1 + $0x44] ss:$24 sps:$4 sm:$0xff]   ;;  %v5480_v47 = vld [vmem:[%s6739_s1 + $0x40] ss:$24 sps:$4 sm:$0xff]   ;;  %v1465_v5 = vrot.slane %v1112_v4, %v1464_v3 }
 0x1d1   : > { %1993 = vmatpush2.bf16.msra.mxu0 %v5452_v6  ;;  %v1457_v6 = vrot.slane %v1112_v4, %v6886_v19 }
 0x1d2   : > { %1418 = vadd.xlane.f32.xlu0 %v1417_v48  ;;  %2034 = vmatpush2.bf16.msra.mxu1 %v5455_v7  ;;  %v5485_v48 = vld [vmem:[%s6739_s1 + $0x14] ss:$24 sps:$4 sm:$0xff]   ;;  %v1468_v7 = vsub.s32 3, %v6880_v17 }
 0x1d3   : > { %1994 = vmatprep.subr.bf16.mxu0 %v5456_v8  ;;  %2035 = vmatprep.subr.bf16.mxu1 %v5459_v9 }
 0x1d5   : > { %1995 = vmatpush2.bf16.msra.mxu0 %v5458_v10 }
 0x1d6   : > { %2036 = vmatpush2.bf16.msra.mxu1 %v5461_v11  ;;  %2046 = vmatprep.subr.bf16.mxu0 %v5464_v12 }
 0x1d7   : > { %5182 = vmatprep.subr.bf16.mxu1 %v6286_v2 }
 0x25b   : > { %v1419_v13 = vpop.xlane.xlu0 %1418 }
 0x25c   : > { %v1420_v14 = vmul.f32 0.00390625, %v1419_v13 }
 0x25e   : > { %v1421_v15 = vadd.f32 1e-05, %v1420_v14 }
 0x260   : > { %5750 = vrsqrt.f32 %v1421_v15  ;;  %v1469_v15 = vrot.slane %v1112_v4, %v1468_v7 }
 0x26d   : > { %v5751_v24 = vpop.eup %5750 }
 0x26e   : > { %v1424_v25 = vmul.f32 %v5751_v24, %v6845_v45  ;;  %v1423_v27 = vmul.f32 %v5751_v24, %v6842_v44  ;;  %v5479_v44 = vld [vmem:[%s6739_s1 + $0x74] ss:$24 sps:$4 sm:$0xff]   ;;  %v5477_v45 = vld [vmem:[%s6739_s1 + $0x70] ss:$24 sps:$4 sm:$0xff]  }
 0x270   : > { %v1437_v29 = vmul.f32 %v1433_v22, %v1424_v25  ;;  %v1436_v30 = vmul.f32 %v1429_v23, %v1423_v27  ;;  %v1461_v23 = vrot.slane %v1112_v4, %v6883_v18 }
 0x272   : > { %v1450_v31 = vadd.f32 %v1446_v26, %v1437_v29  ;;  %v1449_v32 = vadd.f32 %v1442_v28, %v1436_v30 }
 0x274   : > { %v1452_v33 = vpack.c.bf16 %v1450_v31, %v1450_v31  ;;  %v6898_v35 = vpack.c.bf16 %v1449_v32, %v1449_v32  ;;  %v1472_v32 = vsub.s32 4, %v6880_v17 }
 0x276   : > { %1996 = vmatprep.mubr.bf16.mxu0 %v1452_v33  ;;  %2037 = vmatprep.mubr.bf16.mxu1 %v1452_v33 }
 0x277   : > { %1997 = vmatmul.mubr.bf16.vlgmr.msra.gmra.mxu0 %v6898_v35  ;;  %2038 = vmatmul.mubr.bf16.vlgmr.msra.gmra.mxu1 %v6898_v35 }
 0x278   : > { %2047 = vmatpush1.bf16.msra.mxu0 %v5462_v34  ;;  %2078 = vmatprep.mubr.bf16.mxu0 %v1452_v33  ;;  %v1476_v33 = vsub.s32 5, %v6880_v17  ;;  %v1473_v34 = vrot.slane %v1112_v4, %v1472_v32 }
 0x279   : > { %2048 = vmatprep.subr.bf16.mxu0 %v5467_v36  ;;  %5184 = vmatprep.mubr.msk.bf16.mxu1 %vm6287_vm0, %v6286_v2 }
 0x27c   : > { %2049 = vmatpush1.bf16.msra.mxu0 %v5465_v37 }
 0x27d   : > { %2050 = vmatprep.subr.bf16.mxu0 %v5470_v38 }
 0x280   : > { %2051 = vmatpush1.bf16.msra.mxu0 %v5468_v39 }
 0x281   : > { %2052 = vmatprep.subr.bf16.mxu0 %v5473_v40 }
 0x284   : > { %2053 = vmatpush1.bf16.msra.mxu0 %v5471_v41 }
 0x285   : > { %2054 = vmatprep.subr.bf16.mxu0 %v5476_v42 }
 0x288   : > { %2055 = vmatpush1.bf16.msra.mxu0 %v5474_v43 }
 0x289   : > { %2056 = vmatprep.subr.bf16.mxu0 %v5479_v44 }
 0x28c   : > { %2057 = vmatpush1.bf16.msra.mxu0 %v5477_v45 }
 0x28d   : > { %2058 = vmatprep.subr.bf16.mxu0 %v5482_v46  ;;  %v1003_v46 = vand.u32 127, %v1000_v16 }
 0x28f   : > { %vm1004_vm2 = vcmp.le.s32.totalorder %v1003_v46, %v6880_v17  ;;  %v5545_v46 = vld [vmem:[%s6750_s6 + $0xc4] ss:$8 sps:$4 sm:$0xff]  }
 0x290   : > { %2059 = vmatpush1.bf16.msra.mxu0 %v5480_v47  ;;  %v6288_v47 = vmov -1e+09  }
 0x291   : > { %2060 = vmatprep.subr.bf16.mxu0 %v5485_v48  ;;  %v1005_v48 = vsel %vm1004_vm2, 0.0, %v6288_v47  ;;  %v5543_v47 = vld [vmem:[%s6750_s6 + $0xc0] ss:$8 sps:$4 sm:$0xff]  }
 0x294   : > { %2061 = vmatpush1.bf16.msra.mxu0 %v5483_v49  ;;  %v4757_v49 = vld [vmem:[%s782_s25] ss:$0 sm:$0xff]  ;;  %s7543_s25 = sld [smem:[#allocation38_spill]] }
 0x295   : > { %2062 = vmatprep.subr.bf16.mxu0 %v5488_v50  ;;  %v1013_v50 = vadd.f32 %v4757_v49, %v1005_v48  ;;  %v5548_v48 = vld [vmem:[%s6750_s6 + $0xb4] ss:$8 sps:$4 sm:$0xff]   ;;  %v5546_v49 = vld [vmem:[%s6750_s6 + $0xb0] ss:$8 sps:$4 sm:$0xff]  }
 0x298   : > { %2063 = vmatpush2.bf16.msra.mxu0 %v5486_v51 }
 0x299   : > { %2064 = vmatprep.subr.bf16.mxu0 %v5491_v52 }
 0x29a   : > { %p5144_p11 = scmp.ne.s32.totalorder %s7543_s25, 1 }
 0x29b   : > { %s7544_s1 = sld [smem:[#allocation65_spill]] (!%p5144_p11) }
 0x29c   : > { %2065 = vmatpush2.bf16.msra.mxu0 %v5489_v53 }
 0x29d   : > { %2066 = vmatprep.subr.bf16.mxu0 %v5494_v54 }
 0x2a0   : > { %2067 = vmatpush2.bf16.msra.mxu0 %v5492_v55 }
 0x2a1   : > { %2068 = vmatprep.subr.bf16.mxu0 %v5497_v56 }
 0x2a4   : > { %2069 = vmatpush2.bf16.msra.mxu0 %v5495_v57 }
 0x2a5   : > { %2070 = vmatprep.subr.bf16.mxu0 %v5500_v58 }
 0x2a8   : > { %2071 = vmatpush2.bf16.msra.mxu0 %v5498_v59 }
 0x2a9   : > { %2072 = vmatprep.subr.bf16.mxu0 %v5503_v60 }
 0x2ac   : > { %2073 = vmatpush2.bf16.msra.mxu0 %v5501_v61 }
 0x2ad   : > { %2074 = vmatprep.subr.bf16.mxu0 %v5506_v62 }
 0x2b0   : > { %2075 = vmatpush2.bf16.msra.mxu0 %v5504_v63 }
 0x2b1   : > { %2076 = vmatprep.subr.bf16.mxu0 %v5509_v0 }
 0x2b4   : > { %2077 = vmatpush2.bf16.msra.mxu0 %v5507_v1 }
 0x2b5   : > { %5170 = vmatprep.subr.bf16.mxu0 %v6286_v2 }
 0x2b7   : > { %2079 = vmatmul.mubr.bf16.vlgmr.msra.gmra.mxu0 %v6898_v35  ;;  %v1477_v35 = vrot.slane %v1112_v4, %v1476_v33 }
 0x2b8   : > { %5172 = vmatprep.mubr.msk.bf16.mxu0 %vm6287_vm0, %v6286_v2 }
 0x337   : > { %v1998_v8 = vpop.f32.mrf.mxu0  ;;  %v2039_v9 = vpop.f32.mrf.mxu1 }
 0x338   : > { %v2040_v10 = vadd.f32 %v2039_v9, %v1465_v5  ;;  %v1999_v11 = vadd.f32 %v1998_v8, %v1457_v6 }
 0x339   : > { %v2000_v12 = vpop.f32.mrf.mxu0  ;;  %v2041_v13 = vpop.f32.mrf.mxu1 }
 0x33a   : > { %v2091_v14 = vpack.c.bf16 %v2040_v10, %v2040_v10  ;;  %v2087_v22 = vmul.f32 0.088388346, %v1999_v11  ;;  %v2042_v26 = vadd.f32 %v2041_v13, %v1469_v15  ;;  %v2001_v28 = vadd.f32 %v2000_v12, %v1461_v23  ;;  %v5510_v23 = vld [vmem:[%s6750_s6 + $0x70] ss:$8 sps:$4 sm:$0xff]  }
 0x33b   : > { %v2002_v20 = vpop.f32.mrf.mxu0  ;;  %v2043_v21 = vpop.f32.mrf.mxu1 }
 0x33c   : > { %5171 = vmatpush3.bf16.xpose.msra.mxu0 %v2091_v14  ;;  %v2089_v27 = vpack.c.bf16 %v2087_v22, %v2087_v22  ;;  %v2092_v29 = vpack.c.bf16 %v2042_v26, %v2042_v26  ;;  %v2088_v30 = vmul.f32 0.088388346, %v2001_v28  ;;  %v5512_v20 = vld [vmem:[%s6750_s6 + $0x74] ss:$8 sps:$4 sm:$0xff]   ;;  %v5513_v26 = vld [vmem:[%s6750_s6 + $0x60] ss:$8 sps:$4 sm:$0xff]  }
 0x33d   : > { %v2003_v24 = vpop.f32.mrf.mxu0  ;;  %v2044_v25 = vpop.f32.mrf.mxu1  ;;  %5176 = vmatprep.subr.bf16.mxu0 %v6286_v2  ;;  %v5521_v28 = vld [vmem:[%s6750_s6 + $0x44] ss:$8 sps:$4 sm:$0xff]  }
 0x33e   : > { %v2090_v31 = vpack.c.bf16 %v2088_v30, %v2088_v30  ;;  %v5515_v25 = vld [vmem:[%s6750_s6 + $0x64] ss:$8 sps:$4 sm:$0xff]   ;;  %v5524_v30 = vld [vmem:[%s6750_s6 + $0x34] ss:$8 sps:$4 sm:$0xff]  }
 0x343   : > { %5173 = vmatmul.mubr.bf16.vlgmr.msra.gmra.mxu0 %v2089_v27  ;;  %v5518_v27 = vld [vmem:[%s6750_s6 + $0x54] ss:$8 sps:$4 sm:$0xff]  }
 0x344   : > { %5177 = vmatpush3.bf16.xpose.msra.mxu0 %v2092_v29  ;;  %5178 = vmatprep.mubr.msk.bf16.mxu0 %vm6287_vm0, %v6286_v2  ;;  %v5519_v29 = vld [vmem:[%s6750_s6 + $0x40] ss:$8 sps:$4 sm:$0xff]  }
 0x34b   : > { %5179 = vmatmul.mubr.bf16.vlgmr.msra.gmra.mxu0 %v2090_v31  ;;  %v5522_v31 = vld [vmem:[%s6750_s6 + $0x30] ss:$8 sps:$4 sm:$0xff]  }
 0x377   : > { %v2080_v36 = vpop.f32.mrf.mxu0 }
 0x378   : > { %v2081_v37 = vadd.f32 %v2080_v36, %v1473_v34  ;;  %v5527_v34 = vld [vmem:[%s6750_s6 + $0x24] ss:$8 sps:$4 sm:$0xff]   ;;  %v5530_v36 = vld [vmem:[%s6750_s6 + $0x14] ss:$8 sps:$4 sm:$0xff]  }
 0x379   : > { %v2082_v38 = vpop.f32.mrf.mxu0 }
 0x37a   : > { %v2198_v39 = vpack.c.bf16 %v2081_v37, %v2081_v37  ;;  %v2083_v40 = vadd.f32 %v2082_v38, %v1477_v35  ;;  %v5525_v35 = vld [vmem:[%s6750_s6 + $0x20] ss:$8 sps:$4 sm:$0xff]   ;;  %v5528_v37 = vld [vmem:[%s6750_s6 + $0x10] ss:$8 sps:$4 sm:$0xff]   ;;  %v5533_v38 = vld [vmem:[%s6750_s6 + $0x4] ss:$8 sps:$4 sm:$0xff]  }
 0x37b   : > { %v2084_v41 = vpop.f32.mrf.mxu0 }
 0x37c   : > { %v2205_v42 = vsel %vm2203_vm1, %v2198_v39, 0  ;;  %v2199_v43 = vpack.c.bf16 %v2083_v40, %v2083_v40  ;;  %v5531_v39 = vld [vmem:[%s6750_s6] ss:$8 sps:$4 sm:$0xff]   ;;  %v5536_v40 = vld [vmem:[%s6750_s6 + $0xf4] ss:$8 sps:$4 sm:$0xff]  }
 0x37d   : > { %v2085_v44 = vpop.f32.mrf.mxu0  ;;  %5183 = vmatpush3.bf16.msra.mxu1 %v2205_v42  ;;  %v5534_v41 = vld [vmem:[%s6750_s6 + $0xf0] ss:$8 sps:$4 sm:$0xff]   ;;  %v5539_v42 = vld [vmem:[%s6750_s6 + $0xe4] ss:$8 sps:$4 sm:$0xff]  }
 0x37e   : > { %v2251_v45 = vsel %vm2203_vm1, %v2199_v43, 0  ;;  %5188 = vmatprep.subr.bf16.mxu1 %v6286_v2  ;;  %v5537_v43 = vld [vmem:[%s6750_s6 + $0xe0] ss:$8 sps:$4 sm:$0xff]   ;;  %v5542_v44 = vld [vmem:[%s6750_s6 + $0xd4] ss:$8 sps:$4 sm:$0xff]  }
 0x403   : > { %v2127_v51 = vpop.f32.mrf.mxu0 }
 0x404   : > { %v2128_v52 = vadd.f32 %v2127_v51, %v1013_v50  ;;  %v5549_v51 = vld [vmem:[%s6750_s6 + $0xa0] ss:$8 sps:$4 sm:$0xff]  }
 0x405   : > { %v5174_v53 = vpop.f32.mrf.mxu0 }
 0x406   : > { %v2174_v54 = vsel %vm2173_vm3, %v2128_v52, -inf  ;;  %v5552_v53 = vld [vmem:[%s6750_s6 + $0x90] ss:$8 sps:$4 sm:$0xff]  }
 0x407   : > { %v2130_v55 = vpop.f32.mrf.mxu0  ;;  %2175 = vmax.xlane.f32.xlu1 %v2174_v54  ;;  %v5557_v54 = vld [vmem:[%s6750_s6 + $0x84] ss:$8 sps:$4 sm:$0xff]  }
 0x408   : > { %v5555_v55 = vld [vmem:[%s6750_s6 + $0x80] ss:$8 sps:$4 sm:$0xff]  }
 0x409   : > { %v5175_v56 = vpop.f32.mrf.mxu0 }
 0x40b   : > { %v2167_v57 = vpop.f32.mrf.mxu0 }
 0x40c   : > { %v2168_v58 = vadd.f32 %v2167_v57, %v1013_v50  ;;  %v5551_v50 = vld [vmem:[%s6750_s6 + $0xa4] ss:$8 sps:$4 sm:$0xff]  }
 0x40d   : > { %v5180_v59 = vpop.f32.mrf.mxu0 }
 0x40e   : > { %v2177_v16 = vsel %vm2173_vm3, %v2168_v58, -inf }
 0x40f   : > { %v2170_v60 = vpop.f32.mrf.mxu0  ;;  %2178 = vmax.xlane.f32.xlu1 %v2177_v16 }
 0x411   : > { %v5181_v61 = vpop.f32.mrf.mxu0 }
 0x490   : > { %v2176_v62 = vpop.xlane.xlu1 %2175 }
 0x491   : > { %v2180_v63 = vsub.f32 %v2128_v52, %v2176_v62  ;;  %v5554_v52 = vld [vmem:[%s6750_s6 + $0x94] ss:$8 sps:$4 sm:$0xff]  }
 0x493   : > { %v2182_v0 = vmul.f32 1.442695, %v2180_v63 }
 0x495   : > { %5752 = vpow2.f32 %v2182_v0 }
 0x498   : > { %v2179_v1 = vpop.xlane.xlu1 %2178 }
 0x499   : > { %v2181_v4 = vsub.f32 %v2168_v58, %v2179_v1  ;;  %v1145_v1 = vld [vmem:[%s827_s16] sm:$0x3]  ;;  %s7545_s16 = sld [smem:[#allocation66_spill]] (!%p5144_p11) }
 0x49b   : > { %v2184_v5 = vmul.f32 1.442695, %v2181_v4  ;;  %v2299_v4 = vrot.slane %v1145_v1, %v6886_v19 }
 0x49d   : > { %5754 = vpow2.f32 %v2184_v5  ;;  %v2303_v5 = vrot.slane %v1145_v1, %v6883_v18 }
 0x4a2   : > { %v5753_v6 = vpop.eup %5752 }
 0x4a3   : > { %v2186_v8 = vsel %vm2173_vm3, %v5753_v6, 0.0 }
 0x4a4   : > { %2187 = vadd.xlane.f32.xlu0 %v2186_v8 }
 0x4aa   : > { %v5755_v9 = vpop.eup %5754 }
 0x4ab   : > { %v2189_v10 = vsel %vm2173_vm3, %v5755_v9, 0.0 }
 0x4ac   : > { %2190 = vadd.xlane.f32.xlu1 %v2189_v10 }
 0x52d   : > { %v2188_v11 = vpop.xlane.xlu0 %2187 }
 0x52e   : > { %5756 = vrcp.f32 %v2188_v11 }
 0x535   : > { %v2191_v12 = vpop.xlane.xlu1 %2190 }
 0x536   : > { %5758 = vrcp.f32 %v2191_v12  ;;  %v5778_v12 = vld [vmem:[#allocation2] sm:$0xff] }
 0x53b   : > { %v5757_v13 = vpop.eup %5756 }
 0x53c   : > { %v2194_v14 = vmul.f32 %v5757_v13, %v5753_v6 }
 0x53e   : > { %v2196_v15 = vpack.c.bf16 %v2194_v14, %v2194_v14  ;;  %v5779_v14 = vld [vmem:[#allocation2 + $0x8] sm:$0xff] }
 0x540   : > { %5185 = vmatmul.mubr.msk.bf16.vlgmr.msra.gmra.mxu1 %vm2173_vm3, %v2196_v15 }
 0x541   : > { %5189 = vmatpush3.bf16.msra.mxu1 %v2251_v45  ;;  %5190 = vmatprep.mubr.msk.bf16.mxu1 %vm6287_vm0, %v6286_v2  ;;  %v5516_v2 = vld [vmem:[%s6750_s6 + $0x50] ss:$8 sps:$4 sm:$0xff]  }
 0x542   : > { %2466 = vmatprep.subr.bf16.mxu1 %v5512_v20  ;;  %v5540_v45 = vld [vmem:[%s6750_s6 + $0xd0] ss:$8 sps:$4 sm:$0xff]  }
 0x543   : > { %v5759_v21 = vpop.eup %5758 }
 0x544   : > { %v2195_v22 = vmul.f32 %v5759_v21, %v5755_v9 }
 0x546   : > { %v2197_v24 = vpack.c.bf16 %v2195_v22, %v2195_v22  ;;  %v1204_v22 = vld [vmem:[%s6766_s7 + $0x1c0] sm:$0xff] }
 0x548   : > { %5191 = vmatmul.mubr.msk.bf16.vlgmr.msra.gmra.mxu1 %vm2173_vm3, %v2197_v24  ;;  %v1205_v24 = vld [vmem:[%s6766_s7 + $0x1c8] sm:$0xff] }
 0x549   : > { %2467 = vmatpush1.bf16.msra.mxu1 %v5510_v23  ;;  %v1208_v23 = vld [vmem:[%s6766_s7 + $0x1e0] sm:$0xff] }
 0x54a   : > { %2468 = vmatprep.subr.bf16.mxu1 %v5515_v25  ;;  %v4944_v25 = vcombine.low %v1204_v22, %v1208_v23 }
 0x54d   : > { %2469 = vmatpush1.bf16.msra.mxu1 %v5513_v26  ;;  %v4945_v26 = vcombine.high %v1204_v22, %v1208_v23  ;;  %v1152_v22 = vld [vmem:[%s6766_s7 + $0x20] sm:$0xff]  ;;  %v1149_v23 = vld [vmem:[%s6766_s7 + $0x8] sm:$0xff] }
 0x54e   : > { %2470 = vmatprep.subr.bf16.mxu1 %v5518_v27  ;;  %v1209_v27 = vld [vmem:[%s6766_s7 + $0x1e8] sm:$0xff] }
 0x54f   : > { %3234 = vmatprep.subr.bf16.mxu0 %v4945_v26 }
 0x550   : > { %3235 = vmatpush1.bf16.msra.mxu0 %v4944_v25 }
 0x551   : > { %2471 = vmatpush1.bf16.msra.mxu1 %v5516_v2  ;;  %v1196_v2 = vld [vmem:[%s6766_s7 + $0x180] sm:$0xff] }
 0x552   : > { %2472 = vmatprep.subr.bf16.mxu1 %v5521_v28  ;;  %v1200_v28 = vld [vmem:[%s6766_s7 + $0x1a0] sm:$0xff] }
 0x555   : > { %2473 = vmatpush1.bf16.msra.mxu1 %v5519_v29  ;;  %v4946_v29 = vcombine.low %v1205_v24, %v1209_v27 }
 0x556   : > { %2474 = vmatprep.subr.bf16.mxu1 %v5524_v30  ;;  %v4947_v30 = vcombine.high %v1205_v24, %v1209_v27  ;;  %v1153_v24 = vld [vmem:[%s6766_s7 + $0x28] sm:$0xff] }
 0x559   : > { %2475 = vmatpush1.bf16.msra.mxu1 %v5522_v31  ;;  %v4937_v31 = vcombine.high %v1196_v2, %v1200_v28 }
 0x55a   : > { %2476 = vmatprep.subr.bf16.mxu1 %v5527_v34  ;;  %v1197_v34 = vld [vmem:[%s6766_s7 + $0x188] sm:$0xff] }
 0x55b   : > { %3236 = vmatprep.subr.bf16.mxu0 %v4937_v31  ;;  %v1273_v31 = vld [vmem:[%s6766_s7 + $0x3e8] sm:$0xff] }
 0x55d   : > { %2477 = vmatpush1.bf16.msra.mxu1 %v5525_v35  ;;  %v1201_v35 = vld [vmem:[%s6766_s7 + $0x1a8] sm:$0xff] }
 0x55e   : > { %2478 = vmatprep.subr.bf16.mxu1 %v5530_v36  ;;  %v1188_v36 = vld [vmem:[%s6766_s7 + $0x140] sm:$0xff] }
 0x561   : > { %2479 = vmatpush1.bf16.msra.mxu1 %v5528_v37  ;;  %v4939_v37 = vcombine.high %v1197_v34, %v1201_v35 }
 0x562   : > { %2480 = vmatprep.subr.bf16.mxu1 %v5533_v38  ;;  %v1192_v38 = vld [vmem:[%s6766_s7 + $0x160] sm:$0xff] }
 0x565   : > { %2481 = vmatpush1.bf16.msra.mxu1 %v5531_v39  ;;  %v1189_v39 = vld [vmem:[%s6766_s7 + $0x148] sm:$0xff] }
 0x566   : > { %2482 = vmatprep.subr.bf16.mxu1 %v5536_v40  ;;  %v1193_v40 = vld [vmem:[%s6766_s7 + $0x168] sm:$0xff] }
 0x569   : > { %2483 = vmatpush2.bf16.msra.mxu1 %v5534_v41  ;;  %v4936_v41 = vcombine.low %v1196_v2, %v1200_v28  ;;  %v4891_v2 = vcombine.high %v1149_v23, %v1153_v24  ;;  %v1268_v28 = vld [vmem:[%s6766_s7 + $0x3c0] sm:$0xff] }
 0x56a   : > { %2484 = vmatprep.subr.bf16.mxu1 %v5539_v42  ;;  %v4938_v42 = vcombine.low %v1197_v34, %v1201_v35  ;;  %v4890_v35 = vcombine.low %v1149_v23, %v1153_v24  ;;  %v1229_v23 = vld [vmem:[%s6766_s7 + $0x288] sm:$0xff] }
 0x56b   : > { %3237 = vmatpush1.bf16.msra.mxu0 %v4936_v41  ;;  %v1265_v41 = vld [vmem:[%s6766_s7 + $0x3a8] sm:$0xff] }
 0x56c   : > { %v1233_v24 = vld [vmem:[%s6766_s7 + $0x2a8] sm:$0xff] }
 0x56d   : > { %2485 = vmatpush2.bf16.msra.mxu1 %v5537_v43  ;;  %v4929_v43 = vcombine.high %v1188_v36, %v1192_v38 }
 0x56e   : > { %2486 = vmatprep.subr.bf16.mxu1 %v5542_v44  ;;  %v4931_v44 = vcombine.high %v1189_v39, %v1193_v40 }
 0x56f   : > { %3238 = vmatprep.subr.bf16.mxu0 %v4929_v43 }
 0x571   : > { %2487 = vmatpush2.bf16.msra.mxu1 %v5540_v45  ;;  %v1180_v45 = vld [vmem:[%s6766_s7 + $0x100] sm:$0xff] }
 0x572   : > { %2488 = vmatprep.subr.bf16.mxu1 %v5545_v46  ;;  %v1184_v46 = vld [vmem:[%s6766_s7 + $0x120] sm:$0xff] }
 0x575   : > { %2489 = vmatpush2.bf16.msra.mxu1 %v5543_v47  ;;  %v1181_v47 = vld [vmem:[%s6766_s7 + $0x108] sm:$0xff] }
 0x576   : > { %2490 = vmatprep.subr.bf16.mxu1 %v5548_v48  ;;  %v1185_v48 = vld [vmem:[%s6766_s7 + $0x128] sm:$0xff] }
 0x579   : > { %2491 = vmatpush2.bf16.msra.mxu1 %v5546_v49  ;;  %v4928_v49 = vcombine.low %v1188_v36, %v1192_v38  ;;  %v1260_v38 = vld [vmem:[%s6766_s7 + $0x380] sm:$0xff] }
 0x57a   : > { %2492 = vmatprep.subr.bf16.mxu1 %v5551_v50  ;;  %v4930_v50 = vcombine.low %v1189_v39, %v1193_v40  ;;  %v1264_v39 = vld [vmem:[%s6766_s7 + $0x3a0] sm:$0xff]  ;;  %v1261_v40 = vld [vmem:[%s6766_s7 + $0x388] sm:$0xff] }
 0x57b   : > { %3239 = vmatpush1.bf16.msra.mxu0 %v4928_v49 }
 0x57d   : > { %2493 = vmatpush2.bf16.msra.mxu1 %v5549_v51  ;;  %v4921_v51 = vcombine.high %v1180_v45, %v1184_v46 }
 0x57e   : > { %2494 = vmatprep.subr.bf16.mxu1 %v5554_v52  ;;  %v4923_v52 = vcombine.high %v1181_v47, %v1185_v48 }
 0x57f   : > { %3240 = vmatprep.subr.bf16.mxu0 %v4921_v51 }
 0x581   : > { %2495 = vmatpush2.bf16.msra.mxu1 %v5552_v53  ;;  %v1172_v53 = vld [vmem:[%s6766_s7 + $0xc0] sm:$0xff] }
 0x582   : > { %2496 = vmatprep.subr.bf16.mxu1 %v5557_v54  ;;  %v1176_v54 = vld [vmem:[%s6766_s7 + $0xe0] sm:$0xff] }
 0x585   : > { %2497 = vmatpush2.bf16.msra.mxu1 %v5555_v55  ;;  %v1173_v55 = vld [vmem:[%s6766_s7 + $0xc8] sm:$0xff] }
 0x586   : > { %3275 = vmatprep.subr.bf16.mxu1 %v4947_v30  ;;  %v1269_v30 = vld [vmem:[%s6766_s7 + $0x3c8] sm:$0xff] }
 0x587   : > { %v5010_v43 = vcombine.low %v1269_v30, %v1273_v31 }
 0x600   : > { %v2241_v56 = vpop.f32.mrf.mxu1 }
 0x601   : > { %v2293_v61 = vpack.c.bf16 %v2241_v56, %v2241_v56  ;;  %v1177_v56 = vld [vmem:[%s6766_s7 + $0xe8] sm:$0xff] }
 0x602   : > { %v5186_v57 = vpop.f32.mrf.mxu1  ;;  %v4914_v1 = vcombine.low %v1173_v55, %v1177_v56 }
 0x603   : > { %v4920_v57 = vcombine.low %v1180_v45, %v1184_v46  ;;  %v5003_v45 = vcombine.high %v1261_v40, %v1265_v41  ;;  %v5000_v46 = vcombine.low %v1260_v38, %v1264_v39 }
 0x604   : > { %v2244_v58 = vpop.f32.mrf.mxu1 }
 0x605   : > { %v4922_v58 = vcombine.low %v1181_v47, %v1185_v48  ;;  %3241 = vmatpush1.bf16.msra.mxu0 %v4920_v57  ;;  %v5002_v47 = vcombine.low %v1261_v40, %v1265_v41  ;;  %v1253_v57 = vld [vmem:[%s6766_s7 + $0x348] sm:$0xff] }
 0x606   : > { %v5187_v59 = vpop.f32.mrf.mxu1  ;;  %v1213_v40 = vld [vmem:[%s6766_s7 + $0x208] sm:$0xff] }
 0x607   : > { %v4913_v59 = vcombine.high %v1172_v53, %v1176_v54  ;;  %v1217_v41 = vld [vmem:[%s6766_s7 + $0x228] sm:$0xff] }
 0x608   : > { %v2287_v16 = vpop.f32.mrf.mxu1 }
 0x609   : > { %v2294_v60 = vpack.c.bf16 %v2287_v16, %v2287_v16  ;;  %v4915_v16 = vcombine.high %v1173_v55, %v1177_v56  ;;  %3242 = vmatprep.subr.bf16.mxu0 %v4913_v59  ;;  %v1252_v55 = vld [vmem:[%s6766_s7 + $0x340] sm:$0xff]  ;;  %v1257_v59 = vld [vmem:[%s6766_s7 + $0x368] sm:$0xff] }
 0x60a   : > { %v5192_v62 = vpop.f32.mrf.mxu1  ;;  %v1256_v56 = vld [vmem:[%s6766_s7 + $0x360] sm:$0xff] }
 0x60b   : > { %2498 = vmatprep.mubr.bf16.mxu1 %v2294_v60  ;;  %v1164_v60 = vld [vmem:[%s6766_s7 + $0x80] sm:$0xff]  ;;  %v1165_v62 = vld [vmem:[%s6766_s7 + $0x88] sm:$0xff] }
 0x60c   : > { %v2290_v63 = vpop.f32.mrf.mxu1  ;;  %2499 = vmatmul.mubr.bf16.vlgmr.msra.gmra.mxu1 %v2293_v61  ;;  %v1168_v61 = vld [vmem:[%s6766_s7 + $0xa0] sm:$0xff] }
 0x60d   : > { %3276 = vmatpush1.bf16.msra.mxu1 %v4946_v29  ;;  %v1169_v63 = vld [vmem:[%s6766_s7 + $0xa8] sm:$0xff]  ;;  %v1272_v29 = vld [vmem:[%s6766_s7 + $0x3e0] sm:$0xff] }
 0x60e   : > { %v5193_v0 = vpop.f32.mrf.mxu1  ;;  %3277 = vmatprep.subr.bf16.mxu1 %v4939_v37  ;;  %v5009_v36 = vcombine.high %v1268_v28, %v1272_v29  ;;  %v5011_v37 = vcombine.high %v1269_v30, %v1273_v31  ;;  %v1221_v30 = vld [vmem:[%s6766_s7 + $0x248] sm:$0xff] }
 0x60f   : > { %v4912_v0 = vcombine.low %v1172_v53, %v1176_v54  ;;  %v1225_v31 = vld [vmem:[%s6766_s7 + $0x268] sm:$0xff] }
 0x611   : > { %3278 = vmatpush1.bf16.msra.mxu1 %v4938_v42  ;;  %3243 = vmatpush1.bf16.msra.mxu0 %v4912_v0  ;;  %v5008_v42 = vcombine.low %v1268_v28, %v1272_v29  ;;  %v1245_v0 = vld [vmem:[%s6766_s7 + $0x308] sm:$0xff]  ;;  %v1220_v28 = vld [vmem:[%s6766_s7 + $0x240] sm:$0xff] }
 0x612   : > { %3279 = vmatprep.subr.bf16.mxu1 %v4931_v44  ;;  %v5001_v44 = vcombine.high %v1260_v38, %v1264_v39  ;;  %v1224_v29 = vld [vmem:[%s6766_s7 + $0x260] sm:$0xff] }
 0x613   : > { %v1212_v38 = vld [vmem:[%s6766_s7 + $0x200] sm:$0xff] }
 0x614   : > { %v1216_v39 = vld [vmem:[%s6766_s7 + $0x220] sm:$0xff] }
 0x615   : > { %3280 = vmatpush1.bf16.msra.mxu1 %v4930_v50 }
 0x616   : > { %3281 = vmatprep.subr.bf16.mxu1 %v4923_v52 }
 0x619   : > { %3282 = vmatpush1.bf16.msra.mxu1 %v4922_v58  ;;  %v4993_v58 = vcombine.high %v1252_v55, %v1256_v56 }
 0x61a   : > { %3283 = vmatprep.subr.bf16.mxu1 %v4915_v16  ;;  %v4992_v16 = vcombine.low %v1252_v55, %v1256_v56 }
 0x61d   : > { %3284 = vmatpush1.bf16.msra.mxu1 %v4914_v1 }
 0x6cc   : > { %v2500_v6 = vpop.f32.mrf.mxu1 }
 0x6cd   : > { %v2501_v8 = vadd.f32 %v2500_v6, %v2299_v4  ;;  %v4905_v4 = vcombine.high %v1164_v60, %v1168_v61  ;;  %v1156_v6 = vld [vmem:[%s6766_s7 + $0x40] sm:$0xff] }
 0x6ce   : > { %v2502_v9 = vpop.f32.mrf.mxu1 }
 0x6cf   : > { %v2503_v10 = vadd.f32 %v2502_v9, %v2303_v5  ;;  %v7006_v13 = vadd.f32 %v5778_v12, %v2501_v8  ;;  %v4907_v5 = vcombine.high %v1165_v62, %v1169_v63  ;;  %v1160_v8 = vld [vmem:[%s6766_s7 + $0x60] sm:$0xff]  ;;  %v1157_v9 = vld [vmem:[%s6766_s7 + $0x48] sm:$0xff]  ;;  %3244 = vmatprep.subr.bf16.mxu0 %v4905_v4  ;;  %v4906_v12 = vcombine.low %v1165_v62, %v1169_v63 }
 0x6d0   : > { %v2504_v11 = vpop.f32.mrf.mxu1  ;;  %v4896_v25 = vcombine.low %v1156_v6, %v1160_v8  ;;  %v1244_v62 = vld [vmem:[%s6766_s7 + $0x300] sm:$0xff] }
 0x6d1   : > { %v7008_v15 = vadd.f32 %v5779_v14, %v2503_v10  ;;  %v1161_v10 = vld [vmem:[%s6766_s7 + $0x68] sm:$0xff]  ;;  %v4904_v11 = vcombine.low %v1164_v60, %v1168_v61  ;;  %v4897_v14 = vcombine.high %v1156_v6, %v1160_v8  ;;  %3285 = vmatprep.subr.bf16.mxu1 %v4907_v5  ;;  %v4994_v60 = vcombine.low %v1253_v57, %v1257_v59  ;;  %v1248_v63 = vld [vmem:[%s6766_s7 + $0x320] sm:$0xff] }
 0x6d2   : > { %v2505_v20 = vpop.f32.mrf.mxu1  ;;  %3286 = vmatpush1.bf16.msra.mxu1 %v4906_v12  ;;  %v4898_v26 = vcombine.low %v1157_v9, %v1161_v10  ;;  %v4995_v61 = vcombine.high %v1253_v57, %v1257_v59  ;;  %v4984_v1 = vcombine.low %v1244_v62, %v1248_v63  ;;  %v4985_v4 = vcombine.high %v1244_v62, %v1248_v63  ;;  %v1249_v5 = vld [vmem:[%s6766_s7 + $0x328] sm:$0xff]  ;;  %v1236_v6 = vld [vmem:[%s6766_s7 + $0x2c0] sm:$0xff] }
 0x6d3   : > { %v2509_v21 = vadd.f32 %v7008_v15, %v7006_v13  ;;  %v4899_v20 = vcombine.high %v1157_v9, %v1161_v10  ;;  %3245 = vmatpush1.bf16.msra.mxu0 %v4904_v11  ;;  %v1240_v8 = vld [vmem:[%s6766_s7 + $0x2e0] sm:$0xff]  ;;  %v4986_v9 = vcombine.low %v1245_v0, %v1249_v5  ;;  %v4987_v10 = vcombine.high %v1245_v0, %v1249_v5  ;;  %v1237_v12 = vld [vmem:[%s6766_s7 + $0x2c8] sm:$0xff] }
 0x6d4   : > { %3246 = vmatprep.subr.bf16.mxu0 %v4897_v14  ;;  %v4977_v11 = vcombine.high %v1236_v6, %v1240_v8  ;;  %v1241_v14 = vld [vmem:[%s6766_s7 + $0x2e8] sm:$0xff] }
 0x6d5   : > { %2510 = vadd.xlane.f32.xlu0 %v2509_v21  ;;  %v1148_v21 = vld [vmem:[%s6766_s7] sm:$0xff]  ;;  %3287 = vmatprep.subr.bf16.mxu1 %v4899_v20 }
 0x6d6   : > { %v4889_v27 = vcombine.high %v1148_v21, %v1152_v22  ;;  %v4888_v34 = vcombine.low %v1148_v21, %v1152_v22  ;;  %3288 = vmatpush1.bf16.msra.mxu1 %v4898_v26  ;;  %v1228_v20 = vld [vmem:[%s6766_s7 + $0x280] sm:$0xff]  ;;  %v4979_v21 = vcombine.high %v1237_v12, %v1241_v14  ;;  %v4978_v26 = vcombine.low %v1237_v12, %v1241_v14  ;;  %v1198_v12 = vld [vmem:[%s6766_s7 + $0x190] sm:$0xff] }
 0x6d7   : > { %3247 = vmatpush1.bf16.msra.mxu0 %v4896_v25  ;;  %3289 = vmatprep.subr.bf16.mxu1 %v4891_v2  ;;  %v1232_v22 = vld [vmem:[%s6766_s7 + $0x2a0] sm:$0xff]  ;;  %v4976_v25 = vcombine.low %v1236_v6, %v1240_v8  ;;  %v4971_v2 = vcombine.high %v1229_v23, %v1233_v24  ;;  %v1202_v14 = vld [vmem:[%s6766_s7 + $0x1b0] sm:$0xff] }
 0x6d8   : > { %3248 = vmatprep.subr.bf16.mxu0 %v4889_v27  ;;  %v4969_v27 = vcombine.high %v1228_v20, %v1232_v22 }
 0x6da   : > { %3290 = vmatpush1.bf16.msra.mxu1 %v4890_v35  ;;  %v4970_v35 = vcombine.low %v1229_v23, %v1233_v24 }
 0x6db   : > { %3249 = vmatpush1.bf16.msra.mxu0 %v4888_v34  ;;  %3291 = vmatprep.subr.bf16.mxu1 %v5011_v37  ;;  %v4968_v34 = vcombine.low %v1228_v20, %v1232_v22  ;;  %v4963_v37 = vcombine.high %v1221_v30, %v1225_v31  ;;  %v1199_v20 = vld [vmem:[%s6766_s7 + $0x198] sm:$0xff] }
 0x6dc   : > { %3250 = vmatprep.subr.bf16.mxu0 %v5009_v36  ;;  %v4961_v36 = vcombine.high %v1220_v28, %v1224_v29 }
 0x6de   : > { %3292 = vmatpush2.bf16.msra.mxu1 %v5010_v43  ;;  %v4962_v43 = vcombine.low %v1221_v30, %v1225_v31  ;;  %v1182_v31 = vld [vmem:[%s6766_s7 + $0x110] sm:$0xff] }
 0x6df   : > { %3251 = vmatpush2.bf16.msra.mxu0 %v5008_v42  ;;  %3293 = vmatprep.subr.bf16.mxu1 %v5003_v45  ;;  %v4960_v42 = vcombine.low %v1220_v28, %v1224_v29  ;;  %v4955_v45 = vcombine.high %v1213_v40, %v1217_v41 }
 0x6e0   : > { %3252 = vmatprep.subr.bf16.mxu0 %v5001_v44  ;;  %v4953_v44 = vcombine.high %v1212_v38, %v1216_v39 }
 0x6e2   : > { %3294 = vmatpush2.bf16.msra.mxu1 %v5002_v47  ;;  %v4954_v47 = vcombine.low %v1213_v40, %v1217_v41  ;;  %v1174_v41 = vld [vmem:[%s6766_s7 + $0xd0] sm:$0xff] }
 0x6e3   : > { %3253 = vmatpush2.bf16.msra.mxu0 %v5000_v46  ;;  %3295 = vmatprep.subr.bf16.mxu1 %v4995_v61  ;;  %v4952_v46 = vcombine.low %v1212_v38, %v1216_v39  ;;  %v1147_v61 = vld [vmem:[%s845_s22] sm:$0x3] }
 0x6e4   : > { %3254 = vmatprep.subr.bf16.mxu0 %v4993_v58  ;;  %v2542_v6 = vrot.slane %v1147_v61, %v6886_v19 }
 0x6e6   : > { %3296 = vmatpush2.bf16.msra.mxu1 %v4994_v60  ;;  %v1146_v60 = vld [vmem:[%s836_s20] sm:$0x3] }
 0x6e7   : > { %3255 = vmatpush2.bf16.msra.mxu0 %v4992_v16  ;;  %3297 = vmatprep.subr.bf16.mxu1 %v4987_v10  ;;  %v2533_v62 = vrot.slane %v1146_v60, %v6883_v18  ;;  %v2529_v63 = vrot.slane %v1146_v60, %v6886_v19  ;;  %v1159_v60 = vld [vmem:[%s6766_s7 + $0x58] sm:$0xff] }
 0x6e8   : > { %3256 = vmatprep.subr.bf16.mxu0 %v4985_v4  ;;  %v2546_v4 = vrot.slane %v1147_v61, %v6883_v18  ;;  %v1163_v61 = vld [vmem:[%s6766_s7 + $0x78] sm:$0xff] }
 0x6ea   : > { %3298 = vmatpush2.bf16.msra.mxu1 %v4986_v9 }
 0x6eb   : > { %3257 = vmatpush2.bf16.msra.mxu0 %v4984_v1  ;;  %3299 = vmatprep.subr.bf16.mxu1 %v4979_v21  ;;  %v1203_v21 = vld [vmem:[%s6766_s7 + $0x1b8] sm:$0xff] }
 0x6ec   : > { %3258 = vmatprep.subr.bf16.mxu0 %v4977_v11  ;;  %v4943_v24 = vcombine.high %v1199_v20, %v1203_v21  ;;  %v4942_v28 = vcombine.low %v1199_v20, %v1203_v21  ;;  %v1274_v20 = vld [vmem:[%s6766_s7 + $0x3f0] sm:$0xff]  ;;  %v1271_v21 = vld [vmem:[%s6766_s7 + $0x3d8] sm:$0xff] }
 0x6ee   : > { %3300 = vmatpush2.bf16.msra.mxu1 %v4978_v26  ;;  %v1191_v26 = vld [vmem:[%s6766_s7 + $0x158] sm:$0xff] }
 0x6ef   : > { %3259 = vmatpush2.bf16.msra.mxu0 %v4976_v25  ;;  %3301 = vmatprep.subr.bf16.mxu1 %v4971_v2  ;;  %v1194_v25 = vld [vmem:[%s6766_s7 + $0x170] sm:$0xff]  ;;  %v4940_v2 = vcombine.low %v1198_v12, %v1202_v14 }
 0x6f0   : > { %3260 = vmatprep.subr.bf16.mxu0 %v4969_v27  ;;  %v1195_v27 = vld [vmem:[%s6766_s7 + $0x178] sm:$0xff] }
 0x6f1   : > { %v4935_v30 = vcombine.high %v1191_v26, %v1195_v27  ;;  %v4934_v38 = vcombine.low %v1191_v26, %v1195_v27  ;;  %v1262_v26 = vld [vmem:[%s6766_s7 + $0x390] sm:$0xff] }
 0x6f2   : > { %3302 = vmatpush2.bf16.msra.mxu1 %v4970_v35  ;;  %v1183_v35 = vld [vmem:[%s6766_s7 + $0x118] sm:$0xff]  ;;  %v1266_v27 = vld [vmem:[%s6766_s7 + $0x3b0] sm:$0xff] }
 0x6f3   : > { %3261 = vmatpush2.bf16.msra.mxu0 %v4968_v34  ;;  %3303 = vmatprep.subr.bf16.mxu1 %v4963_v37  ;;  %v1186_v34 = vld [vmem:[%s6766_s7 + $0x130] sm:$0xff] }
 0x6f4   : > { %3262 = vmatprep.subr.bf16.mxu0 %v4961_v36  ;;  %v1187_v36 = vld [vmem:[%s6766_s7 + $0x138] sm:$0xff]  ;;  %v4925_v39 = vcombine.high %v1182_v31, %v1186_v34 }
 0x6f5   : > { %v4927_v40 = vcombine.high %v1183_v35, %v1187_v36 }
 0x6f6   : > { %3304 = vmatpush2.bf16.msra.mxu1 %v4962_v43  ;;  %v1175_v43 = vld [vmem:[%s6766_s7 + $0xd8] sm:$0xff] }
 0x6f7   : > { %3263 = vmatpush2.bf16.msra.mxu0 %v4960_v42  ;;  %3305 = vmatprep.subr.bf16.mxu1 %v4955_v45  ;;  %v1178_v42 = vld [vmem:[%s6766_s7 + $0xf0] sm:$0xff]  ;;  %v4924_v45 = vcombine.low %v1182_v31, %v1186_v34  ;;  %v5005_v31 = vcombine.high %v1262_v26, %v1266_v27 }
 0x6f8   : > { %3264 = vmatprep.subr.bf16.mxu0 %v4953_v44  ;;  %v1179_v44 = vld [vmem:[%s6766_s7 + $0xf8] sm:$0xff] }
 0x6fa   : > { %3306 = vmatpush2.bf16.msra.mxu1 %v4954_v47  ;;  %v4917_v47 = vcombine.high %v1174_v41, %v1178_v42 }
 0x6fb   : > { %3265 = vmatpush2.bf16.msra.mxu0 %v4952_v46  ;;  %v4926_v46 = vcombine.low %v1183_v35, %v1187_v36  ;;  %v1254_v35 = vld [vmem:[%s6766_s7 + $0x350] sm:$0xff] }
 0x6fc   : > { %v1258_v36 = vld [vmem:[%s6766_s7 + $0x370] sm:$0xff] }
 0x75e   : > { %v2511_v48 = vpop.xlane.xlu0 %2510 }
 0x75f   : > { %v2512_v49 = vmul.f32 0.00390625, %v2511_v48  ;;  %v1206_v48 = vld [vmem:[%s6766_s7 + $0x1d0] sm:$0xff] }
 0x761   : > { %v7053_v50 = vsub.f32 %v7006_v13, %v2512_v49  ;;  %v7056_v51 = vsub.f32 %v7008_v15, %v2512_v49  ;;  %v1210_v49 = vld [vmem:[%s6766_s7 + $0x1f0] sm:$0xff] }
 0x762   : > { %v4948_v55 = vcombine.low %v1206_v48, %v1210_v49 }
 0x763   : > { %v2515_v52 = vmul.f32 %v7053_v50, %v7053_v50  ;;  %v2516_v53 = vmul.f32 %v7056_v51, %v7056_v51 }
 0x765   : > { %v2517_v54 = vadd.f32 %v2516_v53, %v2515_v52  ;;  %v1207_v52 = vld [vmem:[%s6766_s7 + $0x1d8] sm:$0xff]  ;;  %v4949_v53 = vcombine.high %v1206_v48, %v1210_v49  ;;  %v4919_v48 = vcombine.high %v1175_v43, %v1179_v44  ;;  %v1166_v49 = vld [vmem:[%s6766_s7 + $0x90] sm:$0xff] }
 0x767   : > { %2518 = vadd.xlane.f32.xlu1 %v2517_v54  ;;  %v1211_v54 = vld [vmem:[%s6766_s7 + $0x1f8] sm:$0xff]  ;;  %3316 = vmatprep.subr.bf16.mxu0 %v4949_v53 }
 0x768   : > { %v4950_v56 = vcombine.low %v1207_v52, %v1211_v54  ;;  %v4951_v57 = vcombine.high %v1207_v52, %v1211_v54  ;;  %v1170_v52 = vld [vmem:[%s6766_s7 + $0xb0] sm:$0xff]  ;;  %v1167_v53 = vld [vmem:[%s6766_s7 + $0x98] sm:$0xff] }
 0x769   : > { %v1171_v54 = vld [vmem:[%s6766_s7 + $0xb8] sm:$0xff] }
 0x76a   : > { %3357 = vmatprep.subr.bf16.mxu1 %v4951_v57  ;;  %v4909_v57 = vcombine.high %v1166_v49, %v1170_v52 }
 0x7f0   : > { %v2519_v58 = vpop.xlane.xlu1 %2518 }
 0x7f1   : > { %v2520_v59 = vmul.f32 0.00390625, %v2519_v58  ;;  %v4911_v58 = vcombine.high %v1167_v53, %v1171_v54 }
 0x7f3   : > { %v2521_v16 = vadd.f32 1e-05, %v2520_v59  ;;  %v1158_v59 = vld [vmem:[%s6766_s7 + $0x50] sm:$0xff] }
 0x7f5   : > { %5760 = vrsqrt.f32 %v2521_v16  ;;  %v1162_v16 = vld [vmem:[%s6766_s7 + $0x70] sm:$0xff] }
 0x802   : > { %v5761_v0 = vpop.eup %5760 }
 0x803   : > { %v2524_v1 = vmul.f32 %v5761_v0, %v7056_v51  ;;  %v2523_v5 = vmul.f32 %v5761_v0, %v7053_v50  ;;  %v1190_v51 = vld [vmem:[%s6766_s7 + $0x150] sm:$0xff]  ;;  %v4941_v50 = vcombine.high %v1198_v12, %v1202_v14  ;;  %v4901_v0 = vcombine.high %v1158_v59, %v1162_v16 }
 0x804   : > { %v4933_v29 = vcombine.high %v1190_v51, %v1194_v25  ;;  %v4932_v37 = vcombine.low %v1190_v51, %v1194_v25  ;;  %v1270_v14 = vld [vmem:[%s6766_s7 + $0x3d0] sm:$0xff] }
 0x805   : > { %v2537_v8 = vmul.f32 %v2533_v62, %v2524_v1  ;;  %v2536_v9 = vmul.f32 %v2529_v63, %v2523_v5  ;;  %v4908_v62 = vcombine.low %v1166_v49, %v1170_v52  ;;  %v4910_v63 = vcombine.low %v1167_v53, %v1171_v54  ;;  %v1154_v5 = vld [vmem:[%s6766_s7 + $0x30] sm:$0xff] }
 0x806   : > { %v4903_v1 = vcombine.high %v1159_v60, %v1163_v61  ;;  %v1238_v53 = vld [vmem:[%s6766_s7 + $0x2d0] sm:$0xff] }
 0x807   : > { %v2550_v10 = vadd.f32 %v2546_v4, %v2537_v8  ;;  %v2549_v11 = vadd.f32 %v2542_v6, %v2536_v9  ;;  %v1150_v4 = vld [vmem:[%s6766_s7 + $0x10] sm:$0xff]  ;;  %v1151_v6 = vld [vmem:[%s6766_s7 + $0x18] sm:$0xff]  ;;  %v4900_v9 = vcombine.low %v1158_v59, %v1162_v16 }
 0x808   : > { %v1155_v8 = vld [vmem:[%s6766_s7 + $0x38] sm:$0xff]  ;;  %v4892_v51 = vcombine.low %v1150_v4, %v1154_v5  ;;  %v1242_v54 = vld [vmem:[%s6766_s7 + $0x2f0] sm:$0xff] }
 0x809   : > { %v2552_v22 = vpack.c.bf16 %v2550_v10, %v2550_v10  ;;  %v7104_v23 = vpack.c.bf16 %v2549_v11, %v2549_v11  ;;  %v4902_v10 = vcombine.low %v1159_v60, %v1163_v61  ;;  %v4893_v11 = vcombine.high %v1150_v4, %v1154_v5  ;;  %v1230_v60 = vld [vmem:[%s6766_s7 + $0x290] sm:$0xff] }
 0x80a   : > { %v4895_v12 = vcombine.high %v1151_v6, %v1155_v8  ;;  %v4981_v59 = vcombine.high %v1238_v53, %v1242_v54  ;;  %v1234_v61 = vld [vmem:[%s6766_s7 + $0x2b0] sm:$0xff] }
 0x80b   : > { %3266 = vmatprep.mubr.bf16.mxu0 %v2552_v22  ;;  %3307 = vmatprep.mubr.bf16.mxu1 %v2552_v22  ;;  %v4973_v4 = vcombine.high %v1230_v60, %v1234_v61 }
 0x80c   : > { %3267 = vmatmul.mubr.bf16.vlgmr.msra.gmra.mxu0 %v7104_v23  ;;  %3308 = vmatmul.mubr.bf16.vlgmr.msra.gmra.mxu1 %v7104_v23 }
 0x80d   : > { %3317 = vmatpush1.bf16.msra.mxu0 %v4948_v55  ;;  %3358 = vmatpush1.bf16.msra.mxu1 %v4950_v56  ;;  %v4916_v55 = vcombine.low %v1174_v41, %v1178_v42  ;;  %v4918_v56 = vcombine.low %v1175_v43, %v1179_v44  ;;  %v4997_v41 = vcombine.high %v1254_v35, %v1258_v36  ;;  %v1246_v43 = vld [vmem:[%s6766_s7 + $0x310] sm:$0xff] }
 0x80e   : > { %3348 = vmatprep.mubr.bf16.mxu0 %v2552_v22  ;;  %3389 = vmatprep.mubr.bf16.mxu1 %v2552_v22  ;;  %v1275_v22 = vld [vmem:[%s6766_s7 + $0x3f8] sm:$0xff]  ;;  %v1250_v44 = vld [vmem:[%s6766_s7 + $0x330] sm:$0xff] }
 0x80f   : > { %3318 = vmatprep.subr.bf16.mxu0 %v4941_v50  ;;  %3359 = vmatprep.subr.bf16.mxu1 %v4943_v24  ;;  %v4894_v50 = vcombine.low %v1151_v6, %v1155_v8  ;;  %v5013_v24 = vcombine.high %v1270_v14, %v1274_v20  ;;  %v5015_v25 = vcombine.high %v1271_v21, %v1275_v22  ;;  %v1222_v6 = vld [vmem:[%s6766_s7 + $0x250] sm:$0xff] }
 0x810   : > { %v4989_v49 = vcombine.high %v1246_v43, %v1250_v44  ;;  %v1226_v8 = vld [vmem:[%s6766_s7 + $0x270] sm:$0xff] }
 0x811   : > { %3319 = vmatpush1.bf16.msra.mxu0 %v4940_v2  ;;  %3360 = vmatpush1.bf16.msra.mxu1 %v4942_v28  ;;  %v1263_v2 = vld [vmem:[%s6766_s7 + $0x398] sm:$0xff] }
 0x812   : > { %3320 = vmatprep.subr.bf16.mxu0 %v4933_v29  ;;  %3361 = vmatprep.subr.bf16.mxu1 %v4935_v30  ;;  %v1267_v28 = vld [vmem:[%s6766_s7 + $0x3b8] sm:$0xff]  ;;  %v5012_v29 = vcombine.low %v1270_v14, %v1274_v20  ;;  %v5014_v30 = vcombine.low %v1271_v21, %v1275_v22  ;;  %v4965_v14 = vcombine.high %v1222_v6, %v1226_v8  ;;  %v1214_v21 = vld [vmem:[%s6766_s7 + $0x210] sm:$0xff] }
 0x813   : > { %v5007_v34 = vcombine.high %v1263_v2, %v1267_v28  ;;  %v1218_v22 = vld [vmem:[%s6766_s7 + $0x230] sm:$0xff] }
 0x815   : > { %3321 = vmatpush1.bf16.msra.mxu0 %v4932_v37  ;;  %3362 = vmatpush1.bf16.msra.mxu1 %v4934_v38  ;;  %v1255_v37 = vld [vmem:[%s6766_s7 + $0x358] sm:$0xff] }
 0x816   : > { %3322 = vmatprep.subr.bf16.mxu0 %v4925_v39  ;;  %3363 = vmatprep.subr.bf16.mxu1 %v4927_v40  ;;  %v1259_v38 = vld [vmem:[%s6766_s7 + $0x378] sm:$0xff]  ;;  %v5004_v39 = vcombine.low %v1262_v26, %v1266_v27  ;;  %v5006_v40 = vcombine.low %v1263_v2, %v1267_v28  ;;  %v4957_v26 = vcombine.high %v1214_v21, %v1218_v22 }
 0x817   : > { %v4999_v42 = vcombine.high %v1255_v37, %v1259_v38  ;;  %v4956_v2 = vcombine.low %v1214_v21, %v1218_v22  ;;  %v5629_v21 = vld [vmem:[%s6772_s0 + $0x1c4] ss:$8 sps:$4 sm:$0xff]   ;;  %v5624_v22 = vld [vmem:[%s6772_s0 + $0xc0] ss:$8 sps:$4 sm:$0xff]  }
 0x819   : > { %3323 = vmatpush1.bf16.msra.mxu0 %v4924_v45  ;;  %3364 = vmatpush1.bf16.msra.mxu1 %v4926_v46  ;;  %v1247_v45 = vld [vmem:[%s6766_s7 + $0x318] sm:$0xff] }
 0x81a   : > { %3324 = vmatprep.subr.bf16.mxu0 %v4917_v47  ;;  %3365 = vmatprep.subr.bf16.mxu1 %v4919_v48  ;;  %v1251_v46 = vld [vmem:[%s6766_s7 + $0x338] sm:$0xff]  ;;  %v4996_v47 = vcombine.low %v1254_v35, %v1258_v36  ;;  %v4998_v48 = vcombine.low %v1255_v37, %v1259_v38  ;;  %v5566_v35 = vld [vmem:[%s6772_s0 + $0x64] ss:$8 sps:$4 sm:$0xff]   ;;  %v5564_v37 = vld [vmem:[%s6772_s0 + $0x60] ss:$8 sps:$4 sm:$0xff]  }
 0x81b   : > { %v4991_v52 = vcombine.high %v1247_v45, %v1251_v46  ;;  %v5569_v36 = vld [vmem:[%s6772_s0 + $0x164] ss:$8 sps:$4 sm:$0xff]   ;;  %v5567_v38 = vld [vmem:[%s6772_s0 + $0x160] ss:$8 sps:$4 sm:$0xff]  }
 0x81d   : > { %3325 = vmatpush1.bf16.msra.mxu0 %v4916_v55  ;;  %3366 = vmatpush1.bf16.msra.mxu1 %v4918_v56  ;;  %v1239_v55 = vld [vmem:[%s6766_s7 + $0x2d8] sm:$0xff] }
 0x81e   : > { %3326 = vmatprep.subr.bf16.mxu0 %v4909_v57  ;;  %3367 = vmatprep.subr.bf16.mxu1 %v4911_v58  ;;  %v1243_v56 = vld [vmem:[%s6766_s7 + $0x2f8] sm:$0xff]  ;;  %v4988_v57 = vcombine.low %v1246_v43, %v1250_v44  ;;  %v4990_v58 = vcombine.low %v1247_v45, %v1251_v46  ;;  %v5581_v43 = vld [vmem:[%s6772_s0 + $0x144] ss:$8 sps:$4 sm:$0xff]   ;;  %v5576_v44 = vld [vmem:[%s6772_s0 + $0x40] ss:$8 sps:$4 sm:$0xff]  }
 0x81f   : > { %v4983_v16 = vcombine.high %v1239_v55, %v1243_v56  ;;  %v5579_v45 = vld [vmem:[%s6772_s0 + $0x140] ss:$8 sps:$4 sm:$0xff]   ;;  %v5584_v46 = vld [vmem:[%s6772_s0 + $0x34] ss:$8 sps:$4 sm:$0xff]  }
 0x821   : > { %3327 = vmatpush1.bf16.msra.mxu0 %v4908_v62  ;;  %3368 = vmatpush1.bf16.msra.mxu1 %v4910_v63  ;;  %v1231_v62 = vld [vmem:[%s6766_s7 + $0x298] sm:$0xff] }
 0x822   : > { %3328 = vmatprep.subr.bf16.mxu0 %v4901_v0  ;;  %3369 = vmatprep.subr.bf16.mxu1 %v4903_v1  ;;  %v1235_v63 = vld [vmem:[%s6766_s7 + $0x2b8] sm:$0xff]  ;;  %v4980_v0 = vcombine.low %v1238_v53, %v1242_v54  ;;  %v4982_v1 = vcombine.low %v1239_v55, %v1243_v56  ;;  %v5593_v53 = vld [vmem:[%s6772_s0 + $0x124] ss:$8 sps:$4 sm:$0xff]   ;;  %v5588_v54 = vld [vmem:[%s6772_s0 + $0x20] ss:$8 sps:$4 sm:$0xff]  }
 0x823   : > { %v4975_v5 = vcombine.high %v1231_v62, %v1235_v63  ;;  %v5591_v55 = vld [vmem:[%s6772_s0 + $0x120] ss:$8 sps:$4 sm:$0xff]   ;;  %v5596_v56 = vld [vmem:[%s6772_s0 + $0x14] ss:$8 sps:$4 sm:$0xff]  }
 0x825   : > { %3329 = vmatpush1.bf16.msra.mxu0 %v4900_v9  ;;  %3370 = vmatpush1.bf16.msra.mxu1 %v4902_v10  ;;  %v1223_v9 = vld [vmem:[%s6766_s7 + $0x258] sm:$0xff] }
 0x826   : > { %3330 = vmatprep.subr.bf16.mxu0 %v4893_v11  ;;  %3371 = vmatprep.subr.bf16.mxu1 %v4895_v12  ;;  %v1227_v10 = vld [vmem:[%s6766_s7 + $0x278] sm:$0xff]  ;;  %v4972_v11 = vcombine.low %v1230_v60, %v1234_v61  ;;  %v4974_v12 = vcombine.low %v1231_v62, %v1235_v63  ;;  %v5605_v60 = vld [vmem:[%s6772_s0 + $0x104] ss:$8 sps:$4 sm:$0xff]   ;;  %v5600_v61 = vld [vmem:[%s6772_s0] ss:$8 sps:$4 sm:$0xff]  }
 0x827   : > { %v4967_v20 = vcombine.high %v1223_v9, %v1227_v10  ;;  %v5603_v62 = vld [vmem:[%s6772_s0 + $0x100] ss:$8 sps:$4 sm:$0xff]   ;;  %v5608_v63 = vld [vmem:[%s6772_s0 + $0xf4] ss:$8 sps:$4 sm:$0xff]  }
 0x829   : > { %3331 = vmatpush1.bf16.msra.mxu0 %v4892_v51  ;;  %3372 = vmatpush1.bf16.msra.mxu1 %v4894_v50  ;;  %v1215_v51 = vld [vmem:[%s6766_s7 + $0x218] sm:$0xff] }
 0x82a   : > { %3332 = vmatprep.subr.bf16.mxu0 %v5013_v24  ;;  %3373 = vmatprep.subr.bf16.mxu1 %v5015_v25  ;;  %v1219_v50 = vld [vmem:[%s6766_s7 + $0x238] sm:$0xff]  ;;  %v4964_v24 = vcombine.low %v1222_v6, %v1226_v8  ;;  %v4966_v25 = vcombine.low %v1223_v9, %v1227_v10  ;;  %v5617_v6 = vld [vmem:[%s6772_s0 + $0x1e4] ss:$8 sps:$4 sm:$0xff]   ;;  %v5612_v8 = vld [vmem:[%s6772_s0 + $0xe0] ss:$8 sps:$4 sm:$0xff]  }
 0x82b   : > { %v4959_v27 = vcombine.high %v1215_v51, %v1219_v50  ;;  %v4958_v28 = vcombine.low %v1215_v51, %v1219_v50  ;;  %v5615_v9 = vld [vmem:[%s6772_s0 + $0x1e0] ss:$8 sps:$4 sm:$0xff]   ;;  %v5620_v10 = vld [vmem:[%s6772_s0 + $0xd4] ss:$8 sps:$4 sm:$0xff]  }
 0x82c   : > { %v5627_v51 = vld [vmem:[%s6772_s0 + $0x1c0] ss:$8 sps:$4 sm:$0xff]   ;;  %v5632_v50 = vld [vmem:[%s6772_s0 + $0xb4] ss:$8 sps:$4 sm:$0xff]  }
 0x82d   : > { %3333 = vmatpush2.bf16.msra.mxu0 %v5012_v29  ;;  %3374 = vmatpush2.bf16.msra.mxu1 %v5014_v30  ;;  %v5560_v29 = vld [vmem:[%s6772_s0 + $0x74] ss:$8 sps:$4 sm:$0xff]  }
 0x82e   : > { %3334 = vmatprep.subr.bf16.mxu0 %v5005_v31  ;;  %3375 = vmatprep.subr.bf16.mxu1 %v5007_v34  ;;  %v5563_v30 = vld [vmem:[%s6772_s0 + $0x174] ss:$8 sps:$4 sm:$0xff]   ;;  %v5558_v31 = vld [vmem:[%s6772_s0 + $0x70] ss:$8 sps:$4 sm:$0xff]  }
 0x82f   : > { %v5561_v34 = vld [vmem:[%s6772_s0 + $0x170] ss:$8 sps:$4 sm:$0xff]  }
 0x831   : > { %3335 = vmatpush2.bf16.msra.mxu0 %v5004_v39  ;;  %3376 = vmatpush2.bf16.msra.mxu1 %v5006_v40  ;;  %v5572_v39 = vld [vmem:[%s6772_s0 + $0x54] ss:$8 sps:$4 sm:$0xff]  }
 0x832   : > { %3336 = vmatprep.subr.bf16.mxu0 %v4997_v41  ;;  %3377 = vmatprep.subr.bf16.mxu1 %v4999_v42  ;;  %v5575_v40 = vld [vmem:[%s6772_s0 + $0x154] ss:$8 sps:$4 sm:$0xff]   ;;  %v5570_v41 = vld [vmem:[%s6772_s0 + $0x50] ss:$8 sps:$4 sm:$0xff]  }
 0x833   : > { %v5573_v42 = vld [vmem:[%s6772_s0 + $0x150] ss:$8 sps:$4 sm:$0xff]  }
 0x835   : > { %3337 = vmatpush2.bf16.msra.mxu0 %v4996_v47  ;;  %3378 = vmatpush2.bf16.msra.mxu1 %v4998_v48  ;;  %v5587_v47 = vld [vmem:[%s6772_s0 + $0x134] ss:$8 sps:$4 sm:$0xff]   ;;  %v5582_v48 = vld [vmem:[%s6772_s0 + $0x30] ss:$8 sps:$4 sm:$0xff]  }
 0x836   : > { %3338 = vmatprep.subr.bf16.mxu0 %v4989_v49  ;;  %3379 = vmatprep.subr.bf16.mxu1 %v4991_v52  ;;  %v5585_v49 = vld [vmem:[%s6772_s0 + $0x130] ss:$8 sps:$4 sm:$0xff]   ;;  %v5590_v52 = vld [vmem:[%s6772_s0 + $0x24] ss:$8 sps:$4 sm:$0xff]  }
 0x839   : > { %3339 = vmatpush2.bf16.msra.mxu0 %v4988_v57  ;;  %3380 = vmatpush2.bf16.msra.mxu1 %v4990_v58  ;;  %v5599_v57 = vld [vmem:[%s6772_s0 + $0x114] ss:$8 sps:$4 sm:$0xff]   ;;  %v5594_v58 = vld [vmem:[%s6772_s0 + $0x10] ss:$8 sps:$4 sm:$0xff]  }
 0x83a   : > { %3340 = vmatprep.subr.bf16.mxu0 %v4981_v59  ;;  %3381 = vmatprep.subr.bf16.mxu1 %v4983_v16  ;;  %v5597_v59 = vld [vmem:[%s6772_s0 + $0x110] ss:$8 sps:$4 sm:$0xff]   ;;  %v5602_v16 = vld [vmem:[%s6772_s0 + $0x4] ss:$8 sps:$4 sm:$0xff]  }
 0x83d   : > { %3341 = vmatpush2.bf16.msra.mxu0 %v4980_v0  ;;  %3382 = vmatpush2.bf16.msra.mxu1 %v4982_v1  ;;  %v5611_v0 = vld [vmem:[%s6772_s0 + $0x1f4] ss:$8 sps:$4 sm:$0xff]   ;;  %v5606_v1 = vld [vmem:[%s6772_s0 + $0xf0] ss:$8 sps:$4 sm:$0xff]  }
 0x83e   : > { %3342 = vmatprep.subr.bf16.mxu0 %v4973_v4  ;;  %3383 = vmatprep.subr.bf16.mxu1 %v4975_v5  ;;  %v5609_v4 = vld [vmem:[%s6772_s0 + $0x1f0] ss:$8 sps:$4 sm:$0xff]   ;;  %v5614_v5 = vld [vmem:[%s6772_s0 + $0xe4] ss:$8 sps:$4 sm:$0xff]  }
 0x841   : > { %3343 = vmatpush2.bf16.msra.mxu0 %v4972_v11  ;;  %3384 = vmatpush2.bf16.msra.mxu1 %v4974_v12  ;;  %v5623_v11 = vld [vmem:[%s6772_s0 + $0x1d4] ss:$8 sps:$4 sm:$0xff]   ;;  %v5618_v12 = vld [vmem:[%s6772_s0 + $0xd0] ss:$8 sps:$4 sm:$0xff]  }
 0x842   : > { %3344 = vmatprep.subr.bf16.mxu0 %v4965_v14  ;;  %3385 = vmatprep.subr.bf16.mxu1 %v4967_v20  ;;  %v5621_v14 = vld [vmem:[%s6772_s0 + $0x1d0] ss:$8 sps:$4 sm:$0xff]   ;;  %v5626_v20 = vld [vmem:[%s6772_s0 + $0xc4] ss:$8 sps:$4 sm:$0xff]  }
 0x845   : > { %3345 = vmatpush2.bf16.msra.mxu0 %v4964_v24  ;;  %3386 = vmatpush2.bf16.msra.mxu1 %v4966_v25  ;;  %v5635_v24 = vld [vmem:[%s6772_s0 + $0x1b4] ss:$8 sps:$4 sm:$0xff]   ;;  %v5630_v25 = vld [vmem:[%s6772_s0 + $0xb0] ss:$8 sps:$4 sm:$0xff]  }
 0x846   : > { %3346 = vmatprep.subr.bf16.mxu0 %v4957_v26  ;;  %3387 = vmatprep.subr.bf16.mxu1 %v4959_v27  ;;  %v5633_v26 = vld [vmem:[%s6772_s0 + $0x1b0] ss:$8 sps:$4 sm:$0xff]   ;;  %v5638_v27 = vld [vmem:[%s6772_s0 + $0xa4] ss:$8 sps:$4 sm:$0xff]  }
 0x849   : > { %3347 = vmatpush2.bf16.msra.mxu0 %v4956_v2  ;;  %3388 = vmatpush2.bf16.msra.mxu1 %v4958_v28  ;;  %v5641_v2 = vld [vmem:[%s6772_s0 + $0x1a4] ss:$8 sps:$4 sm:$0xff]   ;;  %v5636_v28 = vld [vmem:[%s6772_s0 + $0xa0] ss:$8 sps:$4 sm:$0xff]  }
 0x84a   : > { %4129 = vmatprep.subr.bf16.mxu0 %v5560_v29  ;;  %4170 = vmatprep.subr.bf16.mxu1 %v5563_v30  ;;  %v5639_v29 = vld [vmem:[%s6772_s0 + $0x1a0] ss:$8 sps:$4 sm:$0xff]   ;;  %v5644_v30 = vld [vmem:[%s6772_s0 + $0x94] ss:$8 sps:$4 sm:$0xff]  }
 0x84c   : > { %3349 = vmatmul.mubr.bf16.vlgmr.msra.gmra.mxu0 %v7104_v23  ;;  %3390 = vmatmul.mubr.bf16.vlgmr.msra.gmra.mxu1 %v7104_v23  ;;  %v5578_v23 = vld [vmem:[%s6772_s0 + $0x44] ss:$8 sps:$4 sm:$0xff]  }
 0x84d   : > { %4130 = vmatpush1.bf16.msra.mxu0 %v5558_v31  ;;  %4171 = vmatpush1.bf16.msra.mxu1 %v5561_v34  ;;  %v5647_v31 = vld [vmem:[%s6772_s0 + $0x194] ss:$8 sps:$4 sm:$0xff]   ;;  %v5642_v34 = vld [vmem:[%s6772_s0 + $0x90] ss:$8 sps:$4 sm:$0xff]  }
 0x84e   : > { %4131 = vmatprep.subr.bf16.mxu0 %v5566_v35  ;;  %4172 = vmatprep.subr.bf16.mxu1 %v5569_v36  ;;  %v5645_v35 = vld [vmem:[%s6772_s0 + $0x190] ss:$8 sps:$4 sm:$0xff]   ;;  %v5650_v36 = vld [vmem:[%s6772_s0 + $0x84] ss:$8 sps:$4 sm:$0xff]  }
 0x851   : > { %4132 = vmatpush1.bf16.msra.mxu0 %v5564_v37  ;;  %4173 = vmatpush1.bf16.msra.mxu1 %v5567_v38  ;;  %v5653_v37 = vld [vmem:[%s6772_s0 + $0x184] ss:$8 sps:$4 sm:$0xff]   ;;  %v5648_v38 = vld [vmem:[%s6772_s0 + $0x80] ss:$8 sps:$4 sm:$0xff]  }
 0x852   : > { %4133 = vmatprep.subr.bf16.mxu0 %v5572_v39  ;;  %4174 = vmatprep.subr.bf16.mxu1 %v5575_v40  ;;  %v5651_v39 = vld [vmem:[%s6772_s0 + $0x180] ss:$8 sps:$4 sm:$0xff]   ;;  %v5656_v40 = vld [vmem:[%s6772_s0 + $0x274] ss:$8 sps:$4 sm:$0xff]  }
 0x855   : > { %4134 = vmatpush1.bf16.msra.mxu0 %v5570_v41  ;;  %4175 = vmatpush1.bf16.msra.mxu1 %v5573_v42  ;;  %v5659_v41 = vld [vmem:[%s6772_s0 + $0x374] ss:$8 sps:$4 sm:$0xff]  }
 0x856   : > { %4135 = vmatprep.subr.bf16.mxu0 %v5578_v23  ;;  %4176 = vmatprep.subr.bf16.mxu1 %v5581_v43  ;;  %v7233_v42 = vld [vmem:[%s6791_s3] sm:$0xff] }
 0x857   : > { %v2557_v23 = vrot.slane %v7233_v42, %v6886_v19  ;;  %v2565_v43 = vrot.slane %v7233_v42, %v1464_v3 }
 0x859   : > { %4136 = vmatpush1.bf16.msra.mxu0 %v5576_v44  ;;  %4177 = vmatpush1.bf16.msra.mxu1 %v5579_v45  ;;  %v2561_v44 = vrot.slane %v7233_v42, %v6883_v18  ;;  %v2569_v45 = vrot.slane %v7233_v42, %v1468_v7 }
 0x85a   : > { %4137 = vmatprep.subr.bf16.mxu0 %v5584_v46  ;;  %4178 = vmatprep.subr.bf16.mxu1 %v5587_v47 }
 0x85d   : > { %4138 = vmatpush1.bf16.msra.mxu0 %v5582_v48  ;;  %4179 = vmatpush1.bf16.msra.mxu1 %v5585_v49 }
 0x85e   : > { %4139 = vmatprep.subr.bf16.mxu0 %v5590_v52  ;;  %4180 = vmatprep.subr.bf16.mxu1 %v5593_v53 }
 0x861   : > { %4140 = vmatpush1.bf16.msra.mxu0 %v5588_v54  ;;  %4181 = vmatpush1.bf16.msra.mxu1 %v5591_v55 }
 0x862   : > { %4141 = vmatprep.subr.bf16.mxu0 %v5596_v56  ;;  %4182 = vmatprep.subr.bf16.mxu1 %v5599_v57 }
 0x865   : > { %4142 = vmatpush1.bf16.msra.mxu0 %v5594_v58  ;;  %4183 = vmatpush1.bf16.msra.mxu1 %v5597_v59 }
 0x866   : > { %4143 = vmatprep.subr.bf16.mxu0 %v5602_v16  ;;  %4184 = vmatprep.subr.bf16.mxu1 %v5605_v60 }
 0x869   : > { %4144 = vmatpush1.bf16.msra.mxu0 %v5600_v61  ;;  %4185 = vmatpush1.bf16.msra.mxu1 %v5603_v62 }
 0x86a   : > { %4145 = vmatprep.subr.bf16.mxu0 %v5608_v63  ;;  %4186 = vmatprep.subr.bf16.mxu1 %v5611_v0 }
 0x86d   : > { %4146 = vmatpush2.bf16.msra.mxu0 %v5606_v1  ;;  %4187 = vmatpush2.bf16.msra.mxu1 %v5609_v4 }
 0x86e   : > { %4147 = vmatprep.subr.bf16.mxu0 %v5614_v5  ;;  %4188 = vmatprep.subr.bf16.mxu1 %v5617_v6 }
 0x871   : > { %4148 = vmatpush2.bf16.msra.mxu0 %v5612_v8  ;;  %4189 = vmatpush2.bf16.msra.mxu1 %v5615_v9 }
 0x872   : > { %4149 = vmatprep.subr.bf16.mxu0 %v5620_v10  ;;  %4190 = vmatprep.subr.bf16.mxu1 %v5623_v11 }
 0x875   : > { %4150 = vmatpush2.bf16.msra.mxu0 %v5618_v12  ;;  %4191 = vmatpush2.bf16.msra.mxu1 %v5621_v14 }
 0x876   : > { %4151 = vmatprep.subr.bf16.mxu0 %v5626_v20  ;;  %4192 = vmatprep.subr.bf16.mxu1 %v5629_v21 }
 0x879   : > { %4152 = vmatpush2.bf16.msra.mxu0 %v5624_v22  ;;  %4193 = vmatpush2.bf16.msra.mxu1 %v5627_v51 }
 0x87a   : > { %4153 = vmatprep.subr.bf16.mxu0 %v5632_v50  ;;  %4194 = vmatprep.subr.bf16.mxu1 %v5635_v24 }
 0x87d   : > { %4154 = vmatpush2.bf16.msra.mxu0 %v5630_v25  ;;  %4195 = vmatpush2.bf16.msra.mxu1 %v5633_v26 }
 0x87e   : > { %4155 = vmatprep.subr.bf16.mxu0 %v5638_v27  ;;  %4196 = vmatprep.subr.bf16.mxu1 %v5641_v2 }
 0x881   : > { %4156 = vmatpush2.bf16.msra.mxu0 %v5636_v28  ;;  %4197 = vmatpush2.bf16.msra.mxu1 %v5639_v29 }
 0x882   : > { %4157 = vmatprep.subr.bf16.mxu0 %v5644_v30  ;;  %4198 = vmatprep.subr.bf16.mxu1 %v5647_v31 }
 0x885   : > { %4158 = vmatpush2.bf16.msra.mxu0 %v5642_v34  ;;  %4199 = vmatpush2.bf16.msra.mxu1 %v5645_v35 }
 0x886   : > { %4159 = vmatprep.subr.bf16.mxu0 %v5650_v36  ;;  %4200 = vmatprep.subr.bf16.mxu1 %v5653_v37 }
 0x889   : > { %4160 = vmatpush2.bf16.msra.mxu0 %v5648_v38  ;;  %4201 = vmatpush2.bf16.msra.mxu1 %v5651_v39  ;;  %v5654_v39 = vld [vmem:[%s6772_s0 + $0x270] ss:$8 sps:$4 sm:$0xff]  }
 0x88a   : > { %4211 = vmatprep.subr.bf16.mxu0 %v5656_v40  ;;  %4252 = vmatprep.subr.bf16.mxu1 %v5659_v41  ;;  %v5657_v41 = vld [vmem:[%s6772_s0 + $0x370] ss:$8 sps:$4 sm:$0xff]  }
 0x8cc   : > { %v3268_v46 = vpop.f32.mrf.mxu0  ;;  %v3309_v47 = vpop.f32.mrf.mxu1 }
 0x8cd   : > { %v3269_v48 = vadd.f32 %v3268_v46, %v2557_v23  ;;  %v3310_v49 = vadd.f32 %v3309_v47, %v2565_v43  ;;  %v5662_v43 = vld [vmem:[%s6772_s0 + $0x264] ss:$8 sps:$4 sm:$0xff]   ;;  %v5660_v46 = vld [vmem:[%s6772_s0 + $0x260] ss:$8 sps:$4 sm:$0xff]  }
 0x8ce   : > { %v3270_v52 = vpop.f32.mrf.mxu0  ;;  %v3311_v53 = vpop.f32.mrf.mxu1  ;;  %v5663_v47 = vld [vmem:[%s6772_s0 + $0x360] ss:$8 sps:$4 sm:$0xff]  }
 0x8cf   : > { %v3406_v54 = vmul.f32 0.044715, %v3269_v48  ;;  %v3408_v55 = vmul.f32 0.044715, %v3310_v49  ;;  %v3271_v56 = vadd.f32 %v3270_v52, %v2561_v44  ;;  %v3312_v57 = vadd.f32 %v3311_v53, %v2569_v45  ;;  %v5665_v45 = vld [vmem:[%s6772_s0 + $0x364] ss:$8 sps:$4 sm:$0xff]  }
 0x8d0   : > { %v3272_v58 = vpop.f32.mrf.mxu0  ;;  %v3313_v59 = vpop.f32.mrf.mxu1  ;;  %v3398_v25 = vmul.f32 0.5, %v3269_v48  ;;  %v3400_v29 = vmul.f32 0.5, %v3310_v49  ;;  %v5666_v52 = vld [vmem:[%s6772_s0 + $0x250] ss:$8 sps:$4 sm:$0xff]  }
 0x8d1   : > { %v3414_v3 = vmul.f32 %v3406_v54, %v3269_v48  ;;  %v3416_v16 = vmul.f32 %v3408_v55, %v3310_v49  ;;  %v3407_v60 = vmul.f32 0.044715, %v3271_v56  ;;  %v3409_v61 = vmul.f32 0.044715, %v3312_v57  ;;  %v5669_v53 = vld [vmem:[%s6772_s0 + $0x350] ss:$8 sps:$4 sm:$0xff]  }
 0x8d2   : > { %v3273_v62 = vpop.f32.mrf.mxu0  ;;  %v3314_v63 = vpop.f32.mrf.mxu1  ;;  %v3399_v2 = vmul.f32 0.5, %v3271_v56  ;;  %v3401_v30 = vmul.f32 0.5, %v3312_v57  ;;  %v5674_v54 = vld [vmem:[%s6772_s0 + $0x244] ss:$8 sps:$4 sm:$0xff]   ;;  %v5680_v58 = vld [vmem:[%s6772_s0 + $0x234] ss:$8 sps:$4 sm:$0xff]  }
 0x8d3   : > { %v3422_v0 = vmul.f32 %v3414_v3, %v3269_v48  ;;  %v3424_v7 = vmul.f32 %v3416_v16, %v3310_v49  ;;  %v3415_v1 = vmul.f32 %v3407_v60, %v3271_v56  ;;  %v3417_v4 = vmul.f32 %v3409_v61, %v3312_v57  ;;  %v5677_v55 = vld [vmem:[%s6772_s0 + $0x344] ss:$8 sps:$4 sm:$0xff]   ;;  %v5683_v59 = vld [vmem:[%s6772_s0 + $0x334] ss:$8 sps:$4 sm:$0xff]   ;;  %v5678_v3 = vld [vmem:[%s6772_s0 + $0x230] ss:$8 sps:$4 sm:$0xff]  }
 0x8d4   : > { %v5681_v16 = vld [vmem:[%s6772_s0 + $0x330] ss:$8 sps:$4 sm:$0xff]   ;;  %v5686_v60 = vld [vmem:[%s6772_s0 + $0x224] ss:$8 sps:$4 sm:$0xff]   ;;  %v5684_v62 = vld [vmem:[%s6772_s0 + $0x220] ss:$8 sps:$4 sm:$0xff]  }
 0x8d5   : > { %v3430_v5 = vadd.f32 %v3422_v0, %v3269_v48  ;;  %v3432_v6 = vadd.f32 %v3424_v7, %v3310_v49  ;;  %v3423_v8 = vmul.f32 %v3415_v1, %v3271_v56  ;;  %v3425_v9 = vmul.f32 %v3417_v4, %v3312_v57  ;;  %v5668_v48 = vld [vmem:[%s6772_s0 + $0x254] ss:$8 sps:$4 sm:$0xff]   ;;  %v5689_v61 = vld [vmem:[%s6772_s0 + $0x324] ss:$8 sps:$4 sm:$0xff]   ;;  %v5687_v63 = vld [vmem:[%s6772_s0 + $0x320] ss:$8 sps:$4 sm:$0xff]  }
 0x8d6   : > { %v5671_v49 = vld [vmem:[%s6772_s0 + $0x354] ss:$8 sps:$4 sm:$0xff]   ;;  %v5690_v1 = vld [vmem:[%s6772_s0 + $0x210] ss:$8 sps:$4 sm:$0xff]   ;;  %v2580_v4 = vsub.s32 6, %v6880_v17 }
 0x8d7   : > { %v3438_v10 = vmul.f32 0.7978846, %v3430_v5  ;;  %v3440_v11 = vmul.f32 0.7978846, %v3432_v6  ;;  %v3431_v12 = vadd.f32 %v3423_v8, %v3271_v56  ;;  %v3433_v14 = vadd.f32 %v3425_v9, %v3312_v57  ;;  %v5672_v56 = vld [vmem:[%s6772_s0 + $0x240] ss:$8 sps:$4 sm:$0xff]  }
 0x8d8   : > { %v5675_v57 = vld [vmem:[%s6772_s0 + $0x340] ss:$8 sps:$4 sm:$0xff]   ;;  %v5692_v0 = vld [vmem:[%s6772_s0 + $0x214] ss:$8 sps:$4 sm:$0xff]   ;;  %v5693_v5 = vld [vmem:[%s6772_s0 + $0x310] ss:$8 sps:$4 sm:$0xff]  }
 0x8d9   : > { %v3439_v20 = vmul.f32 0.7978846, %v3431_v12  ;;  %v3441_v21 = vmul.f32 0.7978846, %v3433_v14  ;;  %5762 = vtanh.f32 %v3438_v10  ;;  %v5695_v7 = vld [vmem:[%s6772_s0 + $0x314] ss:$8 sps:$4 sm:$0xff]   ;;  %v2573_v10 = vrot.slane %v7233_v42, %v1472_v32 }
 0x8da   : > { %5764 = vtanh.f32 %v3440_v11  ;;  %v5698_v6 = vld [vmem:[%s6772_s0 + $0x204] ss:$8 sps:$4 sm:$0xff]   ;;  %v2584_v9 = vsub.s32 7, %v6880_v17  ;;  %v2581_v11 = vrot.slane %v7233_v42, %v2580_v4  ;;  %v5696_v12 = vld [vmem:[%s6772_s0 + $0x200] ss:$8 sps:$4 sm:$0xff]  }
 0x8db   : > { %5766 = vtanh.f32 %v3439_v20  ;;  %v5701_v8 = vld [vmem:[%s6772_s0 + $0x304] ss:$8 sps:$4 sm:$0xff]   ;;  %v5699_v14 = vld [vmem:[%s6772_s0 + $0x300] ss:$8 sps:$4 sm:$0xff]   ;;  %v5704_v20 = vld [vmem:[%s6772_s0 + $0x2f4] ss:$8 sps:$4 sm:$0xff]  }
 0x8dc   : > { %5768 = vtanh.f32 %v3441_v21  ;;  %v2577_v21 = vrot.slane %v7233_v42, %v1476_v33  ;;  %v5705_v17 = vld [vmem:[%s6772_s0 + $0x3f0] ss:$8 sps:$4 sm:$0xff]   ;;  %v5731_v4 = vld [vmem:[%s6772_s0 + $0x3b4] ss:$8 sps:$4 sm:$0xff]  }
 0x8e6   : > { %v5763_v22 = vpop.eup %5762 }
 0x8e7   : > { %v5765_v51 = vpop.eup %5764  ;;  %v3454_v50 = vadd.f32 1.0, %v5763_v22  ;;  %v2585_v22 = vrot.slane %v7233_v42, %v2584_v9  ;;  %v5737_v9 = vld [vmem:[%s6772_s0 + $0x3a4] ss:$8 sps:$4 sm:$0xff]  }
 0x8e8   : > { %v5767_v24 = vpop.eup %5766  ;;  %v3456_v26 = vadd.f32 1.0, %v5765_v51  ;;  %v5707_v51 = vld [vmem:[%s6772_s0 + $0x3f4] ss:$8 sps:$4 sm:$0xff]  }
 0x8e9   : > { %v5769_v27 = vpop.eup %5768  ;;  %v3455_v28 = vadd.f32 1.0, %v5767_v24  ;;  %v3462_v34 = vmul.f32 %v3454_v50, %v3398_v25 }
 0x8ea   : > { %v3457_v31 = vadd.f32 1.0, %v5769_v27  ;;  %v3464_v36 = vmul.f32 %v3456_v26, %v3400_v29  ;;  %v5702_v26 = vld [vmem:[%s6772_s0 + $0x2f0] ss:$8 sps:$4 sm:$0xff]  }
 0x8eb   : > { %v3463_v35 = vmul.f32 %v3455_v28, %v3399_v2  ;;  %v3470_v23 = vpack.c.bf16 %v3462_v34, %v3462_v34  ;;  %v5710_v28 = vld [vmem:[%s6772_s0 + $0x2e4] ss:$8 sps:$4 sm:$0xff]  }
 0x8ec   : > { %v3465_v37 = vmul.f32 %v3457_v31, %v3401_v30  ;;  %v3472_v44 = vpack.c.bf16 %v3464_v36, %v3464_v36  ;;  %v5713_v31 = vld [vmem:[%s6772_s0 + $0x3e4] ss:$8 sps:$4 sm:$0xff]  }
 0x8ed   : > { %v3471_v38 = vpack.c.bf16 %v3463_v35, %v3463_v35 }
 0x8ee   : > { %v3473_v40 = vpack.c.bf16 %v3465_v37, %v3465_v37 }
 0x8ef   : > { %4161 = vmatprep.mubr.bf16.mxu0 %v3471_v38 }
 0x8f0   : > { %4202 = vmatprep.mubr.bf16.mxu1 %v3473_v40  ;;  %4162 = vmatmul.mubr.bf16.vlgmr.msra.gmra.mxu0 %v3470_v23  ;;  %v5708_v40 = vld [vmem:[%s6772_s0 + $0x2e0] ss:$8 sps:$4 sm:$0xff]  }
 0x8f1   : > { %4203 = vmatmul.mubr.bf16.vlgmr.msra.gmra.mxu1 %v3472_v44  ;;  %4212 = vmatpush1.bf16.msra.mxu0 %v5654_v39  ;;  %v5716_v44 = vld [vmem:[%s6772_s0 + $0x2d4] ss:$8 sps:$4 sm:$0xff]  }
 0x8f2   : > { %4253 = vmatpush1.bf16.msra.mxu1 %v5657_v41  ;;  %4213 = vmatprep.subr.bf16.mxu0 %v5662_v43  ;;  %v5711_v43 = vld [vmem:[%s6772_s0 + $0x3e0] ss:$8 sps:$4 sm:$0xff]  }
 0x8f3   : > { %4254 = vmatprep.subr.bf16.mxu1 %v5665_v45 }
 0x8f5   : > { %4214 = vmatpush1.bf16.msra.mxu0 %v5660_v46 }
 0x8f6   : > { %4255 = vmatpush1.bf16.msra.mxu1 %v5663_v47  ;;  %4215 = vmatprep.subr.bf16.mxu0 %v5668_v48 }
 0x8f7   : > { %4256 = vmatprep.subr.bf16.mxu1 %v5671_v49  ;;  %v5719_v49 = vld [vmem:[%s6772_s0 + $0x3d4] ss:$8 sps:$4 sm:$0xff]  }
 0x8f9   : > { %4216 = vmatpush1.bf16.msra.mxu0 %v5666_v52 }
 0x8fa   : > { %4257 = vmatpush1.bf16.msra.mxu1 %v5669_v53  ;;  %4217 = vmatprep.subr.bf16.mxu0 %v5674_v54  ;;  %v5714_v54 = vld [vmem:[%s6772_s0 + $0x2d0] ss:$8 sps:$4 sm:$0xff]  }
 0x8fb   : > { %4258 = vmatprep.subr.bf16.mxu1 %v5677_v55 }
 0x8fd   : > { %4218 = vmatpush1.bf16.msra.mxu0 %v5672_v56 }
 0x8fe   : > { %4259 = vmatpush1.bf16.msra.mxu1 %v5675_v57  ;;  %4219 = vmatprep.subr.bf16.mxu0 %v5680_v58  ;;  %v5717_v57 = vld [vmem:[%s6772_s0 + $0x3d0] ss:$8 sps:$4 sm:$0xff]   ;;  %v5722_v58 = vld [vmem:[%s6772_s0 + $0x2c4] ss:$8 sps:$4 sm:$0xff]  }
 0x8ff   : > { %4260 = vmatprep.subr.bf16.mxu1 %v5683_v59 }
 0x901   : > { %4220 = vmatpush1.bf16.msra.mxu0 %v5678_v3 }
 0x902   : > { %4261 = vmatpush1.bf16.msra.mxu1 %v5681_v16  ;;  %4221 = vmatprep.subr.bf16.mxu0 %v5686_v60  ;;  %v5725_v16 = vld [vmem:[%s6772_s0 + $0x3c4] ss:$8 sps:$4 sm:$0xff]  }
 0x903   : > { %4262 = vmatprep.subr.bf16.mxu1 %v5689_v61 }
 0x905   : > { %4222 = vmatpush1.bf16.msra.mxu0 %v5684_v62  ;;  %v5720_v62 = vld [vmem:[%s6772_s0 + $0x2c0] ss:$8 sps:$4 sm:$0xff]  }
 0x906   : > { %4263 = vmatpush1.bf16.msra.mxu1 %v5687_v63  ;;  %4223 = vmatprep.subr.bf16.mxu0 %v5692_v0 }
 0x907   : > { %4264 = vmatprep.subr.bf16.mxu1 %v5695_v7  ;;  %v5723_v7 = vld [vmem:[%s6772_s0 + $0x3c0] ss:$8 sps:$4 sm:$0xff]  }
 0x909   : > { %4224 = vmatpush1.bf16.msra.mxu0 %v5690_v1  ;;  %v5728_v1 = vld [vmem:[%s6772_s0 + $0x2b4] ss:$8 sps:$4 sm:$0xff]  }
 0x90a   : > { %4265 = vmatpush1.bf16.msra.mxu1 %v5693_v5  ;;  %4225 = vmatprep.subr.bf16.mxu0 %v5698_v6  ;;  %v5726_v5 = vld [vmem:[%s6772_s0 + $0x2b0] ss:$8 sps:$4 sm:$0xff]  }
 0x90b   : > { %4266 = vmatprep.subr.bf16.mxu1 %v5701_v8  ;;  %v5729_v6 = vld [vmem:[%s6772_s0 + $0x3b0] ss:$8 sps:$4 sm:$0xff]   ;;  %v5734_v8 = vld [vmem:[%s6772_s0 + $0x2a4] ss:$8 sps:$4 sm:$0xff]  }
 0x90c   : > { %v3350_v50 = vpop.f32.mrf.mxu0  ;;  %v3391_v32 = vpop.f32.mrf.mxu1 }
 0x90d   : > { %v7287_v24 = vadd.f32 %v3350_v50, %v2573_v10  ;;  %v7289_v25 = vadd.f32 %v3391_v32, %v2581_v11  ;;  %4226 = vmatpush1.bf16.msra.mxu0 %v5696_v12  ;;  %v5732_v10 = vld [vmem:[%s6772_s0 + $0x2a0] ss:$8 sps:$4 sm:$0xff]   ;;  %v5740_v12 = vld [vmem:[%s6772_s0 + $0x294] ss:$8 sps:$4 sm:$0xff]   ;;  %v5749_v32 = vld [vmem:[%s6772_s0 + $0x384] ss:$8 sps:$4 sm:$0xff]  }
 0x90e   : > { %4267 = vmatpush1.bf16.msra.mxu1 %v5699_v14  ;;  %v3352_v27 = vpop.f32.mrf.mxu0  ;;  %v3393_v2 = vpop.f32.mrf.mxu1  ;;  %4227 = vmatprep.subr.bf16.mxu0 %v5704_v20  ;;  %v5735_v11 = vld [vmem:[%s6772_s0 + $0x3a0] ss:$8 sps:$4 sm:$0xff]   ;;  %v5743_v14 = vld [vmem:[%s6772_s0 + $0x394] ss:$8 sps:$4 sm:$0xff]   ;;  %v5738_v20 = vld [vmem:[%s6772_s0 + $0x290] ss:$8 sps:$4 sm:$0xff]  }
 0x90f   : > { %v3410_v33 = vmul.f32 0.044715, %v7287_v24  ;;  %v3412_v42 = vmul.f32 0.044715, %v7289_v25  ;;  %v7296_v29 = vadd.f32 %v3352_v27, %v2577_v21  ;;  %v7298_v30 = vadd.f32 %v3393_v2, %v2585_v22  ;;  %4268 = vmatprep.subr.bf16.mxu1 %v5707_v51  ;;  %v5741_v22 = vld [vmem:[%s6772_s0 + $0x390] ss:$8 sps:$4 sm:$0xff]  }
 0x910   : > { %v3354_v34 = vpop.f32.mrf.mxu0  ;;  %v3395_v35 = vpop.f32.mrf.mxu1  ;;  %v5746_v51 = vld [vmem:[%s6772_s0 + $0x284] ss:$8 sps:$4 sm:$0xff]   ;;  %v3402_v2 = vmul.f32 0.5, %v7287_v24 }
 0x911   : > { %v3418_v36 = vmul.f32 %v3410_v33, %v7287_v24  ;;  %v3420_v37 = vmul.f32 %v3412_v42, %v7289_v25  ;;  %v3411_v38 = vmul.f32 0.044715, %v7296_v29  ;;  %v3413_v39 = vmul.f32 0.044715, %v7298_v30  ;;  %4228 = vmatpush2.bf16.msra.mxu0 %v5702_v26  ;;  %v5744_v33 = vld [vmem:[%s6772_s0 + $0x280] ss:$8 sps:$4 sm:$0xff]  }
 0x912   : > { %4269 = vmatpush2.bf16.msra.mxu1 %v5705_v17  ;;  %v3355_v41 = vpop.f32.mrf.mxu0  ;;  %v3396_v23 = vpop.f32.mrf.mxu1  ;;  %4229 = vmatprep.subr.bf16.mxu0 %v5710_v28  ;;  %v3403_v42 = vmul.f32 0.5, %v7296_v29  ;;  %v3404_v34 = vmul.f32 0.5, %v7289_v25  ;;  %v5747_v35 = vld [vmem:[%s6772_s0 + $0x380] ss:$8 sps:$4 sm:$0xff]  }
 0x913   : > { %v3426_v45 = vmul.f32 %v3418_v36, %v7287_v24  ;;  %v3428_v46 = vmul.f32 %v3420_v37, %v7289_v25  ;;  %v3419_v47 = vmul.f32 %v3411_v38, %v7296_v29  ;;  %v3421_v48 = vmul.f32 %v3413_v39, %v7298_v30  ;;  %4270 = vmatprep.subr.bf16.mxu1 %v5713_v31 }
 0x914   : > { %v3405_v36 = vmul.f32 0.5, %v7298_v30 }
 0x915   : > { %v3434_v52 = vadd.f32 %v3426_v45, %v7287_v24  ;;  %v3436_v53 = vadd.f32 %v3428_v46, %v7289_v25  ;;  %4230 = vmatpush2.bf16.msra.mxu0 %v5708_v40  ;;  %v3427_v55 = vmul.f32 %v3419_v47, %v7296_v29  ;;  %v3429_v56 = vmul.f32 %v3421_v48, %v7298_v30 }
 0x916   : > { %4271 = vmatpush2.bf16.msra.mxu1 %v5711_v43  ;;  %4231 = vmatprep.subr.bf16.mxu0 %v5716_v44 }
 0x917   : > { %v3442_v59 = vmul.f32 0.7978846, %v3434_v52  ;;  %v3444_v3 = vmul.f32 0.7978846, %v3436_v53  ;;  %4272 = vmatprep.subr.bf16.mxu1 %v5719_v49  ;;  %v3435_v60 = vadd.f32 %v3427_v55, %v7296_v29  ;;  %v3437_v61 = vadd.f32 %v3429_v56, %v7298_v30  ;;  %v1405_v52 = vld [vmem:[%s7542_s19] sm:$0x3] }
 0x918   : > { %v3482_v53 = vrot.slane %v1405_v52, %v6886_v19 }
 0x919   : > { %4232 = vmatpush2.bf16.msra.mxu0 %v5714_v54  ;;  %v3443_v63 = vmul.f32 0.7978846, %v3435_v60  ;;  %v3445_v0 = vmul.f32 0.7978846, %v3437_v61  ;;  %5770 = vtanh.f32 %v3442_v59  ;;  %v3486_v54 = vrot.slane %v1405_v52, %v6883_v18 }
 0x91a   : > { %4273 = vmatpush2.bf16.msra.mxu1 %v5717_v57  ;;  %4233 = vmatprep.subr.bf16.mxu0 %v5722_v58  ;;  %5772 = vtanh.f32 %v3444_v3 }
 0x91b   : > { %4274 = vmatprep.subr.bf16.mxu1 %v5725_v16  ;;  %5774 = vtanh.f32 %v3443_v63 }
 0x91c   : > { %5776 = vtanh.f32 %v3445_v0 }
 0x91d   : > { %4234 = vmatpush2.bf16.msra.mxu0 %v5720_v62 }
 0x91e   : > { %4275 = vmatpush2.bf16.msra.mxu1 %v5723_v7  ;;  %4235 = vmatprep.subr.bf16.mxu0 %v5728_v1 }
 0x91f   : > { %4276 = vmatprep.subr.bf16.mxu1 %v5731_v4 }
 0x921   : > { %4236 = vmatpush2.bf16.msra.mxu0 %v5726_v5 }
 0x922   : > { %4277 = vmatpush2.bf16.msra.mxu1 %v5729_v6  ;;  %4237 = vmatprep.subr.bf16.mxu0 %v5734_v8 }
 0x923   : > { %4278 = vmatprep.subr.bf16.mxu1 %v5737_v9 }
 0x925   : > { %4238 = vmatpush2.bf16.msra.mxu0 %v5732_v10 }
 0x926   : > { %v5771_v21 = vpop.eup %5770  ;;  %4279 = vmatpush2.bf16.msra.mxu1 %v5735_v11  ;;  %4239 = vmatprep.subr.bf16.mxu0 %v5740_v12 }
 0x927   : > { %v5773_v50 = vpop.eup %5772  ;;  %4280 = vmatprep.subr.bf16.mxu1 %v5743_v14  ;;  %v3458_v26 = vadd.f32 1.0, %v5771_v21 }
 0x928   : > { %v5775_v27 = vpop.eup %5774  ;;  %v3460_v17 = vadd.f32 1.0, %v5773_v50 }
 0x929   : > { %v5777_v28 = vpop.eup %5776  ;;  %4240 = vmatpush2.bf16.msra.mxu0 %v5738_v20  ;;  %v3459_v31 = vadd.f32 1.0, %v5775_v27  ;;  %v3466_v38 = vmul.f32 %v3458_v26, %v3402_v2 }
 0x92a   : > { %4281 = vmatpush2.bf16.msra.mxu1 %v5741_v22  ;;  %4241 = vmatprep.subr.bf16.mxu0 %v5746_v51  ;;  %v3461_v37 = vadd.f32 1.0, %v5777_v28  ;;  %v3468_v40 = vmul.f32 %v3460_v17, %v3404_v34 }
 0x92b   : > { %4282 = vmatprep.subr.bf16.mxu1 %v5749_v32  ;;  %v3467_v39 = vmul.f32 %v3459_v31, %v3403_v42  ;;  %v3474_v29 = vpack.c.bf16 %v3466_v38, %v3466_v38 }
 0x92c   : > { %v3469_v24 = vmul.f32 %v3461_v37, %v3405_v36  ;;  %v3476_v43 = vpack.c.bf16 %v3468_v40, %v3468_v40 }
 0x92d   : > { %4242 = vmatpush2.bf16.msra.mxu0 %v5744_v33  ;;  %v3475_v41 = vpack.c.bf16 %v3467_v39, %v3467_v39 }
 0x92e   : > { %4283 = vmatpush2.bf16.msra.mxu1 %v5747_v35  ;;  %v3477_v23 = vpack.c.bf16 %v3469_v24, %v3469_v24 }
 0x92f   : > { %4243 = vmatprep.mubr.bf16.mxu0 %v3475_v41 }
 0x930   : > { %4284 = vmatprep.mubr.bf16.mxu1 %v3477_v23  ;;  %4244 = vmatmul.mubr.bf16.vlgmr.msra.gmra.mxu0 %v3474_v29 }
 0x931   : > { %4285 = vmatmul.mubr.bf16.vlgmr.msra.gmra.mxu1 %v3476_v43 }
 0x9b0   : > { %v4163_v25 = vpop.f32.mrf.mxu0 }
 0x9b1   : > { %v4204_v44 = vpop.f32.mrf.mxu1  ;;  %v4164_v55 = vadd.f32 %v4163_v25, %v3482_v53 }
 0x9b2   : > { %v4165_v30 = vpop.f32.mrf.mxu0 }
 0x9b3   : > { %v4206_v45 = vpop.f32.mrf.mxu1  ;;  %v4166_v56 = vadd.f32 %v4165_v30, %v3486_v54  ;;  %v4205_v57 = vadd.f32 %v4204_v44, %v4164_v55 }
 0x9b4   : > { %v4167_v46 = vpop.f32.mrf.mxu0 }
 0x9b5   : > { %v4208_v47 = vpop.f32.mrf.mxu1  ;;  %v4207_v59 = vadd.f32 %v4206_v45, %v4166_v56 }
 0x9b6   : > { %v4168_v48 = vpop.f32.mrf.mxu0 }
 0x9b7   : > { %v4209_v49 = vpop.f32.mrf.mxu1 }
 0x9f0   : > { %v4245_v58 = vpop.f32.mrf.mxu0 }
 0x9f1   : > { %v4246_v3 = vadd.f32 %v4245_v58, %v4205_v57  ;;  %v4286_v16 = vpop.f32.mrf.mxu1 }
 0x9f2   : > { %v4247_v60 = vpop.f32.mrf.mxu0 }
 0x9f3   : > { %v4287_v61 = vadd.f32 %v4286_v16, %v4246_v3  ;;  %v4248_v62 = vadd.f32 %v4247_v60, %v4207_v59  ;;  %v4288_v63 = vpop.f32.mrf.mxu1 }
 0x9f4   : > { %v4249_v0 = vpop.f32.mrf.mxu0 }
 0x9f5   : > { %v4293_v7 = vadd.f32 %v4287_v61, %v7006_v13  ;;  %v4289_v1 = vadd.f32 %v4288_v63, %v4248_v62  ;;  %v4290_v4 = vpop.f32.mrf.mxu1  ;;  %4300 = sbr.rel (%p5144_p11) target bundleno = 2867 (0xb33), region = 140 }
 0x9f6   : > { %v4250_v5 = vpop.f32.mrf.mxu0 }
 0x9f7   : > { %4295 = vst [vmem:[#allocation2] sm:$0xff] %v4293_v7  ;;  %v4294_v6 = vadd.f32 %v4289_v1, %v7008_v15  ;;  %v4291_v8 = vpop.f32.mrf.mxu1 }
 0x9f9   : > { %4296 = vst [vmem:[#allocation2 + $0x8] sm:$0xff] %v4294_v6 }
 0x9fa   : > { %v4303_v9 = vadd.f32 %v4294_v6, %v4293_v7  ;;  %v4301_v15 = vld [vmem:[%s7544_s1] sm:$0x3] }
 0x9fb   : > { %v4302_v32 = vld [vmem:[%s7545_s16] sm:$0x3]  ;;  %v4323_v26 = vrot.slane %v4301_v15, %v6886_v19  ;;  %v4327_v27 = vrot.slane %v4301_v15, %v6883_v18 }
 0x9fc   : > { %4304 = vadd.xlane.f32.xlu0 %v4303_v9  ;;  %v4336_v33 = vrot.slane %v4302_v32, %v6886_v19  ;;  %v4340_v42 = vrot.slane %v4302_v32, %v6883_v18 }
 0xa85   : > { %v4305_v10 = vpop.xlane.xlu0 %4304 }
 0xa86   : > { %v4306_v11 = vmul.f32 0.00390625, %v4305_v10 }
 0xa88   : > { %v4307_v12 = vsub.f32 %v4293_v7, %v4306_v11  ;;  %v4308_v14 = vsub.f32 %v4294_v6, %v4306_v11 }
 0xa8a   : > { %v4309_v20 = vmul.f32 %v4307_v12, %v4307_v12  ;;  %v4310_v21 = vmul.f32 %v4308_v14, %v4308_v14 }
 0xa8c   : > { %v4311_v13 = vadd.f32 %v4310_v21, %v4309_v20 }
 0xa8e   : > { %4312 = vadd.xlane.f32.xlu0 %v4311_v13 }
 0xb17   : > { %v4313_v22 = vpop.xlane.xlu0 %4312 }
 0xb18   : > { %v4314_v51 = vmul.f32 0.00390625, %v4313_v22 }
 0xb1a   : > { %v4315_v50 = vadd.f32 1e-05, %v4314_v51 }
 0xb1c   : > { %5780 = vrsqrt.f32 %v4315_v50 }
 0xb29   : > { %v5781_v2 = vpop.eup %5780 }
 0xb2a   : > { %v4317_v17 = vmul.f32 %v5781_v2, %v4307_v12  ;;  %v4318_v28 = vmul.f32 %v5781_v2, %v4308_v14 }
 0xb2c   : > { %v4330_v31 = vmul.f32 %v4323_v26, %v4317_v17  ;;  %v4331_v34 = vmul.f32 %v4327_v27, %v4318_v28 }
 0xb2e   : > { %v4343_v35 = vadd.f32 %v4336_v33, %v4330_v31  ;;  %v4344_v36 = vadd.f32 %v4340_v42, %v4331_v34 }
 0xb30   : > { %v5160_v37 = vpack.c.bf16 %v4344_v36, %v4343_v35 }
 0xb32   : > { %4353 = vst [vmem:[%s6793_s13] sm:$0xff] %v5160_v37 }
 0xb33 PF: > { %s7546_s20 = sld [smem:[#allocation39_spill]]  ;;  %s4369_s14 = sshll.u32 %s6793_s13, 4  ;;  %s4370_s14 = int_to_ptr.vmem [resolvable:$true] %s4369_s14 }
 0xb34   : > { %s7548_s3 = sld [smem:[#allocation67_spill]]  ;;  %s4355_s21 = scalar_lea.sflag [#allocation5], %s6707_s28 }
 0xb35   : > { %s6118_s4 = scalar_lea.vmem %s4370_s14, 128  ;;  %s6289_s27 = smov [#allocation23]  }
 0xb36   : > { %p6119_p8 = scmp.ne.s32.totalorder %s4370_s14, %s6118_s4  ;;  %s6122_s15 = sshll.u32 %s6289_s27, 4  ;;  %s6123_s15 = int_to_ptr.vmem [resolvable:$false] %s6122_s15 }
 0xb37   : > { %s6124_s9 = scalar_lea.vmem %s6123_s15, 256  ;;  %p6125_p1 = scmp.lt.s32.totalorder %s4370_s14, %s6123_s15 }
 0xb38   : > { %p6120_p6 = pnand %p6119_p8, %p6498_p7  ;;  %p6126_p12 = scmp.lt.s32.totalorder %s6124_s9, %s6118_s4 }
 0xb39   : > { %s5161_s7 = sshll.u32 %s7546_s20, 7 }
 0xb3a   : > { %s4367_s26 = scalar_lea.hbm %s7548_s3, %s5161_s7  ;;  %p6121_p9 = pneg %p6120_p6 }
 0xb3b   : > { %p6127_p10 = por %p6126_p12, %p6125_p1 }
 0xb3d   : > { %p6128_p0 = pnand %p6127_p10, %p6121_p9 }
 0xb3f   : > { %6131 = shalt.err (!%p6128_p0)
}
 0xb40   : > { %s6132_s5 = scalar_lea.hbm %s4367_s26, 128  ;;  %s6136_s29 = scalar_lea.hbm %s7548_s3, 256 }
 0xb41   : > { %p6133_p5 = scmp.ne.s32.totalorder %s4367_s26, %s6132_s5  ;;  %p6137_p3 = scmp.lt.s32.totalorder %s4367_s26, %s7548_s3 }
 0xb42   : > { %p6138_p13 = scmp.lt.s32.totalorder %s6136_s29, %s6132_s5 }
 0xb43   : > { %p6134_p2 = pnand %p6133_p5, %p6498_p7 }
 0xb44   : > { %p6139_p11 = por %p6138_p13, %p6137_p3 }
 0xb45   : > { %p6135_p4 = pneg %p6134_p2 }
 0xb47   : > { %p6140_p8 = pnand %p6139_p11, %p6135_p4 }
 0xb49   : > { %6143 = shalt.err (!%p6140_p8)
}
 0xb4a   : > { %5224 = dma.vmem_to_hbm [thread:$0]  (%p6498_p7), %s4370_s14, 128, %s4367_s26, %s4355_s21  }
 0xb4b PF: > { %s7549_s13 = sld [smem:[#allocation41_spill]] }
 0xb4c   : > { %s7550_s19 = sld [smem:[#allocation35_spill]] }
 0xb4d   : > { %s7551_s25 = sld [smem:[#allocation50_spill]] }
 0xb51   : > { %p5268_p6 = scmp.ge.s32.totalorder %s7549_s13, 2 }
 0xb52   : > { %s4381_s18 = sand.u32 1, %s7550_s19  }
 0xb53   : > { %p7552_p9 = scmp.ne.s32.totalorder %s7551_s25, 0  ;;  %s4382_s17 = scalar_lea.sflag [#allocation5], %s4381_s18 }
 0xb55   : > { %p5264_p1 = pnand %p5268_p6, %p7552_p9 }
 0xb57   : > { %p5265_p12 = pneg %p5264_p1 }
 0xb59   : > { %6221 = dma.done.wait (%p5265_p12), %s4382_s17, 128  }
 0xb5a   : > { %6223 = vsyncadd (%p5265_p12), %s4382_s17, 4294967168  ;;  %s50_s0 = sadd.s32 1, %s7549_s13   ;;  %s7553_s21 = sld [smem:[#allocation33_spill]] }
 0xb5b   : > { %p47_p10 = scmp.ge.s32.totalorder %s50_s0, 6   ;;  %s7554_s22 = sld [smem:[#allocation34_spill]] }
 0xb5c   : > { %s7555_s23 = sld [smem:[#allocation46_spill]]  ;;  %s7562_s28 = smov %s6262_s30 }
 0xb5d   : > { %s7556_s24 = sld [smem:[#allocation36_spill]] }
 0xb5e   : > { %s7557_s25 = sld [smem:[#allocation37_spill]] }
 0xb5f   : > { %s7558_s26 = sld [smem:[#allocation47_spill]] }
 0xb60   : > { %s7559_s27 = sld [smem:[#allocation40_spill]] }
 0xb61   : > { %s7560_s29 = sld [smem:[#allocation43_spill]] }
 0xb62   : > { %s7561_s1 = sld [smem:[#allocation44_spill]] }
 0xb64   :  { %49 = sbr.rel (!%p47_p10) target bundleno = 37 (0x25), region = 276 }
 0xb68   : > { %s7563_s30 = smov %s7561_s1 }
 0xb69   :  { %4387 = vsyncpa [#allocation4], 1 }
 0xb6a   :  { %4389 = vsyncpa [#allocation4 + $0x1], 1 }
 0xb6b   :  { %4390 = vsyncpa [#allocation7], 1 }
 0xb6c   :  { %4392 = vsyncpa [#allocation7 + $0x1], 1 }
 0xb6d   :  { %4393 = vsyncpa [#allocation10], 1 }
 0xb6e   :  { %4395 = vsyncpa [#allocation10 + $0x1], 1 }
 0xb6f   :  { %4396 = vsyncpa [#allocation13], 1 }
 0xb70   :  { %4398 = vsyncpa [#allocation13 + $0x1], 1 }
 0xb71   :  { %4399 = vsyncpa [#allocation16], 1 }
 0xb72   :  { %4401 = vsyncpa [#allocation16 + $0x1], 1 }
 0xb73   :  { %4402 = vsyncpa [#allocation19], 1 }
 0xb74   :  { %4404 = vsyncpa [#allocation19 + $0x1], 1 }
 0xb75   :  { %4405 = vsyncpa [#allocation22], 1 }
 0xb76   :  { %4407 = vsyncpa [#allocation22 + $0x1], 1 }
 0xb77   :  { %4408 = vsyncpa [#allocation5], 1 }
 0xb78   :  { %4410 = vsyncpa [#allocation5 + $0x1], 1 }

</bundles_post_ra>
